<compile_context>
chip_gen: v6e
topology: v6e:2x2x1
jax: 0.10.0
libtpu: 0.0.40
codegen_flags: <defaults>
</compile_context>

<pallas_src>
import functools
import math

import jax
import jax.numpy as jnp
from jax.experimental import pallas as pl
from jax.experimental.pallas import tpu as pltpu


# ----------------------------------------------------------------------------
# helpers
# ----------------------------------------------------------------------------
def _round_up(x, m):
    return ((x + m - 1) // m) * m


def _cdiv(a, b):
    return -(-a // b)


def _choose_tiling(m):
    """Pick (Mp, tn): M padded to Mp = grid*tn, tn a multiple of 128.

    Few large tiles (per-grid-step overhead ~0.35us), but >=2 steps where
    possible so both v7x TensorCores are used (grid axis is 'parallel').
    """
    chunks = _cdiv(m, 128)
    if chunks <= 1:
        g = 1
    elif chunks <= 32:
        g = 2
    else:
        g = 4
    tn = 128 * _cdiv(chunks, g)
    return g * tn, tn


# ----------------------------------------------------------------------------
# Pallas kernel: O = act(A @ B), A:(Ra, K) full, B:(K, tn) tile, O:(Ra, tn).
# The grid runs over lane-dense column tiles of B / O.
# ----------------------------------------------------------------------------
def _matmul_act_kernel(a_ref, b_ref, o_ref, *, act):
    y = jnp.dot(a_ref[...], b_ref[...], preferred_element_type=jnp.float32)
    if act == "relu":
        y = jnp.maximum(y, 0.0)
    elif act == "sigmoid":
        y = jax.nn.sigmoid(y)            # exp goes to the EUP slot
    o_ref[...] = y.astype(o_ref.dtype)


def matmul_act(a, b, act, out_dtype, tn):
    """act(a @ b) with a:(Ra,K) bf16, b:(K,Mp) bf16, Mp % tn == 0."""
    ra, k = a.shape
    k2, mp = b.shape
    assert k == k2 and mp % tn == 0, (a.shape, b.shape, tn)
    grid = (mp // tn,)
    kernel = functools.partial(_matmul_act_kernel, act=act)
    return pl.pallas_call(
        kernel,
        out_shape=jax.ShapeDtypeStruct((ra, mp), out_dtype),
        grid=grid,
        in_specs=[
            pl.BlockSpec((ra, k), lambda j: (0, 0)),   # small weight, resident
            pl.BlockSpec((k, tn), lambda j: (0, j)),   # lane-dense patch tile
        ],
        out_specs=pl.BlockSpec((ra, tn), lambda j: (0, j)),  # lane-dense store
        compiler_params=pltpu.CompilerParams(
            dimension_semantics=("parallel",),
        ),
    )(a, b)


# ----------------------------------------------------------------------------
# Layer 1: ConvTranspose2d(Cin, Cout, 4, stride=1, padding=0) on a 1x1 input.
# out[n,co,kh,kw] = sum_ci x[n,ci] * w[ci,co,kh,kw]  ->  one GEMM.
# ----------------------------------------------------------------------------
def conv_transpose_1x1_act(x, w, act, out_dtype):
    n, cin, h, ww = x.shape
    assert h == 1 and ww == 1
    _, cout, k, _ = w.shape

    a = x.reshape(n, cin)
    b = w.reshape(cin, cout * k * k)

    kp = _round_up(cin, 16)                       # bf16 sublane alignment
    a = jnp.pad(a, ((0, 0), (0, kp - cin))).astype(jnp.bfloat16)
    b = jnp.pad(b, ((0, kp - cin), (0, 0))).astype(jnp.bfloat16)

    y = matmul_act(a, b, act, out_dtype, tn=b.shape[1])   # (N, Cout*k*k)
    return y.reshape(n, cout, k, k)


# ----------------------------------------------------------------------------
# Stride-2 layers: ConvTranspose2d(Cin, Cout, 4, stride=2, padding=1) via the
# sub-pixel decomposition:
#   pad input by 1, im2col with a 2x2 window over (H+1)x(W+1) positions,
#   one GEMM with a (4*Cout, Cin*4) sub-filter matrix, pixel-shuffle, crop 1.
# Sub-filter taps: kh = (2 + r) - 2*dh, kw = (2 + c) - 2*dw,  r,c,dh,dw in {0,1}.
# ----------------------------------------------------------------------------
def conv_transpose_s2_act(x, w, act, out_dtype):
    n, cin, h, wdt = x.shape
    _, cout, k, _ = w.shape
    assert k == 4
    oh, ow = 2 * h, 2 * wdt
    hp, wp = h + 1, wdt + 1

    # --- glue: pad + 2x2 im2col -> X^T (Cin*4, N*Hp*Wp), col = n*Hp*Wp+u*Wp+v
    xpad = jnp.pad(x, ((0, 0), (0, 0), (1, 1), (1, 1)))
    cols = jnp.stack(
        [xpad[:, :, dh:dh + hp, dw:dw + wp] for dh in range(2) for dw in range(2)],
        axis=2,
    )                                            # (N, Cin, 4, Hp, Wp)
    xt = cols.transpose(1, 2, 0, 3, 4).reshape(cin * 4, n * hp * wp)

    # --- glue: sub-pixel weight W_sub[(r,c,co),(ci,dh,dw)] = w[ci,co,2+r-2dh,2+c-2dw]
    kidx = jnp.array([[2, 0], [3, 1]], dtype=jnp.int32)          # [r_or_c, d]
    wsub = w[:, :, kidx[:, :, None, None], kidx[None, None, :, :]]
    # wsub dims: (ci, co, r, dh, c, dw) -> rows (r, c, co), cols (ci, dh, dw)
    wt = wsub.transpose(2, 4, 1, 0, 3, 5).reshape(4 * cout, cin * 4)

    # --- tiling: pad M to grid*tn (tn multiple of 128), K to multiple of 16
    m = n * hp * wp
    mp, tn = _choose_tiling(m)
    kdim = cin * 4
    kp = _round_up(kdim, 16)
    xt = jnp.pad(xt, ((0, kp - kdim), (0, mp - m))).astype(jnp.bfloat16)
    wt = jnp.pad(wt, ((0, 0), (0, kp - kdim))).astype(jnp.bfloat16)

    # --- hot path: fused GEMM + activation, lane-dense (4*Cout, Mp) output
    yt = matmul_act(wt, xt, act, out_dtype, tn)

    # --- glue: crop padding, pixel-shuffle, crop the 1-pixel border
    yt = yt[:, :m].reshape(2, 2, cout, n, hp, wp)        # (r, c, co, n, u, v)
    full = yt.transpose(3, 2, 4, 0, 5, 1).reshape(n, cout, 2 * hp, 2 * wp)
    return full[:, :, 1:1 + oh, 1:1 + ow]


# ----------------------------------------------------------------------------
# Decoder forward pass.
# ----------------------------------------------------------------------------
def make_decoder_params(ngf=8, key=jax.random.PRNGKey(0)):
    # (Cin, Cout, k, stride, padding) — matches the PyTorch module
    specs = [
        (100,     ngf * 8, 4, 1, 0),
        (ngf * 8, ngf * 8, 4, 2, 1),
        (ngf * 8, ngf * 4, 4, 2, 1),
        (ngf * 4, ngf * 2, 4, 2, 1),
        (ngf * 2, ngf,     4, 2, 1),
        (ngf,     1,       4, 2, 1),
    ]
    keys = jax.random.split(key, len(specs))
    weights = []
    for kk, (cin, cout, ksz, _, _) in zip(keys, specs):
        # PyTorch ConvTranspose2d weight layout: (Cin, Cout, k, k)
        std = 1.0 / math.sqrt(cin * ksz * ksz)
        weights.append(jax.random.normal(kk, (cin, cout, ksz, ksz), jnp.float32) * std)
    return weights, specs


def decoder_forward(x, weights, specs):
    n_layers = len(specs)
    for li, (w, (_, _, _, stride, padding)) in enumerate(zip(weights, specs)):
        last = li == n_layers - 1
        act = "sigmoid" if last else "relu"
        out_dtype = jnp.float32 if last else jnp.bfloat16
        if stride == 1:
            assert padding == 0
            x = conv_transpose_1x1_act(x, w, act, out_dtype)
        else:
            assert stride == 2 and padding == 1
            x = conv_transpose_s2_act(x, w, act, out_dtype)
    return x


if __name__ == "__main__":
    ngf = 8          # small width consistent with the module (ngf is a ctor arg)
    batch = 2
    key = jax.random.PRNGKey(0)
    k_in, k_w = jax.random.split(key)

    # Latent input: (N, 100, 1, 1) as the first ConvTranspose2d(100, ...) implies.
    x = jax.random.normal(k_in, (batch, 100, 1, 1), jnp.float32)

    weights, specs = make_decoder_params(ngf=ngf, key=k_w)

    fwd = jax.jit(lambda inp: decoder_forward(inp, weights, specs))
    out = jax.block_until_ready(fwd(x))

    expected_shape = (batch, 1, 128, 128)   # 1 -> 4 -> 8 -> 16 -> 32 -> 64 -> 128
    assert out.shape == expected_shape, out.shape
    assert out.dtype == jnp.float32
    assert bool(jnp.all(jnp.isfinite(out)))
    assert bool(jnp.all((out >= 0.0) & (out <= 1.0)))  # sigmoid output range

    print("KERNEL_OK")
</pallas_src>

<mosaic_0001>
module attributes {stable_mosaic.version = 11 : i64} {
  func.func @_matmul_act_kernel(%arg0: i32, %arg1: memref<2x112xbf16, #tpu.memory_space<vmem>>, %arg2: memref<112x1024xbf16, #tpu.memory_space<vmem>>, %arg3: memref<2x1024xbf16, #tpu.memory_space<vmem>>) attributes {dimension_semantics = [#tpu.dimension_semantics<parallel>], iteration_bounds = array<i64: 1>, scalar_prefetch = 0 : i64, scratch_operands = 0 : i64, tpu.core_type = #tpu.core_type<tc>, window_params = [{pipeline_mode = #tpu.pipeline_mode<synchronous>, transform_indices = @transform_0, window_bounds = array<i64: 2, 112>}, {transform_indices = @transform_1, window_bounds = array<i64: 112, 1024>}, {transform_indices = @transform_2, window_bounds = array<i64: 2, 1024>}]} {
    %c0 = arith.constant 0 : index
    %c0_0 = arith.constant 0 : index
    %0 = vector.load %arg1[%c0, %c0_0] : memref<2x112xbf16, #tpu.memory_space<vmem>>, vector<2x112xbf16>
    %c0_1 = arith.constant 0 : index
    %c0_2 = arith.constant 0 : index
    %1 = vector.load %arg2[%c0_1, %c0_2] : memref<112x1024xbf16, #tpu.memory_space<vmem>>, vector<112x1024xbf16>
    %cst = arith.constant dense<0.000000e+00> : vector<2x1024xf32>
    %2 = tpu.matmul %0, %1, %cst {dimension_numbers = #tpu.dot_dimension_numbers<[1], [0], [0], [1], [0, 0, 1, 1], [], []>} : vector<2x112xbf16>, vector<112x1024xbf16>, vector<2x1024xf32> -> vector<2x1024xf32>
    %cst_3 = arith.constant 0.000000e+00 : f32
    %3 = vector.broadcast %cst_3 : f32 to vector<2x1024xf32>
    %4 = arith.maximumf %2, %3 : vector<2x1024xf32>
    %5 = arith.truncf %4 : vector<2x1024xf32> to vector<2x1024xbf16>
    %c0_4 = arith.constant 0 : index
    %c0_5 = arith.constant 0 : index
    %6 = vector.load %arg3[%c0_4, %c0_5] : memref<2x1024xbf16, #tpu.memory_space<vmem>>, vector<2x1024xbf16>
    tpu.vector_store %arg3[%c0_4, %c0_5], %5 {strides = array<i32>} : memref<2x1024xbf16, #tpu.memory_space<vmem>>, vector<2x1024xbf16>,
    return
  }
  func.func @transform_0(%arg0: i32) -> (i32, i32) {
    %c0_i32 = arith.constant 0 : i32
    %c0_i32_0 = arith.constant 0 : i32
    %c0_i32_1 = arith.constant 0 : i32
    return %c0_i32, %c0_i32_0 : i32, i32
  }
  func.func @transform_1(%arg0: i32) -> (i32, i32) {
    %c0_i32 = arith.constant 0 : i32
    %c0_i32_0 = arith.constant 0 : i32
    return %c0_i32, %arg0 : i32, i32
  }
  func.func @transform_2(%arg0: i32) -> (i32, i32) {
    %c0_i32 = arith.constant 0 : i32
    %c0_i32_0 = arith.constant 0 : i32
    return %c0_i32, %arg0 : i32, i32
  }
}

module attributes {stable_mosaic.version = 11 : i64} {
  func.func @_matmul_act_kernel(%arg0: i32, %arg1: memref<256x256xbf16, #tpu.memory_space<vmem>>, %arg2: memref<256x128xbf16, #tpu.memory_space<vmem>>, %arg3: memref<256x128xbf16, #tpu.memory_space<vmem>>) attributes {dimension_semantics = [#tpu.dimension_semantics<parallel>], iteration_bounds = array<i64: 1>, scalar_prefetch = 0 : i64, scratch_operands = 0 : i64, tpu.core_type = #tpu.core_type<tc>, window_params = [{pipeline_mode = #tpu.pipeline_mode<synchronous>, transform_indices = @transform_0, window_bounds = array<i64: 256, 256>}, {transform_indices = @transform_1, window_bounds = array<i64: 256, 128>}, {transform_indices = @transform_2, window_bounds = array<i64: 256, 128>}]} {
    %c0 = arith.constant 0 : index
    %c0_0 = arith.constant 0 : index
    %0 = vector.load %arg1[%c0, %c0_0] : memref<256x256xbf16, #tpu.memory_space<vmem>>, vector<256x256xbf16>
    %c0_1 = arith.constant 0 : index
    %c0_2 = arith.constant 0 : index
    %1 = vector.load %arg2[%c0_1, %c0_2] : memref<256x128xbf16, #tpu.memory_space<vmem>>, vector<256x128xbf16>
    %cst = arith.constant dense<0.000000e+00> : vector<256x128xf32>
    %2 = tpu.matmul %0, %1, %cst {dimension_numbers = #tpu.dot_dimension_numbers<[1], [0], [0], [1], [0, 0, 1, 1], [], []>} : vector<256x256xbf16>, vector<256x128xbf16>, vector<256x128xf32> -> vector<256x128xf32>
    %cst_3 = arith.constant 0.000000e+00 : f32
    %3 = vector.broadcast %cst_3 : f32 to vector<256x128xf32>
    %4 = arith.maximumf %2, %3 : vector<256x128xf32>
    %5 = arith.truncf %4 : vector<256x128xf32> to vector<256x128xbf16>
    %c0_4 = arith.constant 0 : index
    %c0_5 = arith.constant 0 : index
    %6 = vector.load %arg3[%c0_4, %c0_5] : memref<256x128xbf16, #tpu.memory_space<vmem>>, vector<256x128xbf16>
    tpu.vector_store %arg3[%c0_4, %c0_5], %5 {strides = array<i32>} : memref<256x128xbf16, #tpu.memory_space<vmem>>, vector<256x128xbf16>,
    return
  }
  func.func @transform_0(%arg0: i32) -> (i32, i32) {
    %c0_i32 = arith.constant 0 : i32
    %c0_i32_0 = arith.constant 0 : i32
    %c0_i32_1 = arith.constant 0 : i32
    return %c0_i32, %c0_i32_0 : i32, i32
  }
  func.func @transform_1(%arg0: i32) -> (i32, i32) {
    %c0_i32 = arith.constant 0 : i32
    %c0_i32_0 = arith.constant 0 : i32
    return %c0_i32, %arg0 : i32, i32
  }
  func.func @transform_2(%arg0: i32) -> (i32, i32) {
    %c0_i32 = arith.constant 0 : i32
    %c0_i32_0 = arith.constant 0 : i32
    return %c0_i32, %arg0 : i32, i32
  }
}

module attributes {stable_mosaic.version = 11 : i64} {
  func.func @_matmul_act_kernel(%arg0: i32, %arg1: memref<128x256xbf16, #tpu.memory_space<vmem>>, %arg2: memref<256x128xbf16, #tpu.memory_space<vmem>>, %arg3: memref<128x128xbf16, #tpu.memory_space<vmem>>) attributes {dimension_semantics = [#tpu.dimension_semantics<parallel>], iteration_bounds = array<i64: 2>, scalar_prefetch = 0 : i64, scratch_operands = 0 : i64, tpu.core_type = #tpu.core_type<tc>, window_params = [{pipeline_mode = #tpu.pipeline_mode<synchronous>, transform_indices = @transform_0, window_bounds = array<i64: 128, 256>}, {transform_indices = @transform_1, window_bounds = array<i64: 256, 128>}, {transform_indices = @transform_2, window_bounds = array<i64: 128, 128>}]} {
    %c0 = arith.constant 0 : index
    %c0_0 = arith.constant 0 : index
    %0 = vector.load %arg1[%c0, %c0_0] : memref<128x256xbf16, #tpu.memory_space<vmem>>, vector<128x256xbf16>
    %c0_1 = arith.constant 0 : index
    %c0_2 = arith.constant 0 : index
    %1 = vector.load %arg2[%c0_1, %c0_2] : memref<256x128xbf16, #tpu.memory_space<vmem>>, vector<256x128xbf16>
    %cst = arith.constant dense<0.000000e+00> : vector<128x128xf32>
    %2 = tpu.matmul %0, %1, %cst {dimension_numbers = #tpu.dot_dimension_numbers<[1], [0], [0], [1], [0, 0, 1, 1], [], []>} : vector<128x256xbf16>, vector<256x128xbf16>, vector<128x128xf32> -> vector<128x128xf32>
    %cst_3 = arith.constant 0.000000e+00 : f32
    %3 = vector.broadcast %cst_3 : f32 to vector<128x128xf32>
    %4 = arith.maximumf %2, %3 : vector<128x128xf32>
    %5 = arith.truncf %4 : vector<128x128xf32> to vector<128x128xbf16>
    %c0_4 = arith.constant 0 : index
    %c0_5 = arith.constant 0 : index
    %6 = vector.load %arg3[%c0_4, %c0_5] : memref<128x128xbf16, #tpu.memory_space<vmem>>, vector<128x128xbf16>
    tpu.vector_store %arg3[%c0_4, %c0_5], %5 {strides = array<i32>} : memref<128x128xbf16, #tpu.memory_space<vmem>>, vector<128x128xbf16>,
    return
  }
  func.func @transform_0(%arg0: i32) -> (i32, i32) {
    %c0_i32 = arith.constant 0 : i32
    %c0_i32_0 = arith.constant 0 : i32
    %c0_i32_1 = arith.constant 0 : i32
    return %c0_i32, %c0_i32_0 : i32, i32
  }
  func.func @transform_1(%arg0: i32) -> (i32, i32) {
    %c0_i32 = arith.constant 0 : i32
    %c0_i32_0 = arith.constant 0 : i32
    return %c0_i32, %arg0 : i32, i32
  }
  func.func @transform_2(%arg0: i32) -> (i32, i32) {
    %c0_i32 = arith.constant 0 : i32
    %c0_i32_0 = arith.constant 0 : i32
    return %c0_i32, %arg0 : i32, i32
  }
}

module attributes {stable_mosaic.version = 11 : i64} {
  func.func @_matmul_act_kernel(%arg0: i32, %arg1: memref<64x128xbf16, #tpu.memory_space<vmem>>, %arg2: memref<128x384xbf16, #tpu.memory_space<vmem>>, %arg3: memref<64x384xbf16, #tpu.memory_space<vmem>>) attributes {dimension_semantics = [#tpu.dimension_semantics<parallel>], iteration_bounds = array<i64: 2>, scalar_prefetch = 0 : i64, scratch_operands = 0 : i64, tpu.core_type = #tpu.core_type<tc>, window_params = [{pipeline_mode = #tpu.pipeline_mode<synchronous>, transform_indices = @transform_0, window_bounds = array<i64: 64, 128>}, {transform_indices = @transform_1, window_bounds = array<i64: 128, 384>}, {transform_indices = @transform_2, window_bounds = array<i64: 64, 384>}]} {
    %c0 = arith.constant 0 : index
    %c0_0 = arith.constant 0 : index
    %0 = vector.load %arg1[%c0, %c0_0] : memref<64x128xbf16, #tpu.memory_space<vmem>>, vector<64x128xbf16>
    %c0_1 = arith.constant 0 : index
    %c0_2 = arith.constant 0 : index
    %1 = vector.load %arg2[%c0_1, %c0_2] : memref<128x384xbf16, #tpu.memory_space<vmem>>, vector<128x384xbf16>
    %cst = arith.constant dense<0.000000e+00> : vector<64x384xf32>
    %2 = tpu.matmul %0, %1, %cst {dimension_numbers = #tpu.dot_dimension_numbers<[1], [0], [0], [1], [0, 0, 1, 1], [], []>} : vector<64x128xbf16>, vector<128x384xbf16>, vector<64x384xf32> -> vector<64x384xf32>
    %cst_3 = arith.constant 0.000000e+00 : f32
    %3 = vector.broadcast %cst_3 : f32 to vector<64x384xf32>
    %4 = arith.maximumf %2, %3 : vector<64x384xf32>
    %5 = arith.truncf %4 : vector<64x384xf32> to vector<64x384xbf16>
    %c0_4 = arith.constant 0 : index
    %c0_5 = arith.constant 0 : index
    %6 = vector.load %arg3[%c0_4, %c0_5] : memref<64x384xbf16, #tpu.memory_space<vmem>>, vector<64x384xbf16>
    tpu.vector_store %arg3[%c0_4, %c0_5], %5 {strides = array<i32>} : memref<64x384xbf16, #tpu.memory_space<vmem>>, vector<64x384xbf16>,
    return
  }
  func.func @transform_0(%arg0: i32) -> (i32, i32) {
    %c0_i32 = arith.constant 0 : i32
    %c0_i32_0 = arith.constant 0 : i32
    %c0_i32_1 = arith.constant 0 : i32
    return %c0_i32, %c0_i32_0 : i32, i32
  }
  func.func @transform_1(%arg0: i32) -> (i32, i32) {
    %c0_i32 = arith.constant 0 : i32
    %c0_i32_0 = arith.constant 0 : i32
    return %c0_i32, %arg0 : i32, i32
  }
  func.func @transform_2(%arg0: i32) -> (i32, i32) {
    %c0_i32 = arith.constant 0 : i32
    %c0_i32_0 = arith.constant 0 : i32
    return %c0_i32, %arg0 : i32, i32
  }
}

module attributes {stable_mosaic.version = 11 : i64} {
  func.func @_matmul_act_kernel(%arg0: i32, %arg1: memref<32x64xbf16, #tpu.memory_space<vmem>>, %arg2: memref<64x1152xbf16, #tpu.memory_space<vmem>>, %arg3: memref<32x1152xbf16, #tpu.memory_space<vmem>>) attributes {dimension_semantics = [#tpu.dimension_semantics<parallel>], iteration_bounds = array<i64: 2>, scalar_prefetch = 0 : i64, scratch_operands = 0 : i64, tpu.core_type = #tpu.core_type<tc>, window_params = [{pipeline_mode = #tpu.pipeline_mode<synchronous>, transform_indices = @transform_0, window_bounds = array<i64: 32, 64>}, {transform_indices = @transform_1, window_bounds = array<i64: 64, 1152>}, {transform_indices = @transform_2, window_bounds = array<i64: 32, 1152>}]} {
    %c0 = arith.constant 0 : index
    %c0_0 = arith.constant 0 : index
    %0 = vector.load %arg1[%c0, %c0_0] : memref<32x64xbf16, #tpu.memory_space<vmem>>, vector<32x64xbf16>
    %c0_1 = arith.constant 0 : index
    %c0_2 = arith.constant 0 : index
    %1 = vector.load %arg2[%c0_1, %c0_2] : memref<64x1152xbf16, #tpu.memory_space<vmem>>, vector<64x1152xbf16>
    %cst = arith.constant dense<0.000000e+00> : vector<32x1152xf32>
    %2 = tpu.matmul %0, %1, %cst {dimension_numbers = #tpu.dot_dimension_numbers<[1], [0], [0], [1], [0, 0, 1, 1], [], []>} : vector<32x64xbf16>, vector<64x1152xbf16>, vector<32x1152xf32> -> vector<32x1152xf32>
    %cst_3 = arith.constant 0.000000e+00 : f32
    %3 = vector.broadcast %cst_3 : f32 to vector<32x1152xf32>
    %4 = arith.maximumf %2, %3 : vector<32x1152xf32>
    %5 = arith.truncf %4 : vector<32x1152xf32> to vector<32x1152xbf16>
    %c0_4 = arith.constant 0 : index
    %c0_5 = arith.constant 0 : index
    %6 = vector.load %arg3[%c0_4, %c0_5] : memref<32x1152xbf16, #tpu.memory_space<vmem>>, vector<32x1152xbf16>
    tpu.vector_store %arg3[%c0_4, %c0_5], %5 {strides = array<i32>} : memref<32x1152xbf16, #tpu.memory_space<vmem>>, vector<32x1152xbf16>,
    return
  }
  func.func @transform_0(%arg0: i32) -> (i32, i32) {
    %c0_i32 = arith.constant 0 : i32
    %c0_i32_0 = arith.constant 0 : i32
    %c0_i32_1 = arith.constant 0 : i32
    return %c0_i32, %c0_i32_0 : i32, i32
  }
  func.func @transform_1(%arg0: i32) -> (i32, i32) {
    %c0_i32 = arith.constant 0 : i32
    %c0_i32_0 = arith.constant 0 : i32
    return %c0_i32, %arg0 : i32, i32
  }
  func.func @transform_2(%arg0: i32) -> (i32, i32) {
    %c0_i32 = arith.constant 0 : i32
    %c0_i32_0 = arith.constant 0 : i32
    return %c0_i32, %arg0 : i32, i32
  }
}

module attributes {stable_mosaic.version = 11 : i64} {
  func.func @_matmul_act_kernel(%arg0: i32, %arg1: memref<4x32xbf16, #tpu.memory_space<vmem>>, %arg2: memref<32x2176xbf16, #tpu.memory_space<vmem>>, %arg3: memref<4x2176xf32, #tpu.memory_space<vmem>>) attributes {dimension_semantics = [#tpu.dimension_semantics<parallel>], iteration_bounds = array<i64: 4>, scalar_prefetch = 0 : i64, scratch_operands = 0 : i64, tpu.core_type = #tpu.core_type<tc>, window_params = [{pipeline_mode = #tpu.pipeline_mode<synchronous>, transform_indices = @transform_0, window_bounds = array<i64: 4, 32>}, {transform_indices = @transform_1, window_bounds = array<i64: 32, 2176>}, {transform_indices = @transform_2, window_bounds = array<i64: 4, 2176>}]} {
    %c0 = arith.constant 0 : index
    %c0_0 = arith.constant 0 : index
    %0 = vector.load %arg1[%c0, %c0_0] : memref<4x32xbf16, #tpu.memory_space<vmem>>, vector<4x32xbf16>
    %c0_1 = arith.constant 0 : index
    %c0_2 = arith.constant 0 : index
    %1 = vector.load %arg2[%c0_1, %c0_2] : memref<32x2176xbf16, #tpu.memory_space<vmem>>, vector<32x2176xbf16>
    %cst = arith.constant dense<0.000000e+00> : vector<4x2176xf32>
    %2 = tpu.matmul %0, %1, %cst {dimension_numbers = #tpu.dot_dimension_numbers<[1], [0], [0], [1], [0, 0, 1, 1], [], []>} : vector<4x32xbf16>, vector<32x2176xbf16>, vector<4x2176xf32> -> vector<4x2176xf32>
    %3 = arith.negf %2 : vector<4x2176xf32>
    %4 = math.exp %3 : vector<4x2176xf32>
    %cst_3 = arith.constant 1.000000e+00 : f32
    %5 = vector.broadcast %cst_3 : f32 to vector<4x2176xf32>
    %6 = arith.addf %5, %4 : vector<4x2176xf32>
    %7 = arith.divf %5, %6 : vector<4x2176xf32>
    %c0_4 = arith.constant 0 : index
    %c0_5 = arith.constant 0 : index
    %8 = vector.load %arg3[%c0_4, %c0_5] : memref<4x2176xf32, #tpu.memory_space<vmem>>, vector<4x2176xf32>
    tpu.vector_store %arg3[%c0_4, %c0_5], %7 {strides = array<i32>} : memref<4x2176xf32, #tpu.memory_space<vmem>>, vector<4x2176xf32>,
    return
  }
  func.func @transform_0(%arg0: i32) -> (i32, i32) {
    %c0_i32 = arith.constant 0 : i32
    %c0_i32_0 = arith.constant 0 : i32
    %c0_i32_1 = arith.constant 0 : i32
    return %c0_i32, %c0_i32_0 : i32, i32
  }
  func.func @transform_1(%arg0: i32) -> (i32, i32) {
    %c0_i32 = arith.constant 0 : i32
    %c0_i32_0 = arith.constant 0 : i32
    return %c0_i32, %arg0 : i32, i32
  }
  func.func @transform_2(%arg0: i32) -> (i32, i32) {
    %c0_i32 = arith.constant 0 : i32
    %c0_i32_0 = arith.constant 0 : i32
    return %c0_i32, %arg0 : i32, i32
  }
}

</mosaic_0001>

<bundles_post_ra>
// kernel: _lambda_.6
= control target key start
LH: loop header
LB: loop body
LE: loop exit
PB: predicated region body
PF: predicated region fallthrough
CT: control target
= control target key end

     0   :  { %7 = vsyncpa [#allocation3], 0  ;;  %s702_s9 = smov [#allocation2]   ;;  %s745_s0 = inlined_call_operand.vmem [shape: bf16[2,112], index: 0, kind: input, shape index: {}]   ;;  %s746_s1 = inlined_call_operand.hbm [shape: bf16[112,1024], index: 1, kind: input, shape index: {}]   ;;  %s747_s2 = inlined_call_operand.vmem [shape: bf16[2,1024], index: 2, kind: output, shape index: {}]  }
   0x1   :  { %s15_s10 = sshll.u32 %s702_s9, 4  ;;  %s16_s10 = int_to_ptr.vmem [resolvable:$true] %s15_s10 }
   0x2   :  { %s688_s11 = scalar_lea.vmem %s16_s10, 7168  ;;  %p693_p1 = scmp.lt.s32.totalorder %s16_s10, %s16_s10 }
   0x3   :  { %p689_p0 = scmp.ne.s32.totalorder %s16_s10, %s688_s11  ;;  %p694_p2 = scmp.lt.s32.totalorder %s688_s11, %s688_s11 }
   0x5   :  { %p695_p3 = por %p694_p2, %p693_p1 }
   0x7   :  { %p696_p4 = pnand %p695_p3, %p689_p0 }
   0x9   :  { %699 = shalt.err (!%p696_p4)
}
   0xa   :  { %s703_s12 = smov 512   ;;  %s704_s13 = smov 32  }
   0xb   :  { %21 = dma.hbm_to_vmem [thread:$0]  %s746_s1, 7168, %s16_s10, [#allocation3], %s703_s12, %s703_s12, %s704_s13  }
   0xc   :  { %700 = dma.done.wait [#allocation3], 7168  }
   0xd   :  { %701 = vsyncadd [#allocation3], 4294960128  ;;  %v705_v0 = vmov 0   ;;  %v75_v1 = vld [vmem:[#allocation2 + $0x180] sm:$0xff]  ;;  %v76_v3 = vld [vmem:[#allocation2 + $0x188] sm:$0xff]  ;;  %vm363_vm0 = vcmask 916480  }
   0xe   :  { %399 = vmatprep.mubr.bf16.mxu0 %v705_v0  ;;  %440 = vmatprep.mubr.bf16.mxu1 %v705_v0  ;;  %v79_v2 = vld [vmem:[#allocation2 + $0x1a0] sm:$0xff]  ;;  %v80_v5 = vld [vmem:[#allocation2 + $0x1a8] sm:$0xff]  ;;  %v77_v55 = vld [vmem:[#allocation2 + $0x190] sm:$0xff] }
   0xf   :  { %v660_v4 = vcombine.high %v75_v1, %v79_v2  ;;  %v659_v6 = vcombine.low %v75_v1, %v79_v2  ;;  %v67_v7 = vld [vmem:[#allocation2 + $0x140] sm:$0xff]  ;;  %v662_v9 = vcombine.high %v76_v3, %v80_v5  ;;  %v661_v10 = vcombine.low %v76_v3, %v80_v5  ;;  %v68_v12 = vld [vmem:[#allocation2 + $0x148] sm:$0xff]  ;;  %v81_v56 = vld [vmem:[#allocation2 + $0x1b0] sm:$0xff] }
  0x10   :  { %v71_v8 = vld [vmem:[#allocation2 + $0x160] sm:$0xff]  ;;  %v72_v13 = vld [vmem:[#allocation2 + $0x168] sm:$0xff]  ;;  %v78_v57 = vld [vmem:[#allocation2 + $0x198] sm:$0xff]  ;;  %v664_v61 = vcombine.high %v77_v55, %v81_v56  ;;  %v663_v5 = vcombine.low %v77_v55, %v81_v56 }
  0x11   :  { %v652_v11 = vcombine.high %v67_v7, %v71_v8  ;;  %v59_v14 = vld [vmem:[#allocation2 + $0x100] sm:$0xff]  ;;  %369 = vmatprep.subr.bf16.mxu0 %v660_v4  ;;  %v654_v15 = vcombine.high %v68_v12, %v72_v13  ;;  %v60_v17 = vld [vmem:[#allocation2 + $0x108] sm:$0xff]  ;;  %410 = vmatprep.subr.bf16.mxu1 %v662_v9  ;;  %v651_v19 = vcombine.low %v67_v7, %v71_v8  ;;  %v82_v58 = vld [vmem:[#allocation2 + $0x1b8] sm:$0xff] }
  0x12   :  { %v63_v16 = vld [vmem:[#allocation2 + $0x120] sm:$0xff]  ;;  %v64_v18 = vld [vmem:[#allocation2 + $0x128] sm:$0xff]  ;;  %370 = vmatpush1.bf16.msra.mxu0 %v659_v6  ;;  %411 = vmatpush1.bf16.msra.mxu1 %v661_v10  ;;  %v653_v20 = vcombine.low %v68_v12, %v72_v13  ;;  %v666_v62 = vcombine.high %v78_v57, %v82_v58  ;;  %v69_v63 = vld [vmem:[#allocation2 + $0x150] sm:$0xff]  ;;  %v665_v6 = vcombine.low %v78_v57, %v82_v58  ;;  %v706_v58 = vmov 1966171168  }
  0x13   :  { %371 = vmatprep.subr.bf16.mxu0 %v652_v11  ;;  %v644_v21 = vcombine.high %v59_v14, %v63_v16  ;;  %412 = vmatprep.subr.bf16.mxu1 %v654_v15  ;;  %v646_v22 = vcombine.high %v60_v17, %v64_v18  ;;  %v51_v23 = vld [vmem:[#allocation2 + $0xc0] sm:$0xff]  ;;  %v52_v25 = vld [vmem:[#allocation2 + $0xc8] sm:$0xff]  ;;  %v643_v27 = vcombine.low %v59_v14, %v63_v16  ;;  %v73_v1 = vld [vmem:[#allocation2 + $0x170] sm:$0xff] }
  0x14   :  { %v55_v24 = vld [vmem:[#allocation2 + $0xe0] sm:$0xff]  ;;  %v56_v26 = vld [vmem:[#allocation2 + $0xe8] sm:$0xff]  ;;  %v645_v28 = vcombine.low %v60_v17, %v64_v18  ;;  %v70_v2 = vld [vmem:[#allocation2 + $0x158] sm:$0xff]  ;;  %v656_v7 = vcombine.high %v69_v63, %v73_v1  ;;  %v655_v13 = vcombine.low %v69_v63, %v73_v1 }
  0x15   :  { %v636_v29 = vcombine.high %v51_v23, %v55_v24  ;;  %v638_v30 = vcombine.high %v52_v25, %v56_v26  ;;  %v43_v31 = vld [vmem:[#allocation2 + $0x80] sm:$0xff]  ;;  %v44_v33 = vld [vmem:[#allocation2 + $0x88] sm:$0xff]  ;;  %v635_v35 = vcombine.low %v51_v23, %v55_v24  ;;  %v637_v36 = vcombine.low %v52_v25, %v56_v26  ;;  %v74_v3 = vld [vmem:[#allocation2 + $0x178] sm:$0xff] }
  0x16   :  { %372 = vmatpush1.bf16.msra.mxu0 %v651_v19  ;;  %413 = vmatpush1.bf16.msra.mxu1 %v653_v20  ;;  %v47_v32 = vld [vmem:[#allocation2 + $0xa0] sm:$0xff]  ;;  %v48_v34 = vld [vmem:[#allocation2 + $0xa8] sm:$0xff]  ;;  %v658_v8 = vcombine.high %v70_v2, %v74_v3  ;;  %v61_v9 = vld [vmem:[#allocation2 + $0x110] sm:$0xff]  ;;  %v657_v14 = vcombine.low %v70_v2, %v74_v3 }
  0x17   :  { %373 = vmatprep.subr.bf16.mxu0 %v644_v21  ;;  %414 = vmatprep.subr.bf16.mxu1 %v646_v22  ;;  %v628_v37 = vcombine.high %v43_v31, %v47_v32  ;;  %v630_v38 = vcombine.high %v44_v33, %v48_v34  ;;  %v35_v39 = vld [vmem:[#allocation2 + $0x40] sm:$0xff]  ;;  %v36_v41 = vld [vmem:[#allocation2 + $0x48] sm:$0xff]  ;;  %v627_v43 = vcombine.low %v43_v31, %v47_v32  ;;  %v65_v10 = vld [vmem:[#allocation2 + $0x130] sm:$0xff] }
  0x18   :  { %v39_v40 = vld [vmem:[#allocation2 + $0x60] sm:$0xff]  ;;  %v40_v42 = vld [vmem:[#allocation2 + $0x68] sm:$0xff]  ;;  %v629_v44 = vcombine.low %v44_v33, %v48_v34  ;;  %v62_v11 = vld [vmem:[#allocation2 + $0x118] sm:$0xff]  ;;  %v648_v15 = vcombine.high %v61_v9, %v65_v10  ;;  %v647_v21 = vcombine.low %v61_v9, %v65_v10 }
  0x19   :  { %v620_v45 = vcombine.high %v35_v39, %v39_v40  ;;  %v622_v46 = vcombine.high %v36_v41, %v40_v42  ;;  %v27_v47 = vld [vmem:[#allocation2] sm:$0xff]  ;;  %v28_v49 = vld [vmem:[#allocation2 + $0x8] sm:$0xff]  ;;  %v619_v51 = vcombine.low %v35_v39, %v39_v40  ;;  %v621_v52 = vcombine.low %v36_v41, %v40_v42  ;;  %v66_v12 = vld [vmem:[#allocation2 + $0x138] sm:$0xff] }
  0x1a   :  { %374 = vmatpush1.bf16.msra.mxu0 %v643_v27  ;;  %415 = vmatpush1.bf16.msra.mxu1 %v645_v28  ;;  %v31_v48 = vld [vmem:[#allocation2 + $0x20] sm:$0xff]  ;;  %v32_v50 = vld [vmem:[#allocation2 + $0x28] sm:$0xff]  ;;  %v650_v16 = vcombine.high %v62_v11, %v66_v12  ;;  %v53_v17 = vld [vmem:[#allocation2 + $0xd0] sm:$0xff]  ;;  %v649_v22 = vcombine.low %v62_v11, %v66_v12 }
  0x1b   :  { %375 = vmatprep.subr.bf16.mxu0 %v636_v29  ;;  %416 = vmatprep.subr.bf16.mxu1 %v638_v30  ;;  %v612_v53 = vcombine.high %v27_v47, %v31_v48  ;;  %v614_v54 = vcombine.high %v28_v49, %v32_v50  ;;  %v611_v59 = vcombine.low %v27_v47, %v31_v48  ;;  %v730_v4 = vld [vmem:[%s745_s0] sm:$0x1]  ;;  %v57_v18 = vld [vmem:[#allocation2 + $0xf0] sm:$0xff]  ;;  %v54_v19 = vld [vmem:[#allocation2 + $0xd8] sm:$0xff] }
  0x1c   :  { %v613_v60 = vcombine.low %v28_v49, %v32_v50  ;;  %v58_v20 = vld [vmem:[#allocation2 + $0xf8] sm:$0xff]  ;;  %v640_v23 = vcombine.high %v53_v17, %v57_v18  ;;  %v45_v25 = vld [vmem:[#allocation2 + $0x90] sm:$0xff]  ;;  %v639_v29 = vcombine.low %v53_v17, %v57_v18 }
  0x1d   :  { %v642_v24 = vcombine.high %v54_v19, %v58_v20  ;;  %v49_v26 = vld [vmem:[#allocation2 + $0xb0] sm:$0xff]  ;;  %v46_v27 = vld [vmem:[#allocation2 + $0x98] sm:$0xff]  ;;  %v641_v30 = vcombine.low %v54_v19, %v58_v20 }
  0x1e   :  { %376 = vmatpush1.bf16.msra.mxu0 %v635_v35  ;;  %417 = vmatpush1.bf16.msra.mxu1 %v637_v36  ;;  %v50_v28 = vld [vmem:[#allocation2 + $0xb8] sm:$0xff]  ;;  %v632_v31 = vcombine.high %v45_v25, %v49_v26  ;;  %v37_v32 = vld [vmem:[#allocation2 + $0x50] sm:$0xff]  ;;  %v631_v36 = vcombine.low %v45_v25, %v49_v26 }
  0x1f   :  { %377 = vmatprep.subr.bf16.mxu0 %v628_v37  ;;  %418 = vmatprep.subr.bf16.mxu1 %v630_v38  ;;  %v41_v33 = vld [vmem:[#allocation2 + $0x70] sm:$0xff]  ;;  %v38_v34 = vld [vmem:[#allocation2 + $0x58] sm:$0xff]  ;;  %v633_v37 = vcombine.low %v46_v27, %v50_v28 }
  0x20   :  { %v42_v35 = vld [vmem:[#allocation2 + $0x78] sm:$0xff]  ;;  %v624_v38 = vcombine.high %v37_v32, %v41_v33  ;;  %v29_v40 = vld [vmem:[#allocation2 + $0x10] sm:$0xff] }
  0x21   :  { %v626_v39 = vcombine.high %v38_v34, %v42_v35  ;;  %v33_v41 = vld [vmem:[#allocation2 + $0x30] sm:$0xff]  ;;  %v30_v42 = vld [vmem:[#allocation2 + $0x18] sm:$0xff] }
  0x22   :  { %378 = vmatpush1.bf16.msra.mxu0 %v627_v43  ;;  %419 = vmatpush1.bf16.msra.mxu1 %v629_v44  ;;  %v34_v43 = vld [vmem:[#allocation2 + $0x38] sm:$0xff]  ;;  %v623_v44 = vcombine.low %v37_v32, %v41_v33  ;;  %v615_v48 = vcombine.low %v29_v40, %v33_v41 }
  0x23   :  { %379 = vmatprep.subr.bf16.mxu0 %v620_v45  ;;  %420 = vmatprep.subr.bf16.mxu1 %v622_v46  ;;  %v625_v45 = vcombine.low %v38_v34, %v42_v35  ;;  %v616_v46 = vcombine.high %v29_v40, %v33_v41  ;;  %v618_v47 = vcombine.high %v30_v42, %v34_v43 }
  0x24   :  { %v617_v49 = vcombine.low %v30_v42, %v34_v43 }
  0x26   :  { %380 = vmatpush1.bf16.msra.mxu0 %v619_v51  ;;  %421 = vmatpush1.bf16.msra.mxu1 %v621_v52 }
  0x27   :  { %381 = vmatprep.subr.bf16.mxu0 %v612_v53  ;;  %422 = vmatprep.subr.bf16.mxu1 %v614_v54 }
  0x2a   :  { %382 = vmatpush1.bf16.msra.mxu0 %v611_v59  ;;  %423 = vmatpush1.bf16.msra.mxu1 %v613_v60  ;;  %v560_v59 = vunpack.c.l.s4 %v706_v58  ;;  %v562_v60 = vlaneseq }
  0x2b   :  { %451 = vmatprep.subr.bf16.mxu0 %v664_v61  ;;  %492 = vmatprep.subr.bf16.mxu1 %v666_v62 }
  0x2c   :  { %v561_v61 = vunpack.c.0.s8 %v560_v59  ;;  %v563_v62 = vshrl.u32 %v562_v60, 7 }
  0x2d   :  { %667 = vmatmul.mubr.msk.bf16.vlgmr.msra.gmra.mxu0 %vm363_vm0, %v730_v4  ;;  %668 = vmatmul.mubr.msk.bf16.vlgmr.msra.gmra.mxu1 %vm363_vm0, %v730_v4 }
  0x2e   :  { %452 = vmatpush1.bf16.msra.mxu0 %v663_v5  ;;  %493 = vmatpush1.bf16.msra.mxu1 %v665_v6  ;;  %v564_v6 = vsub.s32 %v561_v61, %v563_v62 }
  0x2f   :  { %453 = vmatprep.subr.bf16.mxu0 %v656_v7  ;;  %494 = vmatprep.subr.bf16.mxu1 %v658_v8 }
  0x30   :  { %481 = vmatprep.mubr.bf16.mxu0 %v705_v0  ;;  %522 = vmatprep.mubr.bf16.mxu1 %v705_v0  ;;  %v634_v0 = vcombine.high %v46_v27, %v50_v28 }
  0x32   :  { %454 = vmatpush1.bf16.msra.mxu0 %v655_v13  ;;  %495 = vmatpush1.bf16.msra.mxu1 %v657_v14 }
  0x33   :  { %455 = vmatprep.subr.bf16.mxu0 %v648_v15  ;;  %496 = vmatprep.subr.bf16.mxu1 %v650_v16 }
  0x36   :  { %456 = vmatpush1.bf16.msra.mxu0 %v647_v21  ;;  %497 = vmatpush1.bf16.msra.mxu1 %v649_v22 }
  0x37   :  { %457 = vmatprep.subr.bf16.mxu0 %v640_v23  ;;  %498 = vmatprep.subr.bf16.mxu1 %v642_v24 }
  0x3a   :  { %458 = vmatpush1.bf16.msra.mxu0 %v639_v29  ;;  %499 = vmatpush1.bf16.msra.mxu1 %v641_v30 }
  0x3b   :  { %459 = vmatprep.subr.bf16.mxu0 %v632_v31  ;;  %500 = vmatprep.subr.bf16.mxu1 %v634_v0 }
  0x3e   :  { %460 = vmatpush1.bf16.msra.mxu0 %v631_v36  ;;  %501 = vmatpush1.bf16.msra.mxu1 %v633_v37 }
  0x3f   :  { %461 = vmatprep.subr.bf16.mxu0 %v624_v38  ;;  %502 = vmatprep.subr.bf16.mxu1 %v626_v39 }
  0x42   :  { %462 = vmatpush1.bf16.msra.mxu0 %v623_v44  ;;  %503 = vmatpush1.bf16.msra.mxu1 %v625_v45 }
  0x43   :  { %463 = vmatprep.subr.bf16.mxu0 %v616_v46  ;;  %504 = vmatprep.subr.bf16.mxu1 %v618_v47 }
  0x46   :  { %464 = vmatpush1.bf16.msra.mxu0 %v615_v48  ;;  %505 = vmatpush1.bf16.msra.mxu1 %v617_v49 }
  0x49   :  { %669 = vmatmul.mubr.msk.bf16.vlgmr.msra.gmra.mxu0 %vm363_vm0, %v730_v4  ;;  %670 = vmatmul.mubr.msk.bf16.vlgmr.msra.gmra.mxu1 %vm363_vm0, %v730_v4 }
  0xed   :  { %v401_v50 = vpop.f32.mrf.mxu0  ;;  %v442_v51 = vpop.f32.mrf.mxu1 }
  0xee   :  { %v531_v63 = vmax.f32 %v401_v50, 0.0  ;;  %v533_v1 = vmax.f32 %v442_v51, 0.0 }
  0xef   :  { %v403_v52 = vpop.f32.mrf.mxu0  ;;  %v444_v53 = vpop.f32.mrf.mxu1 }
  0xf0   :  { %v532_v2 = vmax.f32 %v403_v52, 0.0  ;;  %v534_v3 = vmax.f32 %v444_v53, 0.0 }
  0xf1   :  { %v405_v54 = vpop.f32.mrf.mxu0  ;;  %v446_v55 = vpop.f32.mrf.mxu1 }
  0xf2   :  { %v671_v5 = vpack.c.bf16 %v532_v2, %v531_v63  ;;  %v672_v4 = vpack.c.bf16 %v534_v3, %v533_v1 }
  0xf3   :  { %v406_v56 = vpop.f32.mrf.mxu0  ;;  %v447_v57 = vpop.f32.mrf.mxu1 }
  0xf4   :  { %v565_v13 = vrot.slane %v671_v5, %v564_v6  ;;  %v572_v14 = vrot.slane %v672_v4, %v564_v6 }
  0xf6   :  { %v587_v24 = vcombine.low %v565_v13, %v572_v14 }
  0xf8   :  { %v595_v27 = vrot.slane %v587_v24, %v564_v6 }
 0x109   :  { %v483_v7 = vpop.f32.mrf.mxu0  ;;  %v524_v8 = vpop.f32.mrf.mxu1 }
 0x10a   :  { %v535_v10 = vmax.f32 %v483_v7, 0.0  ;;  %v537_v15 = vmax.f32 %v524_v8, 0.0 }
 0x10b   :  { %v485_v9 = vpop.f32.mrf.mxu0  ;;  %v526_v12 = vpop.f32.mrf.mxu1 }
 0x10c   :  { %v536_v11 = vmax.f32 %v485_v9, 0.0  ;;  %v538_v16 = vmax.f32 %v526_v12, 0.0 }
 0x10d   :  { %v487_v17 = vpop.f32.mrf.mxu0  ;;  %v528_v19 = vpop.f32.mrf.mxu1 }
 0x10e   :  { %v673_v18 = vpack.c.bf16 %v536_v11, %v535_v10  ;;  %v674_v20 = vpack.c.bf16 %v538_v16, %v537_v15 }
 0x10f   :  { %v488_v21 = vpop.f32.mrf.mxu0  ;;  %v529_v23 = vpop.f32.mrf.mxu1 }
 0x110   :  { %v579_v22 = vrot.slane %v673_v18, %v564_v6  ;;  %v586_v25 = vrot.slane %v674_v20, %v564_v6 }
 0x112   :  { %v588_v26 = vcombine.low %v579_v22, %v586_v25 }
 0x114   :  { %v602_v28 = vrot.slane %v588_v26, %v564_v6 }
 0x116   :  { %v603_v29 = vcombine.low %v595_v27, %v602_v28 }
 0x118   :  { %605 = vst [vmem:[%s747_s2] sm:$0xff] %v603_v29 }
 0x119   :  { %610 = vsyncpa [#allocation3], 1 }

// kernel: _lambda_.7
= control target key start
LH: loop header
LB: loop body
LE: loop exit
PB: predicated region body
PF: predicated region fallthrough
CT: control target
= control target key end

     0   :  { %s1295_s1 = inlined_call_operand.vmem [shape: bf16[256,128], index: 1, kind: input, shape index: {}]   ;;  %s1296_s0 = inlined_call_operand.vmem [shape: bf16[256,256], index: 0, kind: input, shape index: {}]   ;;  %s1297_s2 = inlined_call_operand.vmem [shape: bf16[256,128], index: 2, kind: output, shape index: {}]  }
   0x1   :  { %v1024_v0 = vld [vmem:[%s1295_s1 + $0x78] sm:$0xff]   ;;  %v1026_v2 = vld [vmem:[%s1295_s1 + $0x70] sm:$0xff]   ;;  %v1028_v4 = vld [vmem:[%s1295_s1 + $0x68] sm:$0xff]  }
   0x2   :  { %v1025_v1 = vld [vmem:[%s1295_s1 + $0x38] sm:$0xff]   ;;  %896 = vmatprep.subr.bf16.mxu0 %v1024_v0  ;;  %1008 = vmatprep.subr.bf16.mxu1 %v1024_v0  ;;  %v1027_v3 = vld [vmem:[%s1295_s1 + $0x30] sm:$0xff]   ;;  %v1029_v5 = vld [vmem:[%s1295_s1 + $0x28] sm:$0xff]  }
   0x3   :  { %897 = vmatpush3.bf16.msra.mxu0 %v1025_v1  ;;  %1016 = vmatpush3.bf16.msra.mxu1 %v1025_v1  ;;  %v1030_v6 = vld [vmem:[%s1295_s1 + $0x60] sm:$0xff]   ;;  %v1032_v8 = vld [vmem:[%s1295_s1 + $0x58] sm:$0xff]   ;;  %v1034_v10 = vld [vmem:[%s1295_s1 + $0x50] sm:$0xff]  }
   0x4   :  { %898 = vmatprep.subr.bf16.mxu0 %v1026_v2  ;;  %1009 = vmatprep.subr.bf16.mxu1 %v1026_v2  ;;  %v1031_v7 = vld [vmem:[%s1295_s1 + $0x20] sm:$0xff]   ;;  %v1033_v9 = vld [vmem:[%s1295_s1 + $0x18] sm:$0xff]   ;;  %v1035_v13 = vld [vmem:[%s1295_s1 + $0x10] sm:$0xff]  }
   0x5   :  { %v1042_v11 = vld [vmem:[%s1296_s0 + $0x4] ss:$8 sps:$4 sm:$0xff]   ;;  %v1040_v18 = vld [vmem:[%s1296_s0] ss:$8 sps:$4 sm:$0xff]   ;;  %v1046_v20 = vld [vmem:[%s1296_s0 + $0x14] ss:$8 sps:$4 sm:$0xff]  }
   0x6   :  { %v1045_v12 = vld [vmem:[%s1296_s0 + $0x84] ss:$8 sps:$4 sm:$0xff]   ;;  %364 = vmatprep.mubr.bf16.mxu0 %v1042_v11  ;;  %v1043_v19 = vld [vmem:[%s1296_s0 + $0x80] ss:$8 sps:$4 sm:$0xff]   ;;  %v1048_v21 = vld [vmem:[%s1296_s0 + $0x94] ss:$8 sps:$4 sm:$0xff]  }
   0x7   :  { %899 = vmatpush3.bf16.msra.mxu0 %v1027_v3  ;;  %1017 = vmatpush3.bf16.msra.mxu1 %v1027_v3  ;;  %v1036_v14 = vld [vmem:[%s1295_s1 + $0x48] sm:$0xff]   ;;  %v1038_v16 = vld [vmem:[%s1295_s1 + $0x40] sm:$0xff]   ;;  %v1050_v22 = vld [vmem:[%s1296_s0 + $0x10] ss:$8 sps:$4 sm:$0xff]  }
   0x8   :  { %900 = vmatprep.subr.bf16.mxu0 %v1028_v4  ;;  %1010 = vmatprep.subr.bf16.mxu1 %v1028_v4  ;;  %v1037_v15 = vld [vmem:[%s1295_s1 + $0x8] sm:$0xff]   ;;  %v1039_v17 = vld [vmem:[%s1295_s1] sm:$0xff]   ;;  %v1051_v23 = vld [vmem:[%s1296_s0 + $0x90] ss:$8 sps:$4 sm:$0xff]  }
   0x9   :  { %428 = vmatprep.mubr.bf16.mxu1 %v1045_v12  ;;  %v1052_v24 = vld [vmem:[%s1296_s0 + $0x24] ss:$8 sps:$4 sm:$0xff]   ;;  %v1056_v26 = vld [vmem:[%s1296_s0 + $0x20] ss:$8 sps:$4 sm:$0xff]   ;;  %v1058_v28 = vld [vmem:[%s1296_s0 + $0x34] ss:$8 sps:$4 sm:$0xff]  }
   0xa   :  { %v1054_v25 = vld [vmem:[%s1296_s0 + $0xa4] ss:$8 sps:$4 sm:$0xff]   ;;  %v1057_v27 = vld [vmem:[%s1296_s0 + $0xa0] ss:$8 sps:$4 sm:$0xff]   ;;  %v1060_v29 = vld [vmem:[%s1296_s0 + $0xb4] ss:$8 sps:$4 sm:$0xff]  }
   0xb   :  { %901 = vmatpush3.bf16.msra.mxu0 %v1029_v5  ;;  %1018 = vmatpush3.bf16.msra.mxu1 %v1029_v5  ;;  %v1062_v30 = vld [vmem:[%s1296_s0 + $0x30] ss:$8 sps:$4 sm:$0xff]   ;;  %v1064_v32 = vld [vmem:[%s1296_s0 + $0x44] ss:$8 sps:$4 sm:$0xff]   ;;  %v1068_v34 = vld [vmem:[%s1296_s0 + $0x40] ss:$8 sps:$4 sm:$0xff]  }
   0xc   :  { %902 = vmatprep.subr.bf16.mxu0 %v1030_v6  ;;  %1011 = vmatprep.subr.bf16.mxu1 %v1030_v6  ;;  %v1063_v31 = vld [vmem:[%s1296_s0 + $0xb0] ss:$8 sps:$4 sm:$0xff]   ;;  %v1066_v33 = vld [vmem:[%s1296_s0 + $0xc4] ss:$8 sps:$4 sm:$0xff]   ;;  %v1069_v35 = vld [vmem:[%s1296_s0 + $0xc0] ss:$8 sps:$4 sm:$0xff]  }
   0xd   :  { %v1070_v36 = vld [vmem:[%s1296_s0 + $0x54] ss:$8 sps:$4 sm:$0xff]   ;;  %v1074_v38 = vld [vmem:[%s1296_s0 + $0x50] ss:$8 sps:$4 sm:$0xff]   ;;  %v1076_v40 = vld [vmem:[%s1296_s0 + $0x64] ss:$8 sps:$4 sm:$0xff]  }
   0xe   :  { %v1072_v37 = vld [vmem:[%s1296_s0 + $0xd4] ss:$8 sps:$4 sm:$0xff]   ;;  %v1075_v39 = vld [vmem:[%s1296_s0 + $0xd0] ss:$8 sps:$4 sm:$0xff]   ;;  %v1078_v41 = vld [vmem:[%s1296_s0 + $0xe4] ss:$8 sps:$4 sm:$0xff]  }
   0xf   :  { %903 = vmatpush3.bf16.msra.mxu0 %v1031_v7  ;;  %1019 = vmatpush3.bf16.msra.mxu1 %v1031_v7  ;;  %v1080_v42 = vld [vmem:[%s1296_s0 + $0x60] ss:$8 sps:$4 sm:$0xff]   ;;  %v1082_v44 = vld [vmem:[%s1296_s0 + $0x74] ss:$8 sps:$4 sm:$0xff]   ;;  %v1086_v46 = vld [vmem:[%s1296_s0 + $0x70] ss:$8 sps:$4 sm:$0xff]  }
  0x10   :  { %904 = vmatprep.subr.bf16.mxu0 %v1032_v8  ;;  %1012 = vmatprep.subr.bf16.mxu1 %v1032_v8  ;;  %v1081_v43 = vld [vmem:[%s1296_s0 + $0xe0] ss:$8 sps:$4 sm:$0xff]   ;;  %v1084_v45 = vld [vmem:[%s1296_s0 + $0xf4] ss:$8 sps:$4 sm:$0xff]   ;;  %v1087_v47 = vld [vmem:[%s1296_s0 + $0xf0] ss:$8 sps:$4 sm:$0xff]  }
  0x13   :  { %905 = vmatpush3.bf16.msra.mxu0 %v1033_v9  ;;  %1020 = vmatpush3.bf16.msra.mxu1 %v1033_v9 }
  0x14   :  { %906 = vmatprep.subr.bf16.mxu0 %v1034_v10  ;;  %1013 = vmatprep.subr.bf16.mxu1 %v1034_v10 }
  0x17   :  { %907 = vmatpush3.bf16.msra.mxu0 %v1035_v13  ;;  %1021 = vmatpush3.bf16.msra.mxu1 %v1035_v13 }
  0x18   :  { %908 = vmatprep.subr.bf16.mxu0 %v1036_v14  ;;  %1014 = vmatprep.subr.bf16.mxu1 %v1036_v14 }
  0x1b   :  { %909 = vmatpush3.bf16.msra.mxu0 %v1037_v15  ;;  %1022 = vmatpush3.bf16.msra.mxu1 %v1037_v15 }
  0x1c   :  { %910 = vmatprep.subr.bf16.mxu0 %v1038_v16  ;;  %1015 = vmatprep.subr.bf16.mxu1 %v1038_v16 }
  0x1f   :  { %911 = vmatpush3.bf16.msra.mxu0 %v1039_v17  ;;  %1023 = vmatpush3.bf16.msra.mxu1 %v1039_v17 }
  0x22   :  { %365 = vmatmul.mubr.bf16.vlgmr.msra.gmra.mxu0 %v1040_v18  ;;  %429 = vmatmul.mubr.bf16.vlgmr.msra.gmra.mxu1 %v1043_v19 }
  0x23   :  { %372 = vmatprep.mubr.bf16.mxu0 %v1046_v20  ;;  %436 = vmatprep.mubr.bf16.mxu1 %v1048_v21 }
  0x2a   :  { %373 = vmatmul.mubr.bf16.gmra.mxu0 %v1050_v22  ;;  %437 = vmatmul.mubr.bf16.gmra.mxu1 %v1051_v23 }
  0x2b   :  { %380 = vmatprep.mubr.bf16.mxu0 %v1052_v24  ;;  %444 = vmatprep.mubr.bf16.mxu1 %v1054_v25 }
  0x32   :  { %381 = vmatmul.mubr.bf16.gmra.mxu0 %v1056_v26  ;;  %445 = vmatmul.mubr.bf16.gmra.mxu1 %v1057_v27 }
  0x33   :  { %388 = vmatprep.mubr.bf16.mxu0 %v1058_v28  ;;  %452 = vmatprep.mubr.bf16.mxu1 %v1060_v29 }
  0x3a   :  { %389 = vmatmul.mubr.bf16.gmra.mxu0 %v1062_v30  ;;  %453 = vmatmul.mubr.bf16.gmra.mxu1 %v1063_v31 }
  0x3b   :  { %396 = vmatprep.mubr.bf16.mxu0 %v1064_v32  ;;  %460 = vmatprep.mubr.bf16.mxu1 %v1066_v33 }
  0x42   :  { %397 = vmatmul.mubr.bf16.gmra.mxu0 %v1068_v34  ;;  %461 = vmatmul.mubr.bf16.gmra.mxu1 %v1069_v35 }
  0x43   :  { %404 = vmatprep.mubr.bf16.mxu0 %v1070_v36  ;;  %468 = vmatprep.mubr.bf16.mxu1 %v1072_v37 }
  0x4a   :  { %405 = vmatmul.mubr.bf16.gmra.mxu0 %v1074_v38  ;;  %469 = vmatmul.mubr.bf16.gmra.mxu1 %v1075_v39 }
  0x4b   :  { %412 = vmatprep.mubr.bf16.mxu0 %v1076_v40  ;;  %476 = vmatprep.mubr.bf16.mxu1 %v1078_v41 }
  0x52   :  { %413 = vmatmul.mubr.bf16.gmra.mxu0 %v1080_v42  ;;  %477 = vmatmul.mubr.bf16.gmra.mxu1 %v1081_v43 }
  0x53   :  { %420 = vmatprep.mubr.bf16.mxu0 %v1082_v44  ;;  %484 = vmatprep.mubr.bf16.mxu1 %v1084_v45 }
  0x5a   :  { %421 = vmatmul.mubr.bf16.gmra.mxu0 %v1086_v46  ;;  %485 = vmatmul.mubr.bf16.gmra.mxu1 %v1087_v47 }
  0xe2   :  { %v912_v48 = vpop.f32.mrf.mxu0  ;;  %v960_v49 = vpop.f32.mrf.mxu1 }
  0xe4   :  { %v913_v50 = vpop.f32.mrf.mxu0  ;;  %v961_v51 = vpop.f32.mrf.mxu1 }
  0xe5   :  { %v914_v54 = vadd.f32 %v913_v50, %v912_v48  ;;  %v962_v55 = vadd.f32 %v961_v51, %v960_v49 }
  0xe6   :  { %v915_v52 = vpop.f32.mrf.mxu0  ;;  %v963_v53 = vpop.f32.mrf.mxu1 }
  0xe7   :  { %v493_v62 = vmax.f32 %v914_v54, 0.0  ;;  %v509_v63 = vmax.f32 %v962_v55, 0.0 }
  0xe8   :  { %v916_v56 = vpop.f32.mrf.mxu0  ;;  %v964_v57 = vpop.f32.mrf.mxu1 }
  0xe9   :  { %v917_v58 = vadd.f32 %v916_v56, %v915_v52  ;;  %v965_v59 = vadd.f32 %v964_v57, %v963_v53 }
  0xea   :  { %v918_v60 = vpop.f32.mrf.mxu0  ;;  %v966_v61 = vpop.f32.mrf.mxu1 }
  0xeb   :  { %v494_v0 = vmax.f32 %v917_v58, 0.0  ;;  %v510_v1 = vmax.f32 %v965_v59, 0.0 }
  0xec   :  { %v919_v2 = vpop.f32.mrf.mxu0  ;;  %v967_v3 = vpop.f32.mrf.mxu1 }
  0xed   :  { %v804_v4 = vpack.c.bf16 %v494_v0, %v493_v62  ;;  %v844_v5 = vpack.c.bf16 %v510_v1, %v509_v63  ;;  %v920_v8 = vadd.f32 %v919_v2, %v918_v60  ;;  %v968_v9 = vadd.f32 %v967_v3, %v966_v61 }
  0xee   :  { %v921_v6 = vpop.f32.mrf.mxu0  ;;  %v969_v7 = vpop.f32.mrf.mxu1 }
  0xef   :  { %805 = vst [vmem:[%s1297_s2] sm:$0xff] %v804_v4   ;;  %888 = vst [vmem:[%s1297_s2 + $0x40] sm:$0xff] %v844_v5   ;;  %v495_v16 = vmax.f32 %v920_v8, 0.0  ;;  %v511_v17 = vmax.f32 %v968_v9, 0.0 }
  0xf0   :  { %v922_v10 = vpop.f32.mrf.mxu0  ;;  %v970_v11 = vpop.f32.mrf.mxu1 }
  0xf1   :  { %v923_v12 = vadd.f32 %v922_v10, %v921_v6  ;;  %v971_v13 = vadd.f32 %v970_v11, %v969_v7 }
  0xf2   :  { %v924_v14 = vpop.f32.mrf.mxu0  ;;  %v972_v15 = vpop.f32.mrf.mxu1 }
  0xf3   :  { %v496_v18 = vmax.f32 %v923_v12, 0.0  ;;  %v512_v19 = vmax.f32 %v971_v13, 0.0 }
  0xf4   :  { %v925_v20 = vpop.f32.mrf.mxu0  ;;  %v973_v21 = vpop.f32.mrf.mxu1 }
  0xf5   :  { %v809_v22 = vpack.c.bf16 %v496_v18, %v495_v16  ;;  %v849_v23 = vpack.c.bf16 %v512_v19, %v511_v17  ;;  %v926_v26 = vadd.f32 %v925_v20, %v924_v14  ;;  %v974_v27 = vadd.f32 %v973_v21, %v972_v15 }
  0xf6   :  { %v927_v24 = vpop.f32.mrf.mxu0  ;;  %v975_v25 = vpop.f32.mrf.mxu1 }
  0xf7   :  { %881 = vst [vmem:[%s1297_s2 + $0x8] sm:$0xff] %v809_v22   ;;  %889 = vst [vmem:[%s1297_s2 + $0x48] sm:$0xff] %v849_v23   ;;  %v497_v34 = vmax.f32 %v926_v26, 0.0  ;;  %v513_v35 = vmax.f32 %v974_v27, 0.0 }
  0xf8   :  { %v928_v28 = vpop.f32.mrf.mxu0  ;;  %v976_v29 = vpop.f32.mrf.mxu1 }
  0xf9   :  { %v929_v30 = vadd.f32 %v928_v28, %v927_v24  ;;  %v977_v31 = vadd.f32 %v976_v29, %v975_v25 }
  0xfa   :  { %v930_v32 = vpop.f32.mrf.mxu0  ;;  %v978_v33 = vpop.f32.mrf.mxu1 }
  0xfb   :  { %v498_v36 = vmax.f32 %v929_v30, 0.0  ;;  %v514_v37 = vmax.f32 %v977_v31, 0.0 }
  0xfc   :  { %v931_v38 = vpop.f32.mrf.mxu0  ;;  %v979_v39 = vpop.f32.mrf.mxu1 }
  0xfd   :  { %v814_v40 = vpack.c.bf16 %v498_v36, %v497_v34  ;;  %v854_v41 = vpack.c.bf16 %v514_v37, %v513_v35  ;;  %v932_v44 = vadd.f32 %v931_v38, %v930_v32  ;;  %v980_v45 = vadd.f32 %v979_v39, %v978_v33 }
  0xfe   :  { %v933_v42 = vpop.f32.mrf.mxu0  ;;  %v981_v43 = vpop.f32.mrf.mxu1 }
  0xff   :  { %882 = vst [vmem:[%s1297_s2 + $0x10] sm:$0xff] %v814_v40   ;;  %890 = vst [vmem:[%s1297_s2 + $0x50] sm:$0xff] %v854_v41   ;;  %v499_v52 = vmax.f32 %v932_v44, 0.0  ;;  %v515_v53 = vmax.f32 %v980_v45, 0.0 }
 0x100   :  { %v934_v46 = vpop.f32.mrf.mxu0  ;;  %v982_v47 = vpop.f32.mrf.mxu1 }
 0x101   :  { %v935_v48 = vadd.f32 %v934_v46, %v933_v42  ;;  %v983_v49 = vadd.f32 %v982_v47, %v981_v43 }
 0x102   :  { %v936_v50 = vpop.f32.mrf.mxu0  ;;  %v984_v51 = vpop.f32.mrf.mxu1 }
 0x103   :  { %v500_v54 = vmax.f32 %v935_v48, 0.0  ;;  %v516_v55 = vmax.f32 %v983_v49, 0.0 }
 0x104   :  { %v937_v56 = vpop.f32.mrf.mxu0  ;;  %v985_v57 = vpop.f32.mrf.mxu1 }
 0x105   :  { %v819_v58 = vpack.c.bf16 %v500_v54, %v499_v52  ;;  %v859_v59 = vpack.c.bf16 %v516_v55, %v515_v53  ;;  %v938_v62 = vadd.f32 %v937_v56, %v936_v50  ;;  %v986_v63 = vadd.f32 %v985_v57, %v984_v51 }
 0x106   :  { %v939_v60 = vpop.f32.mrf.mxu0  ;;  %v987_v61 = vpop.f32.mrf.mxu1 }
 0x107   :  { %883 = vst [vmem:[%s1297_s2 + $0x18] sm:$0xff] %v819_v58   ;;  %891 = vst [vmem:[%s1297_s2 + $0x58] sm:$0xff] %v859_v59   ;;  %v501_v6 = vmax.f32 %v938_v62, 0.0  ;;  %v517_v7 = vmax.f32 %v986_v63, 0.0 }
 0x108   :  { %v940_v0 = vpop.f32.mrf.mxu0  ;;  %v988_v1 = vpop.f32.mrf.mxu1 }
 0x109   :  { %v941_v2 = vadd.f32 %v940_v0, %v939_v60  ;;  %v989_v3 = vadd.f32 %v988_v1, %v987_v61 }
 0x10a   :  { %v942_v4 = vpop.f32.mrf.mxu0  ;;  %v990_v5 = vpop.f32.mrf.mxu1 }
 0x10b   :  { %v502_v8 = vmax.f32 %v941_v2, 0.0  ;;  %v518_v9 = vmax.f32 %v989_v3, 0.0 }
 0x10c   :  { %v943_v10 = vpop.f32.mrf.mxu0  ;;  %v991_v11 = vpop.f32.mrf.mxu1 }
 0x10d   :  { %v824_v12 = vpack.c.bf16 %v502_v8, %v501_v6  ;;  %v864_v13 = vpack.c.bf16 %v518_v9, %v517_v7  ;;  %v944_v16 = vadd.f32 %v943_v10, %v942_v4  ;;  %v992_v17 = vadd.f32 %v991_v11, %v990_v5 }
 0x10e   :  { %v945_v14 = vpop.f32.mrf.mxu0  ;;  %v993_v15 = vpop.f32.mrf.mxu1 }
 0x10f   :  { %884 = vst [vmem:[%s1297_s2 + $0x20] sm:$0xff] %v824_v12   ;;  %892 = vst [vmem:[%s1297_s2 + $0x60] sm:$0xff] %v864_v13   ;;  %v503_v24 = vmax.f32 %v944_v16, 0.0  ;;  %v519_v25 = vmax.f32 %v992_v17, 0.0 }
 0x110   :  { %v946_v18 = vpop.f32.mrf.mxu0  ;;  %v994_v19 = vpop.f32.mrf.mxu1 }
 0x111   :  { %v947_v20 = vadd.f32 %v946_v18, %v945_v14  ;;  %v995_v21 = vadd.f32 %v994_v19, %v993_v15 }
 0x112   :  { %v948_v22 = vpop.f32.mrf.mxu0  ;;  %v996_v23 = vpop.f32.mrf.mxu1 }
 0x113   :  { %v504_v26 = vmax.f32 %v947_v20, 0.0  ;;  %v520_v27 = vmax.f32 %v995_v21, 0.0 }
 0x114   :  { %v949_v28 = vpop.f32.mrf.mxu0  ;;  %v997_v29 = vpop.f32.mrf.mxu1 }
 0x115   :  { %v829_v30 = vpack.c.bf16 %v504_v26, %v503_v24  ;;  %v869_v31 = vpack.c.bf16 %v520_v27, %v519_v25  ;;  %v950_v34 = vadd.f32 %v949_v28, %v948_v22  ;;  %v998_v35 = vadd.f32 %v997_v29, %v996_v23 }
 0x116   :  { %v951_v32 = vpop.f32.mrf.mxu0  ;;  %v999_v33 = vpop.f32.mrf.mxu1 }
 0x117   :  { %885 = vst [vmem:[%s1297_s2 + $0x28] sm:$0xff] %v829_v30   ;;  %893 = vst [vmem:[%s1297_s2 + $0x68] sm:$0xff] %v869_v31   ;;  %v505_v42 = vmax.f32 %v950_v34, 0.0  ;;  %v521_v43 = vmax.f32 %v998_v35, 0.0 }
 0x118   :  { %v952_v36 = vpop.f32.mrf.mxu0  ;;  %v1000_v37 = vpop.f32.mrf.mxu1 }
 0x119   :  { %v953_v38 = vadd.f32 %v952_v36, %v951_v32  ;;  %v1001_v39 = vadd.f32 %v1000_v37, %v999_v33 }
 0x11a   :  { %v954_v40 = vpop.f32.mrf.mxu0  ;;  %v1002_v41 = vpop.f32.mrf.mxu1 }
 0x11b   :  { %v506_v44 = vmax.f32 %v953_v38, 0.0  ;;  %v522_v45 = vmax.f32 %v1001_v39, 0.0 }
 0x11c   :  { %v955_v46 = vpop.f32.mrf.mxu0  ;;  %v1003_v47 = vpop.f32.mrf.mxu1 }
 0x11d   :  { %v834_v48 = vpack.c.bf16 %v506_v44, %v505_v42  ;;  %v874_v49 = vpack.c.bf16 %v522_v45, %v521_v43  ;;  %v956_v52 = vadd.f32 %v955_v46, %v954_v40  ;;  %v1004_v53 = vadd.f32 %v1003_v47, %v1002_v41 }
 0x11e   :  { %v957_v50 = vpop.f32.mrf.mxu0  ;;  %v1005_v51 = vpop.f32.mrf.mxu1 }
 0x11f   :  { %886 = vst [vmem:[%s1297_s2 + $0x30] sm:$0xff] %v834_v48   ;;  %894 = vst [vmem:[%s1297_s2 + $0x70] sm:$0xff] %v874_v49   ;;  %v507_v58 = vmax.f32 %v956_v52, 0.0  ;;  %v523_v59 = vmax.f32 %v1004_v53, 0.0 }
 0x120   :  { %v958_v54 = vpop.f32.mrf.mxu0  ;;  %v1006_v55 = vpop.f32.mrf.mxu1 }
 0x121   :  { %v959_v56 = vadd.f32 %v958_v54, %v957_v50  ;;  %v1007_v57 = vadd.f32 %v1006_v55, %v1005_v51 }
 0x123   :  { %v508_v60 = vmax.f32 %v959_v56, 0.0  ;;  %v524_v61 = vmax.f32 %v1007_v57, 0.0 }
 0x125   :  { %v839_v62 = vpack.c.bf16 %v508_v60, %v507_v58  ;;  %v879_v63 = vpack.c.bf16 %v524_v61, %v523_v59 }
 0x127   :  { %887 = vst [vmem:[%s1297_s2 + $0x38] sm:$0xff] %v839_v62   ;;  %895 = vst [vmem:[%s1297_s2 + $0x78] sm:$0xff] %v879_v63  }

// kernel: _lambda_.8
= control target key start
LH: loop header
LB: loop body
LE: loop exit
PB: predicated region body
PF: predicated region fallthrough
CT: control target
= control target key end

     0   :  { %s1196_s9 = smov 0   ;;  %s1198_s10 = smov 0   ;;  %s1420_s0 = inlined_call_operand.vmem [shape: bf16[128,256], index: 0, kind: input, shape index: {}]   ;;  %s1421_s1 = inlined_call_operand.vmem [shape: bf16[256,256], index: 1, kind: input, shape index: {}]   ;;  %s1422_s2 = inlined_call_operand.vmem [shape: bf16[128,256], index: 2, kind: output, shape index: {}]  }
   0x1   :  { %s1200_s11 = smov 0  }
   0x2 LB: > { %s889_s12 = sadd.s32 4294967295, %s1179_s11   ;;  %s1213_s13 = sadd.s32 1, %s1179_s11   ;;  %s1179_s11 = sphi %s1200_s11, %s1426_s11   ;;  %s1175_s10 = sphi %s1198_s10, %s1425_s10   ;;  %s1171_s9 = sphi %s1196_s9, %s1424_s9  }
   0x3   : > { %s37_s14 = ssub.s32 %s1179_s11, %s1213_s13  ;;  %s40_s15 = sadd.s32 1, %s1175_s10 }
   0x4   : > { %p38_p0 = scmp.eq.s32.totalorder %s37_s14, 0  ;;  %p47_p1 = scmp.ne.s32.totalorder %s1175_s10, %s1171_s9 }
   0x5   : > { %p48_p2 = scmp.eq.s32.totalorder %s1179_s11, 0  ;;  %p77_p3 = scmp.eq.s32.totalorder %s889_s12, 1 }
   0x6   : > { %s1224_s16 = scalar_select %p38_p0, %s1175_s10, %s40_s15  }
   0x7   : > { %p49_p4 = por %p48_p2, %p47_p1  ;;  %p1226_p5 = por %p77_p3, %p47_p1 }
   0x8   : > { %p892_p6 = scmp.ge.s32.totalorder %s1179_s11, 2 }
   0xa   : > { %102 = sbr.rel (%p892_p6) target bundleno = 40 (0x28), region = 20 }
   0xf   : > { %105 = sbr.rel (!%p49_p4) target bundleno = 40 (0x28), region = 24  ;;  %s107_s18 = sand.u32 (%p49_p4), 1, %s1175_s10  }
  0x10   : > { %s894_s19 = sshll.u32 (%p49_p4), %s1179_s11, 2  ;;  %s893_s20 = sshll.u32 (%p49_p4), %s107_s18, 7 }
  0x11   : > { %s1236_s23 = scalar_lea.vmem (%p49_p4), %s1421_s1, %s894_s19  ;;  %s1240_s24 = scalar_lea.vmem (%p49_p4), [#allocation2], %s893_s20 }
  0x12   : > { %v128_v0 = vld [vmem:[%s1236_s23] sm:$0xf] (%p49_p4)  ;;  %v130_v1 = vld [vmem:[%s1236_s23 + $0x8] sm:$0xf] (%p49_p4)  ;;  %v132_v2 = vld [vmem:[%s1236_s23 + $0x10] sm:$0xf] (%p49_p4) }
  0x13   : > { %129 = vst [vmem:[%s1240_s24] sm:$0xf] (%p49_p4), %v128_v0  ;;  %131 = vst [vmem:[%s1240_s24 + $0x4] sm:$0xf] (%p49_p4), %v130_v1  ;;  %v134_v3 = vld [vmem:[%s1236_s23 + $0x18] sm:$0xf] (%p49_p4) }
  0x14   : > { %v136_v4 = vld [vmem:[%s1236_s23 + $0x20] sm:$0xf]  ;;  %133 = vst [vmem:[%s1240_s24 + $0x8] sm:$0xf] %v132_v2  ;;  %135 = vst [vmem:[%s1240_s24 + $0xc] sm:$0xf] %v134_v3 }
  0x15   : > { %137 = vst [vmem:[%s1240_s24 + $0x10] sm:$0xf] %v136_v4  ;;  %v138_v5 = vld [vmem:[%s1236_s23 + $0x28] sm:$0xf]  ;;  %v140_v6 = vld [vmem:[%s1236_s23 + $0x30] sm:$0xf] }
  0x16   : > { %v142_v7 = vld [vmem:[%s1236_s23 + $0x38] sm:$0xf]  ;;  %139 = vst [vmem:[%s1240_s24 + $0x14] sm:$0xf] %v138_v5  ;;  %141 = vst [vmem:[%s1240_s24 + $0x18] sm:$0xf] %v140_v6 }
  0x17   : > { %143 = vst [vmem:[%s1240_s24 + $0x1c] sm:$0xf] %v142_v7  ;;  %v144_v8 = vld [vmem:[%s1236_s23 + $0x40] sm:$0xf]  ;;  %v146_v9 = vld [vmem:[%s1236_s23 + $0x48] sm:$0xf] }
  0x18   : > { %v148_v10 = vld [vmem:[%s1236_s23 + $0x50] sm:$0xf]  ;;  %145 = vst [vmem:[%s1240_s24 + $0x20] sm:$0xf] %v144_v8  ;;  %147 = vst [vmem:[%s1240_s24 + $0x24] sm:$0xf] %v146_v9 }
  0x19   : > { %149 = vst [vmem:[%s1240_s24 + $0x28] sm:$0xf] %v148_v10  ;;  %v150_v11 = vld [vmem:[%s1236_s23 + $0x58] sm:$0xf]  ;;  %v152_v12 = vld [vmem:[%s1236_s23 + $0x60] sm:$0xf] }
  0x1a   : > { %v154_v13 = vld [vmem:[%s1236_s23 + $0x68] sm:$0xf]  ;;  %151 = vst [vmem:[%s1240_s24 + $0x2c] sm:$0xf] %v150_v11  ;;  %153 = vst [vmem:[%s1240_s24 + $0x30] sm:$0xf] %v152_v12 }
  0x1b   : > { %155 = vst [vmem:[%s1240_s24 + $0x34] sm:$0xf] %v154_v13  ;;  %v156_v14 = vld [vmem:[%s1236_s23 + $0x70] sm:$0xf]  ;;  %v158_v15 = vld [vmem:[%s1236_s23 + $0x78] sm:$0xf] }
  0x1c   : > { %v160_v16 = vld [vmem:[%s1236_s23 + $0x80] sm:$0xf]  ;;  %157 = vst [vmem:[%s1240_s24 + $0x38] sm:$0xf] %v156_v14  ;;  %159 = vst [vmem:[%s1240_s24 + $0x3c] sm:$0xf] %v158_v15 }
  0x1d   : > { %161 = vst [vmem:[%s1240_s24 + $0x40] sm:$0xf] %v160_v16  ;;  %v162_v17 = vld [vmem:[%s1236_s23 + $0x88] sm:$0xf]  ;;  %v164_v18 = vld [vmem:[%s1236_s23 + $0x90] sm:$0xf] }
  0x1e   : > { %v166_v19 = vld [vmem:[%s1236_s23 + $0x98] sm:$0xf]  ;;  %163 = vst [vmem:[%s1240_s24 + $0x44] sm:$0xf] %v162_v17  ;;  %165 = vst [vmem:[%s1240_s24 + $0x48] sm:$0xf] %v164_v18 }
  0x1f   : > { %167 = vst [vmem:[%s1240_s24 + $0x4c] sm:$0xf] %v166_v19  ;;  %v168_v20 = vld [vmem:[%s1236_s23 + $0xa0] sm:$0xf]  ;;  %v170_v21 = vld [vmem:[%s1236_s23 + $0xa8] sm:$0xf] }
  0x20   : > { %v172_v22 = vld [vmem:[%s1236_s23 + $0xb0] sm:$0xf]  ;;  %169 = vst [vmem:[%s1240_s24 + $0x50] sm:$0xf] %v168_v20  ;;  %171 = vst [vmem:[%s1240_s24 + $0x54] sm:$0xf] %v170_v21 }
  0x21   : > { %173 = vst [vmem:[%s1240_s24 + $0x58] sm:$0xf] %v172_v22  ;;  %v174_v23 = vld [vmem:[%s1236_s23 + $0xb8] sm:$0xf]  ;;  %v176_v24 = vld [vmem:[%s1236_s23 + $0xc0] sm:$0xf] }
  0x22   : > { %v178_v25 = vld [vmem:[%s1236_s23 + $0xc8] sm:$0xf]  ;;  %175 = vst [vmem:[%s1240_s24 + $0x5c] sm:$0xf] %v174_v23  ;;  %177 = vst [vmem:[%s1240_s24 + $0x60] sm:$0xf] %v176_v24 }
  0x23   : > { %179 = vst [vmem:[%s1240_s24 + $0x64] sm:$0xf] %v178_v25  ;;  %v180_v26 = vld [vmem:[%s1236_s23 + $0xd0] sm:$0xf]  ;;  %v182_v27 = vld [vmem:[%s1236_s23 + $0xd8] sm:$0xf] }
  0x24   : > { %v184_v28 = vld [vmem:[%s1236_s23 + $0xe0] sm:$0xf]  ;;  %181 = vst [vmem:[%s1240_s24 + $0x68] sm:$0xf] %v180_v26  ;;  %183 = vst [vmem:[%s1240_s24 + $0x6c] sm:$0xf] %v182_v27 }
  0x25   : > { %185 = vst [vmem:[%s1240_s24 + $0x70] sm:$0xf] %v184_v28  ;;  %v186_v29 = vld [vmem:[%s1236_s23 + $0xe8] sm:$0xf]  ;;  %v188_v30 = vld [vmem:[%s1236_s23 + $0xf0] sm:$0xf] }
  0x26   : > { %v190_v31 = vld [vmem:[%s1236_s23 + $0xf8] sm:$0xf]  ;;  %187 = vst [vmem:[%s1240_s24 + $0x74] sm:$0xf] %v186_v29  ;;  %189 = vst [vmem:[%s1240_s24 + $0x78] sm:$0xf] %v188_v30 }
  0x27   : > { %191 = vst [vmem:[%s1240_s24 + $0x7c] sm:$0xf] %v190_v31 }
  0x28 PF: > { %p895_p7 = scmp.ge.s32.totalorder %s1179_s11, 1  ;;  %p278_p8 = scmp.lt.s32.totalorder %s1179_s11, 3 }
  0x2a   : > { %p279_p9 = pnand %p895_p7, %p278_p8 }
  0x2b   : > { %s285_s25 = sand.u32 (!%p279_p9), 1, %s1171_s9  }
  0x2c   : > { %282 = sbr.rel (%p279_p9) target bundleno = 323 (0x143), region = 65  ;;  %s896_s26 = sshll.u32 (!%p279_p9), %s285_s25, 7 }
  0x2d   : > { %s1315_s3 = scalar_lea.vmem (!%p279_p9), [#allocation2], %s896_s26  ;;  %s897_s19 = sshll.u32 (!%p279_p9), %s285_s25, 6 }
  0x2e   : > { %s1377_s20 = scalar_lea.vmem (!%p279_p9), [#allocation3], %s897_s19 }
  0x31   : > { %v1135_v32 = vld [vmem:[%s1420_s0 + $0x4] ss:$8 sps:$4 sm:$0xff]   ;;  %v1117_v34 = vld [vmem:[%s1315_s3 + $0x78] sm:$0xff]   ;;  %v1119_v36 = vld [vmem:[%s1315_s3 + $0x70] sm:$0xff]   ;;  %s947_s9 = sshll.u32 (%p1226_p5), %s889_s12, 2 }
  0x32   : > { %v1138_v33 = vld [vmem:[%s1420_s0 + $0x44] ss:$8 sps:$4 sm:$0xff]   ;;  %562 = vmatprep.mubr.bf16.mxu0 %v1135_v32  ;;  %v1118_v35 = vld [vmem:[%s1315_s3 + $0x38] sm:$0xff]   ;;  %1013 = vmatprep.subr.bf16.mxu0 %v1117_v34  ;;  %v1120_v37 = vld [vmem:[%s1315_s3 + $0x30] sm:$0xff]   ;;  %s731_s22 = scalar_lea.vmem (%p1226_p5), %s1422_s2, %s947_s9 }
  0x33   : > { %594 = vmatprep.mubr.bf16.mxu1 %v1138_v33  ;;  %1077 = vmatprep.subr.bf16.mxu1 %v1117_v34  ;;  %v1121_v38 = vld [vmem:[%s1315_s3 + $0x68] sm:$0xff]   ;;  %v1123_v40 = vld [vmem:[%s1315_s3 + $0x60] sm:$0xff]   ;;  %v1125_v42 = vld [vmem:[%s1315_s3 + $0x58] sm:$0xff]  }
  0x34   : > { %1014 = vmatpush3.bf16.msra.mxu0 %v1118_v35  ;;  %1085 = vmatpush3.bf16.msra.mxu1 %v1118_v35  ;;  %v1122_v39 = vld [vmem:[%s1315_s3 + $0x28] sm:$0xff]   ;;  %v1124_v41 = vld [vmem:[%s1315_s3 + $0x20] sm:$0xff]   ;;  %v1126_v43 = vld [vmem:[%s1315_s3 + $0x18] sm:$0xff]  }
  0x35   : > { %1015 = vmatprep.subr.bf16.mxu0 %v1119_v36  ;;  %1078 = vmatprep.subr.bf16.mxu1 %v1119_v36  ;;  %v1127_v44 = vld [vmem:[%s1315_s3 + $0x50] sm:$0xff]   ;;  %v1129_v46 = vld [vmem:[%s1315_s3 + $0x48] sm:$0xff]   ;;  %v1131_v48 = vld [vmem:[%s1315_s3 + $0x40] sm:$0xff]  }
  0x36   : > { %v1128_v45 = vld [vmem:[%s1315_s3 + $0x10] sm:$0xff]   ;;  %v1130_v47 = vld [vmem:[%s1315_s3 + $0x8] sm:$0xff]   ;;  %v1132_v49 = vld [vmem:[%s1315_s3] sm:$0xff]  }
  0x37   : > { %v1133_v50 = vld [vmem:[%s1420_s0] ss:$8 sps:$4 sm:$0xff]   ;;  %v1139_v52 = vld [vmem:[%s1420_s0 + $0x14] ss:$8 sps:$4 sm:$0xff]   ;;  %v1143_v54 = vld [vmem:[%s1420_s0 + $0x10] ss:$8 sps:$4 sm:$0xff]  }
  0x38   : > { %1016 = vmatpush3.bf16.msra.mxu0 %v1120_v37  ;;  %1086 = vmatpush3.bf16.msra.mxu1 %v1120_v37  ;;  %v1136_v51 = vld [vmem:[%s1420_s0 + $0x40] ss:$8 sps:$4 sm:$0xff]   ;;  %v1141_v53 = vld [vmem:[%s1420_s0 + $0x54] ss:$8 sps:$4 sm:$0xff]   ;;  %v1144_v55 = vld [vmem:[%s1420_s0 + $0x50] ss:$8 sps:$4 sm:$0xff]  }
  0x39   : > { %1017 = vmatprep.subr.bf16.mxu0 %v1121_v38  ;;  %1079 = vmatprep.subr.bf16.mxu1 %v1121_v38  ;;  %v1145_v56 = vld [vmem:[%s1420_s0 + $0x24] ss:$8 sps:$4 sm:$0xff]   ;;  %v1149_v58 = vld [vmem:[%s1420_s0 + $0x20] ss:$8 sps:$4 sm:$0xff]   ;;  %v1151_v60 = vld [vmem:[%s1420_s0 + $0x34] ss:$8 sps:$4 sm:$0xff]  }
  0x3a   : > { %v1147_v57 = vld [vmem:[%s1420_s0 + $0x64] ss:$8 sps:$4 sm:$0xff]   ;;  %v1150_v59 = vld [vmem:[%s1420_s0 + $0x60] ss:$8 sps:$4 sm:$0xff]   ;;  %v1153_v61 = vld [vmem:[%s1420_s0 + $0x74] ss:$8 sps:$4 sm:$0xff]  }
  0x3b   : > { %v1155_v62 = vld [vmem:[%s1420_s0 + $0x30] ss:$8 sps:$4 sm:$0xff]  }
  0x3c   : > { %1018 = vmatpush3.bf16.msra.mxu0 %v1122_v39  ;;  %1087 = vmatpush3.bf16.msra.mxu1 %v1122_v39  ;;  %v1156_v63 = vld [vmem:[%s1420_s0 + $0x70] ss:$8 sps:$4 sm:$0xff]  }
  0x3d   : > { %1019 = vmatprep.subr.bf16.mxu0 %v1123_v40  ;;  %1080 = vmatprep.subr.bf16.mxu1 %v1123_v40 }
  0x40   : > { %1020 = vmatpush3.bf16.msra.mxu0 %v1124_v41  ;;  %1088 = vmatpush3.bf16.msra.mxu1 %v1124_v41 }
  0x41   : > { %1021 = vmatprep.subr.bf16.mxu0 %v1125_v42  ;;  %1081 = vmatprep.subr.bf16.mxu1 %v1125_v42 }
  0x44   : > { %1022 = vmatpush3.bf16.msra.mxu0 %v1126_v43  ;;  %1089 = vmatpush3.bf16.msra.mxu1 %v1126_v43 }
  0x45   : > { %1023 = vmatprep.subr.bf16.mxu0 %v1127_v44  ;;  %1082 = vmatprep.subr.bf16.mxu1 %v1127_v44 }
  0x48   : > { %1024 = vmatpush3.bf16.msra.mxu0 %v1128_v45  ;;  %1090 = vmatpush3.bf16.msra.mxu1 %v1128_v45 }
  0x49   : > { %1025 = vmatprep.subr.bf16.mxu0 %v1129_v46  ;;  %1083 = vmatprep.subr.bf16.mxu1 %v1129_v46 }
  0x4c   : > { %1026 = vmatpush3.bf16.msra.mxu0 %v1130_v47  ;;  %1091 = vmatpush3.bf16.msra.mxu1 %v1130_v47 }
  0x4d   : > { %1027 = vmatprep.subr.bf16.mxu0 %v1131_v48  ;;  %1084 = vmatprep.subr.bf16.mxu1 %v1131_v48 }
  0x50   : > { %1028 = vmatpush3.bf16.msra.mxu0 %v1132_v49  ;;  %1092 = vmatpush3.bf16.msra.mxu1 %v1132_v49 }
  0x53   : > { %563 = vmatmul.mubr.bf16.vlgmr.msra.gmra.mxu0 %v1133_v50  ;;  %595 = vmatmul.mubr.bf16.vlgmr.msra.gmra.mxu1 %v1136_v51 }
  0x54   : > { %570 = vmatprep.mubr.bf16.mxu0 %v1139_v52  ;;  %602 = vmatprep.mubr.bf16.mxu1 %v1141_v53 }
  0x5b   : > { %571 = vmatmul.mubr.bf16.gmra.mxu0 %v1143_v54  ;;  %603 = vmatmul.mubr.bf16.gmra.mxu1 %v1144_v55 }
  0x5c   : > { %578 = vmatprep.mubr.bf16.mxu0 %v1145_v56  ;;  %610 = vmatprep.mubr.bf16.mxu1 %v1147_v57 }
  0x63   : > { %579 = vmatmul.mubr.bf16.gmra.mxu0 %v1149_v58  ;;  %611 = vmatmul.mubr.bf16.gmra.mxu1 %v1150_v59 }
  0x64   : > { %586 = vmatprep.mubr.bf16.mxu0 %v1151_v60  ;;  %618 = vmatprep.mubr.bf16.mxu1 %v1153_v61 }
  0x6b   : > { %587 = vmatmul.mubr.bf16.gmra.mxu0 %v1155_v62  ;;  %619 = vmatmul.mubr.bf16.gmra.mxu1 %v1156_v63 }
 0x113   : > { %v1029_v0 = vpop.f32.mrf.mxu0  ;;  %v1053_v1 = vpop.f32.mrf.mxu1 }
 0x115   : > { %v1030_v2 = vpop.f32.mrf.mxu0  ;;  %v1054_v3 = vpop.f32.mrf.mxu1 }
 0x116   : > { %v1031_v6 = vadd.f32 %v1030_v2, %v1029_v0  ;;  %v1055_v7 = vadd.f32 %v1054_v3, %v1053_v1 }
 0x117   : > { %v1032_v4 = vpop.f32.mrf.mxu0  ;;  %v1056_v5 = vpop.f32.mrf.mxu1 }
 0x118   : > { %v627_v14 = vmax.f32 %v1031_v6, 0.0  ;;  %v635_v15 = vmax.f32 %v1055_v7, 0.0 }
 0x119   : > { %v1033_v8 = vpop.f32.mrf.mxu0  ;;  %v1057_v9 = vpop.f32.mrf.mxu1 }
 0x11a   : > { %v1034_v10 = vadd.f32 %v1033_v8, %v1032_v4  ;;  %v1058_v11 = vadd.f32 %v1057_v9, %v1056_v5 }
 0x11b   : > { %v1035_v12 = vpop.f32.mrf.mxu0  ;;  %v1059_v13 = vpop.f32.mrf.mxu1 }
 0x11c   : > { %v628_v16 = vmax.f32 %v1034_v10, 0.0  ;;  %v636_v17 = vmax.f32 %v1058_v11, 0.0 }
 0x11d   : > { %v1036_v18 = vpop.f32.mrf.mxu0  ;;  %v1060_v19 = vpop.f32.mrf.mxu1 }
 0x11e   : > { %v969_v20 = vpack.c.bf16 %v628_v16, %v627_v14  ;;  %v989_v21 = vpack.c.bf16 %v636_v17, %v635_v15  ;;  %v1037_v24 = vadd.f32 %v1036_v18, %v1035_v12  ;;  %v1061_v25 = vadd.f32 %v1060_v19, %v1059_v13 }
 0x11f   : > { %v1038_v22 = vpop.f32.mrf.mxu0  ;;  %v1062_v23 = vpop.f32.mrf.mxu1 }
 0x120   : > { %970 = vst [vmem:[%s1377_s20] sm:$0xff] %v969_v20   ;;  %1009 = vst [vmem:[%s1377_s20 + $0x20] sm:$0xff] %v989_v21   ;;  %v629_v32 = vmax.f32 %v1037_v24, 0.0  ;;  %v637_v33 = vmax.f32 %v1061_v25, 0.0 }
 0x121   : > { %v1039_v26 = vpop.f32.mrf.mxu0  ;;  %v1063_v27 = vpop.f32.mrf.mxu1 }
 0x122   : > { %v1040_v28 = vadd.f32 %v1039_v26, %v1038_v22  ;;  %v1064_v29 = vadd.f32 %v1063_v27, %v1062_v23 }
 0x123   : > { %v1041_v30 = vpop.f32.mrf.mxu0  ;;  %v1065_v31 = vpop.f32.mrf.mxu1 }
 0x124   : > { %v630_v34 = vmax.f32 %v1040_v28, 0.0  ;;  %v638_v35 = vmax.f32 %v1064_v29, 0.0 }
 0x125   : > { %v1042_v36 = vpop.f32.mrf.mxu0  ;;  %v1066_v37 = vpop.f32.mrf.mxu1 }
 0x126   : > { %v974_v38 = vpack.c.bf16 %v630_v34, %v629_v32  ;;  %v994_v39 = vpack.c.bf16 %v638_v35, %v637_v33  ;;  %v1043_v42 = vadd.f32 %v1042_v36, %v1041_v30  ;;  %v1067_v43 = vadd.f32 %v1066_v37, %v1065_v31 }
 0x127   : > { %v1044_v40 = vpop.f32.mrf.mxu0  ;;  %v1068_v41 = vpop.f32.mrf.mxu1  ;;  %v748_v8 = vld [vmem:[%s1377_s20] sm:$0xf] (%p1226_p5)  ;;  %v750_v9 = vld [vmem:[%s1377_s20 + $0x4] sm:$0xf] (%p1226_p5) }
 0x128   : > { %1006 = vst [vmem:[%s1377_s20 + $0x8] sm:$0xff] %v974_v38   ;;  %1010 = vst [vmem:[%s1377_s20 + $0x28] sm:$0xff] %v994_v39   ;;  %v631_v50 = vmax.f32 %v1043_v42, 0.0  ;;  %v639_v51 = vmax.f32 %v1067_v43, 0.0  ;;  %v764_v16 = vld [vmem:[%s1377_s20 + $0x20] sm:$0xf] (%p1226_p5) }
 0x129   : > { %v1045_v44 = vpop.f32.mrf.mxu0  ;;  %v1069_v45 = vpop.f32.mrf.mxu1  ;;  %749 = vst [vmem:[%s731_s22] sm:$0xf] (%p1226_p5), %v748_v8  ;;  %751 = vst [vmem:[%s731_s22 + $0x8] sm:$0xf] (%p1226_p5), %v750_v9  ;;  %v766_v17 = vld [vmem:[%s1377_s20 + $0x24] sm:$0xf] (%p1226_p5) }
 0x12a   : > { %v1046_v46 = vadd.f32 %v1045_v44, %v1044_v40  ;;  %v1070_v47 = vadd.f32 %v1069_v45, %v1068_v41  ;;  %765 = vst [vmem:[%s731_s22 + $0x40] sm:$0xf] (%p1226_p5), %v764_v16  ;;  %767 = vst [vmem:[%s731_s22 + $0x48] sm:$0xf] (%p1226_p5), %v766_v17 }
 0x12b   : > { %v1047_v48 = vpop.f32.mrf.mxu0  ;;  %v1071_v49 = vpop.f32.mrf.mxu1 }
 0x12c   : > { %v632_v52 = vmax.f32 %v1046_v46, 0.0  ;;  %v640_v53 = vmax.f32 %v1070_v47, 0.0 }
 0x12d   : > { %v1048_v54 = vpop.f32.mrf.mxu0  ;;  %v1072_v55 = vpop.f32.mrf.mxu1 }
 0x12e   : > { %v979_v56 = vpack.c.bf16 %v632_v52, %v631_v50  ;;  %v999_v57 = vpack.c.bf16 %v640_v53, %v639_v51  ;;  %v1049_v60 = vadd.f32 %v1048_v54, %v1047_v48  ;;  %v1073_v61 = vadd.f32 %v1072_v55, %v1071_v49 }
 0x12f   : > { %v1050_v58 = vpop.f32.mrf.mxu0  ;;  %v1074_v59 = vpop.f32.mrf.mxu1  ;;  %v752_v10 = vld [vmem:[%s1377_s20 + $0x8] sm:$0xf] (%p1226_p5)  ;;  %v754_v11 = vld [vmem:[%s1377_s20 + $0xc] sm:$0xf] (%p1226_p5) }
 0x130   : > { %1007 = vst [vmem:[%s1377_s20 + $0x10] sm:$0xff] %v979_v56   ;;  %1011 = vst [vmem:[%s1377_s20 + $0x30] sm:$0xff] %v999_v57   ;;  %v633_v2 = vmax.f32 %v1049_v60, 0.0  ;;  %v641_v3 = vmax.f32 %v1073_v61, 0.0  ;;  %v768_v18 = vld [vmem:[%s1377_s20 + $0x28] sm:$0xf] (%p1226_p5) }
 0x131   : > { %v1051_v62 = vpop.f32.mrf.mxu0  ;;  %v1075_v63 = vpop.f32.mrf.mxu1  ;;  %753 = vst [vmem:[%s731_s22 + $0x10] sm:$0xf] (%p1226_p5), %v752_v10  ;;  %755 = vst [vmem:[%s731_s22 + $0x18] sm:$0xf] (%p1226_p5), %v754_v11  ;;  %v770_v19 = vld [vmem:[%s1377_s20 + $0x2c] sm:$0xf] (%p1226_p5) }
 0x132   : > { %v1052_v0 = vadd.f32 %v1051_v62, %v1050_v58  ;;  %v1076_v1 = vadd.f32 %v1075_v63, %v1074_v59  ;;  %769 = vst [vmem:[%s731_s22 + $0x50] sm:$0xf] (%p1226_p5), %v768_v18  ;;  %771 = vst [vmem:[%s731_s22 + $0x58] sm:$0xf] (%p1226_p5), %v770_v19 }
 0x134   : > { %v634_v4 = vmax.f32 %v1052_v0, 0.0  ;;  %v642_v5 = vmax.f32 %v1076_v1, 0.0  ;;  %729 = sbr.rel (!%p1226_p5) target bundleno = 323 (0x143), region = 73 }
 0x136   : > { %v984_v6 = vpack.c.bf16 %v634_v4, %v633_v2  ;;  %v1004_v7 = vpack.c.bf16 %v642_v5, %v641_v3 }
 0x137   : > { %v756_v12 = vld [vmem:[%s1377_s20 + $0x10] sm:$0xf] (%p1226_p5)  ;;  %v758_v13 = vld [vmem:[%s1377_s20 + $0x14] sm:$0xf] (%p1226_p5) }
 0x138   : > { %1008 = vst [vmem:[%s1377_s20 + $0x18] sm:$0xff] %v984_v6   ;;  %1012 = vst [vmem:[%s1377_s20 + $0x38] sm:$0xff] %v1004_v7   ;;  %v772_v20 = vld [vmem:[%s1377_s20 + $0x30] sm:$0xf] (%p1226_p5)  ;;  %v774_v21 = vld [vmem:[%s1377_s20 + $0x34] sm:$0xf] (%p1226_p5) }
 0x139   : > { %757 = vst [vmem:[%s731_s22 + $0x20] sm:$0xf] %v756_v12  ;;  %759 = vst [vmem:[%s731_s22 + $0x28] sm:$0xf] %v758_v13 }
 0x13a   : > { %773 = vst [vmem:[%s731_s22 + $0x60] sm:$0xf] %v772_v20  ;;  %775 = vst [vmem:[%s731_s22 + $0x68] sm:$0xf] %v774_v21 }
 0x13f   : > { %v760_v14 = vld [vmem:[%s1377_s20 + $0x18] sm:$0xf]  ;;  %v762_v15 = vld [vmem:[%s1377_s20 + $0x1c] sm:$0xf] }
 0x140   : > { %761 = vst [vmem:[%s731_s22 + $0x30] sm:$0xf] %v760_v14  ;;  %763 = vst [vmem:[%s731_s22 + $0x38] sm:$0xf] %v762_v15  ;;  %v776_v22 = vld [vmem:[%s1377_s20 + $0x38] sm:$0xf] }
 0x141   : > { %v778_v23 = vld [vmem:[%s1377_s20 + $0x3c] sm:$0xf]  ;;  %777 = vst [vmem:[%s731_s22 + $0x70] sm:$0xf] %v776_v22 }
 0x142   : > { %779 = vst [vmem:[%s731_s22 + $0x78] sm:$0xf] %v778_v23 }
 0x143 PF: > { %p9_p10 = scmp.ge.s32.totalorder %s1213_s13, 4   ;;  %s1424_s9 = smov %s1175_s10 }
 0x144   : > { %s1425_s10 = smov %s1224_s16  ;;  %s1426_s11 = smov %s1213_s13 }
 0x145   :  { %11 = sbr.rel (!%p9_p10) target bundleno = 2 (0x2), region = 145 }

// kernel: _lambda_.9
= control target key start
LH: loop header
LB: loop body
LE: loop exit
PB: predicated region body
PF: predicated region fallthrough
CT: control target
= control target key end

     0   :  { %s1073_s9 = smov 0   ;;  %s1075_s10 = smov 0   ;;  %s1281_s0 = inlined_call_operand.vmem [shape: bf16[64,128], index: 0, kind: input, shape index: {}]   ;;  %s1282_s1 = inlined_call_operand.vmem [shape: bf16[128,768], index: 1, kind: input, shape index: {}]   ;;  %s1283_s2 = inlined_call_operand.vmem [shape: bf16[64,768], index: 2, kind: output, shape index: {}]  }
   0x1   :  { %s1077_s11 = smov 0  }
   0x2 LB: > { %s814_s12 = sadd.s32 4294967295, %s1055_s11   ;;  %s1090_s13 = sadd.s32 1, %s1055_s11   ;;  %s1055_s11 = sphi %s1077_s11, %s1287_s11   ;;  %s1051_s10 = sphi %s1075_s10, %s1286_s10   ;;  %s1047_s9 = sphi %s1073_s9, %s1285_s9  }
   0x3   : > { %s37_s14 = ssub.s32 %s1055_s11, %s1090_s13  ;;  %s40_s15 = sadd.s32 1, %s1051_s10 }
   0x4   : > { %p38_p0 = scmp.eq.s32.totalorder %s37_s14, 0  ;;  %p47_p1 = scmp.ne.s32.totalorder %s1051_s10, %s1047_s9 }
   0x5   : > { %p48_p2 = scmp.eq.s32.totalorder %s1055_s11, 0  ;;  %p77_p3 = scmp.eq.s32.totalorder %s814_s12, 1 }
   0x6   : > { %s1101_s16 = scalar_select %p38_p0, %s1051_s10, %s40_s15  }
   0x7   : > { %p49_p4 = por %p48_p2, %p47_p1  ;;  %p1103_p5 = por %p77_p3, %p47_p1 }
   0x8   : > { %p817_p6 = scmp.ge.s32.totalorder %s1055_s11, 2 }
   0xa   : > { %102 = sbr.rel (%p817_p6) target bundleno = 38 (0x26), region = 20 }
   0xf   : > { %105 = sbr.rel (!%p49_p4) target bundleno = 38 (0x26), region = 24  ;;  %s107_s18 = sand.u32 (%p49_p4), 1, %s1051_s10  }
  0x10   : > { %s915_s19 = smul.u32 (%p49_p4), 12, %s1055_s11 }
  0x11   : > { %s969_s20 = smul.u32 (%p49_p4), 192, %s107_s18 }
  0x12   : > { %s1113_s23 = scalar_lea.vmem (%p49_p4), %s1282_s1, %s915_s19 }
  0x13   : > { %v127_v0 = vld [vmem:[%s1113_s23] sm:$0xff] (%p49_p4)  ;;  %v129_v1 = vld [vmem:[%s1113_s23 + $0x18] sm:$0xff] (%p49_p4)  ;;  %v131_v2 = vld [vmem:[%s1113_s23 + $0x30] sm:$0xff] (%p49_p4)  ;;  %s1118_s24 = scalar_lea.vmem (%p49_p4), [#allocation2], %s969_s20 }
  0x14   : > { %128 = vst [vmem:[%s1118_s24] sm:$0xff] %v127_v0  ;;  %130 = vst [vmem:[%s1118_s24 + $0xc] sm:$0xff] %v129_v1  ;;  %v133_v3 = vld [vmem:[%s1113_s23 + $0x48] sm:$0xff]  ;;  %v135_v4 = vld [vmem:[%s1113_s23 + $0x60] sm:$0xff] }
  0x15   : > { %132 = vst [vmem:[%s1118_s24 + $0x18] sm:$0xff] %v131_v2  ;;  %v137_v5 = vld [vmem:[%s1113_s23 + $0x78] sm:$0xff]  ;;  %134 = vst [vmem:[%s1118_s24 + $0x24] sm:$0xff] %v133_v3  ;;  %v139_v6 = vld [vmem:[%s1113_s23 + $0x90] sm:$0xff] }
  0x16   : > { %136 = vst [vmem:[%s1118_s24 + $0x30] sm:$0xff] %v135_v4  ;;  %138 = vst [vmem:[%s1118_s24 + $0x3c] sm:$0xff] %v137_v5  ;;  %v141_v7 = vld [vmem:[%s1113_s23 + $0xa8] sm:$0xff]  ;;  %v143_v8 = vld [vmem:[%s1113_s23 + $0xc0] sm:$0xff] }
  0x17   : > { %140 = vst [vmem:[%s1118_s24 + $0x48] sm:$0xff] %v139_v6  ;;  %142 = vst [vmem:[%s1118_s24 + $0x54] sm:$0xff] %v141_v7  ;;  %v145_v9 = vld [vmem:[%s1113_s23 + $0xd8] sm:$0xff]  ;;  %v147_v10 = vld [vmem:[%s1113_s23 + $0xf0] sm:$0xff] }
  0x18   : > { %144 = vst [vmem:[%s1118_s24 + $0x60] sm:$0xff] %v143_v8  ;;  %v149_v11 = vld [vmem:[%s1113_s23 + $0x108] sm:$0xff]  ;;  %146 = vst [vmem:[%s1118_s24 + $0x6c] sm:$0xff] %v145_v9  ;;  %v151_v12 = vld [vmem:[%s1113_s23 + $0x120] sm:$0xff] }
  0x19   : > { %148 = vst [vmem:[%s1118_s24 + $0x78] sm:$0xff] %v147_v10  ;;  %150 = vst [vmem:[%s1118_s24 + $0x84] sm:$0xff] %v149_v11  ;;  %v153_v13 = vld [vmem:[%s1113_s23 + $0x138] sm:$0xff]  ;;  %v155_v14 = vld [vmem:[%s1113_s23 + $0x150] sm:$0xff] }
  0x1a   : > { %152 = vst [vmem:[%s1118_s24 + $0x90] sm:$0xff] %v151_v12  ;;  %154 = vst [vmem:[%s1118_s24 + $0x9c] sm:$0xff] %v153_v13  ;;  %v157_v15 = vld [vmem:[%s1113_s23 + $0x168] sm:$0xff]  ;;  %v821_v17 = vld [vmem:[%s1113_s23 + $0x20] sm:$0xf] }
  0x1b   : > { %156 = vst [vmem:[%s1118_s24 + $0xa8] sm:$0xff] %v155_v14  ;;  %v819_v16 = vld [vmem:[%s1113_s23 + $0x8] sm:$0xf]  ;;  %158 = vst [vmem:[%s1118_s24 + $0xb4] sm:$0xff] %v157_v15  ;;  %v823_v18 = vld [vmem:[%s1113_s23 + $0x38] sm:$0xf] }
  0x1c   : > { %820 = vst [vmem:[%s1118_s24 + $0x8] sm:$0xf] %v819_v16  ;;  %822 = vst [vmem:[%s1118_s24 + $0x14] sm:$0xf] %v821_v17  ;;  %v825_v19 = vld [vmem:[%s1113_s23 + $0x50] sm:$0xf] }
  0x1d   : > { %v827_v20 = vld [vmem:[%s1113_s23 + $0x68] sm:$0xf]  ;;  %824 = vst [vmem:[%s1118_s24 + $0x20] sm:$0xf] %v823_v18  ;;  %826 = vst [vmem:[%s1118_s24 + $0x2c] sm:$0xf] %v825_v19 }
  0x1e   : > { %828 = vst [vmem:[%s1118_s24 + $0x38] sm:$0xf] %v827_v20  ;;  %v829_v21 = vld [vmem:[%s1113_s23 + $0x80] sm:$0xf]  ;;  %v831_v22 = vld [vmem:[%s1113_s23 + $0x98] sm:$0xf] }
  0x1f   : > { %v833_v23 = vld [vmem:[%s1113_s23 + $0xb0] sm:$0xf]  ;;  %830 = vst [vmem:[%s1118_s24 + $0x44] sm:$0xf] %v829_v21  ;;  %832 = vst [vmem:[%s1118_s24 + $0x50] sm:$0xf] %v831_v22 }
  0x20   : > { %834 = vst [vmem:[%s1118_s24 + $0x5c] sm:$0xf] %v833_v23  ;;  %v835_v24 = vld [vmem:[%s1113_s23 + $0xc8] sm:$0xf]  ;;  %v837_v25 = vld [vmem:[%s1113_s23 + $0xe0] sm:$0xf] }
  0x21   : > { %v839_v26 = vld [vmem:[%s1113_s23 + $0xf8] sm:$0xf]  ;;  %836 = vst [vmem:[%s1118_s24 + $0x68] sm:$0xf] %v835_v24  ;;  %838 = vst [vmem:[%s1118_s24 + $0x74] sm:$0xf] %v837_v25 }
  0x22   : > { %840 = vst [vmem:[%s1118_s24 + $0x80] sm:$0xf] %v839_v26  ;;  %v841_v27 = vld [vmem:[%s1113_s23 + $0x110] sm:$0xf]  ;;  %v843_v28 = vld [vmem:[%s1113_s23 + $0x128] sm:$0xf] }
  0x23   : > { %v845_v29 = vld [vmem:[%s1113_s23 + $0x140] sm:$0xf]  ;;  %842 = vst [vmem:[%s1118_s24 + $0x8c] sm:$0xf] %v841_v27  ;;  %844 = vst [vmem:[%s1118_s24 + $0x98] sm:$0xf] %v843_v28 }
  0x24   : > { %846 = vst [vmem:[%s1118_s24 + $0xa4] sm:$0xf] %v845_v29  ;;  %v847_v30 = vld [vmem:[%s1113_s23 + $0x158] sm:$0xf]  ;;  %v849_v31 = vld [vmem:[%s1113_s23 + $0x170] sm:$0xf] }
  0x25   : > { %848 = vst [vmem:[%s1118_s24 + $0xb0] sm:$0xf] %v847_v30  ;;  %850 = vst [vmem:[%s1118_s24 + $0xbc] sm:$0xf] %v849_v31 }
  0x26 PF: > { %p851_p7 = scmp.ge.s32.totalorder %s1055_s11, 1  ;;  %p203_p8 = scmp.lt.s32.totalorder %s1055_s11, 3 }
  0x28   : > { %p204_p9 = pnand %p851_p7, %p203_p8 }
  0x29   : > { %s210_s25 = sand.u32 (!%p204_p9), 1, %s1047_s9  }
  0x2a   : > { %207 = sbr.rel (%p204_p9) target bundleno = 317 (0x13d), region = 50 }
  0x2b   : > { %s970_s26 = smul.u32 (!%p204_p9), 192, %s210_s25 }
  0x2c   : > { %s971_s8 = smul.u32 (!%p204_p9), 96, %s210_s25 }
  0x2d   : > { %s1190_s29 = scalar_lea.vmem (!%p204_p9), [#allocation2], %s970_s26 }
  0x2e   : > { %s1230_s14 = scalar_lea.vmem (!%p204_p9), [#allocation3], %s971_s8 }
  0x2f   : > { %v1057_v32 = vmov 0   ;;  %v1027_v33 = vld [vmem:[%s1281_s0] sm:$0xff]   ;;  %v997_v34 = vld [vmem:[%s1190_s29 + $0xac] ss:$12 sps:$4 sm:$0xff]   ;;  %v999_v35 = vld [vmem:[%s1190_s29 + $0xa8] ss:$12 sps:$4 sm:$0xff]  }
  0x30   : > { %457 = vmatprep.mubr.bf16.mxu0 %v1057_v32  ;;  %961 = vmatprep.mubr.bf16.mxu1 %v1027_v33  ;;  %v1000_v36 = vld [vmem:[%s1190_s29 + $0x94] ss:$12 sps:$4 sm:$0xff]   ;;  %v1002_v37 = vld [vmem:[%s1190_s29 + $0x90] ss:$12 sps:$4 sm:$0xff]   ;;  %v1005_v40 = vld [vmem:[%s1190_s29 + $0x78] ss:$12 sps:$4 sm:$0xff]  }
  0x31   : > { %425 = vmatprep.subr.bf16.mxu0 %v997_v34  ;;  %v1003_v38 = vld [vmem:[%s1190_s29 + $0x7c] ss:$12 sps:$4 sm:$0xff]   ;;  %v1010_v41 = vld [vmem:[%s1190_s29 + $0x98] ss:$12 sps:$4 sm:$0xff]   ;;  %v1014_v43 = vld [vmem:[%s1190_s29 + $0x80] ss:$12 sps:$4 sm:$0xff]  }
  0x32   : > { %426 = vmatpush1.bf16.msra.mxu0 %v999_v35  ;;  %v1006_v39 = vld [vmem:[%s1190_s29 + $0xb0] ss:$12 sps:$4 sm:$0xff]   ;;  %v1009_v44 = vld [vmem:[%s1190_s29 + $0x60] ss:$12 sps:$4 sm:$0xff]   ;;  %v1018_v46 = vld [vmem:[%s1190_s29 + $0x68] ss:$12 sps:$4 sm:$0xff]  }
  0x33   : > { %427 = vmatprep.subr.bf16.mxu0 %v1000_v36  ;;  %945 = vmatprep.subr.bf16.mxu1 %v1006_v39  ;;  %v1007_v42 = vld [vmem:[%s1190_s29 + $0x64] ss:$12 sps:$4 sm:$0xff]   ;;  %v1011_v45 = vld [vmem:[%s1190_s29 + $0x4c] ss:$12 sps:$4 sm:$0xff]   ;;  %v1013_v47 = vld [vmem:[%s1190_s29 + $0x48] ss:$12 sps:$4 sm:$0xff]  }
  0x34   : > { %946 = vmatpush3.bf16.msra.mxu1 %v1006_v39  ;;  %v1015_v48 = vld [vmem:[%s1190_s29 + $0x34] ss:$12 sps:$4 sm:$0xff]   ;;  %v1022_v49 = vld [vmem:[%s1190_s29 + $0x50] ss:$12 sps:$4 sm:$0xff]   ;;  %v1026_v52 = vld [vmem:[%s1190_s29 + $0x38] ss:$12 sps:$4 sm:$0xff]  }
  0x35   : > { %947 = vmatprep.subr.bf16.mxu1 %v1010_v41  ;;  %v1017_v50 = vld [vmem:[%s1190_s29 + $0x30] ss:$12 sps:$4 sm:$0xff]   ;;  %v1021_v53 = vld [vmem:[%s1190_s29 + $0x18] ss:$12 sps:$4 sm:$0xff]   ;;  %v1028_v55 = vld [vmem:[%s1190_s29 + $0x20] ss:$12 sps:$4 sm:$0xff]  }
  0x36   : > { %428 = vmatpush1.bf16.msra.mxu0 %v1002_v37  ;;  %v1019_v51 = vld [vmem:[%s1190_s29 + $0x1c] ss:$12 sps:$4 sm:$0xff]   ;;  %v1023_v54 = vld [vmem:[%s1190_s29 + $0x4] ss:$12 sps:$4 sm:$0xff]   ;;  %v1025_v56 = vld [vmem:[%s1190_s29] ss:$12 sps:$4 sm:$0xff]  }
  0x37   : > { %429 = vmatprep.subr.bf16.mxu0 %v1003_v38  ;;  %v1029_v57 = vld [vmem:[%s1190_s29 + $0x8] ss:$12 sps:$4 sm:$0xff]   ;;  %v1032_v60 = vld [vmem:[%s1281_s0 + $0x18] sm:$0xff]   ;;  %s932_s9 = smul.u32 (%p1103_p5), 12, %s814_s12 }
  0x38   : > { %948 = vmatpush3.bf16.msra.mxu1 %v1010_v41  ;;  %v1031_v58 = vld [vmem:[%s1281_s0 + $0x10] sm:$0xff]   ;;  %v1030_v59 = vld [vmem:[%s1281_s0 + $0x8] sm:$0xff]  }
  0x39   : > { %949 = vmatprep.subr.bf16.mxu1 %v1014_v43  ;;  %s692_s17 = scalar_lea.vmem (%p1103_p5), %s1283_s2, %s932_s9 }
  0x3a   : > { %430 = vmatpush1.bf16.msra.mxu0 %v1005_v40 }
  0x3b   : > { %431 = vmatprep.subr.bf16.mxu0 %v1007_v42 }
  0x3c   : > { %950 = vmatpush3.bf16.msra.mxu1 %v1014_v43 }
  0x3d   : > { %951 = vmatprep.subr.bf16.mxu1 %v1018_v46 }
  0x3e   : > { %432 = vmatpush1.bf16.msra.mxu0 %v1009_v44 }
  0x3f   : > { %433 = vmatprep.subr.bf16.mxu0 %v1011_v45 }
  0x40   : > { %952 = vmatpush3.bf16.msra.mxu1 %v1018_v46 }
  0x41   : > { %953 = vmatprep.subr.bf16.mxu1 %v1022_v49 }
  0x42   : > { %434 = vmatpush1.bf16.msra.mxu0 %v1013_v47 }
  0x43   : > { %435 = vmatprep.subr.bf16.mxu0 %v1015_v48 }
  0x44   : > { %954 = vmatpush3.bf16.msra.mxu1 %v1022_v49 }
  0x45   : > { %955 = vmatprep.subr.bf16.mxu1 %v1026_v52 }
  0x46   : > { %436 = vmatpush1.bf16.msra.mxu0 %v1017_v50 }
  0x47   : > { %437 = vmatprep.subr.bf16.mxu0 %v1019_v51 }
  0x48   : > { %956 = vmatpush3.bf16.msra.mxu1 %v1026_v52 }
  0x49   : > { %957 = vmatprep.subr.bf16.mxu1 %v1028_v55 }
  0x4a   : > { %438 = vmatpush1.bf16.msra.mxu0 %v1021_v53 }
  0x4b   : > { %439 = vmatprep.subr.bf16.mxu0 %v1023_v54 }
  0x4c   : > { %958 = vmatpush3.bf16.msra.mxu1 %v1028_v55 }
  0x4d   : > { %959 = vmatprep.subr.bf16.mxu1 %v1029_v57 }
  0x4e   : > { %440 = vmatpush1.bf16.msra.mxu0 %v1025_v56 }
  0x50   : > { %960 = vmatpush3.bf16.msra.mxu1 %v1029_v57 }
  0x51   : > { %458 = vmatmul.mubr.bf16.vlgmr.msra.gmra.mxu0 %v1027_v33 }
  0x52   : > { %467 = vmatprep.mubr.bf16.mxu0 %v1057_v32 }
  0x53   : > { %962 = vmatmul.mubr.bf16.vlgmr.msra.gmra.mxu1 %v1030_v59 }
  0x54   : > { %965 = vmatprep.mubr.bf16.mxu1 %v1031_v58 }
  0x59   : > { %468 = vmatmul.mubr.bf16.gmra.mxu0 %v1030_v59 }
  0x5a   : > { %477 = vmatprep.mubr.bf16.mxu0 %v1057_v32 }
  0x5b   : > { %966 = vmatmul.mubr.bf16.gmra.mxu1 %v1032_v60 }
  0x61   : > { %478 = vmatmul.mubr.bf16.gmra.mxu0 %v1031_v58 }
  0x62   : > { %487 = vmatprep.mubr.bf16.mxu0 %v1057_v32 }
  0x69   : > { %488 = vmatmul.mubr.bf16.gmra.mxu0 %v1032_v60 }
 0x111   : > { %v459_v61 = vpop.f32.mrf.mxu0 }
 0x112   : > { %v563_v63 = vmax.f32 %v459_v61, 0.0 }
 0x113   : > { %v461_v62 = vpop.f32.mrf.mxu0  ;;  %v963_v2 = vpop.f32.mrf.mxu1 }
 0x114   : > { %v564_v0 = vmax.f32 %v461_v62, 0.0  ;;  %v571_v4 = vmax.f32 %v963_v2, 0.0 }
 0x115   : > { %v463_v1 = vpop.f32.mrf.mxu0  ;;  %v532_v6 = vpop.f32.mrf.mxu1 }
 0x116   : > { %v916_v3 = vpack.c.bf16 %v564_v0, %v563_v63  ;;  %v566_v7 = vmax.f32 %v463_v1, 0.0  ;;  %v921_v9 = vpack.c.bf16 %v571_v4, %v571_v4  ;;  %v565_v10 = vmax.f32 %v532_v6, 0.0 }
 0x117   : > { %v465_v5 = vpop.f32.mrf.mxu0  ;;  %v964_v12 = vpop.f32.mrf.mxu1 }
 0x118   : > { %667 = vst [vmem:[%s1230_s14] sm:$0xff] %v916_v3  ;;  %v567_v8 = vmax.f32 %v465_v5, 0.0  ;;  %672 = vst [vmem:[%s1230_s14 + $0x20] sm:$0xf] %v921_v9  ;;  %v917_v14 = vpack.c.bf16 %v565_v10, %v565_v10  ;;  %v574_v15 = vmax.f32 %v964_v12, 0.0 }
 0x119   : > { %v469_v11 = vpop.f32.mrf.mxu0  ;;  %v535_v17 = vpop.f32.mrf.mxu1 }
 0x11a   : > { %v918_v13 = vpack.c.bf16 %v567_v8, %v566_v7  ;;  %v569_v18 = vmax.f32 %v469_v11, 0.0  ;;  %668 = vst [vmem:[%s1230_s14 + $0x8] sm:$0xf] %v917_v14  ;;  %v923_v20 = vpack.c.bf16 %v574_v15, %v574_v15  ;;  %v568_v21 = vmax.f32 %v535_v17, 0.0 }
 0x11b   : > { %v471_v16 = vpop.f32.mrf.mxu0  ;;  %v967_v23 = vpop.f32.mrf.mxu1 }
 0x11c   : > { %669 = vst [vmem:[%s1230_s14 + $0xc] sm:$0xff] %v918_v13  ;;  %v570_v19 = vmax.f32 %v471_v16, 0.0  ;;  %674 = vst [vmem:[%s1230_s14 + $0x2c] sm:$0xf] %v923_v20  ;;  %v919_v25 = vpack.c.bf16 %v568_v21, %v568_v21  ;;  %v583_v26 = vmax.f32 %v967_v23, 0.0 }
 0x11d   : > { %v473_v22 = vpop.f32.mrf.mxu0  ;;  %v548_v28 = vpop.f32.mrf.mxu1 }
 0x11e   : > { %v920_v24 = vpack.c.bf16 %v570_v19, %v569_v18  ;;  %v572_v29 = vmax.f32 %v473_v22, 0.0  ;;  %670 = vst [vmem:[%s1230_s14 + $0x14] sm:$0xf] %v919_v25  ;;  %v929_v31 = vpack.c.bf16 %v583_v26, %v583_v26  ;;  %v577_v32 = vmax.f32 %v548_v28, 0.0 }
 0x11f   : > { %v475_v27 = vpop.f32.mrf.mxu0  ;;  %v968_v34 = vpop.f32.mrf.mxu1  ;;  %v707_v61 = vld [vmem:[%s1230_s14] sm:$0xff] (%p1103_p5) }
 0x120   : > { %671 = vst [vmem:[%s1230_s14 + $0x18] sm:$0xff] %v920_v24  ;;  %v573_v30 = vmax.f32 %v475_v27, 0.0  ;;  %680 = vst [vmem:[%s1230_s14 + $0x50] sm:$0xf] %v929_v31  ;;  %v925_v36 = vpack.c.bf16 %v577_v32, %v577_v32  ;;  %v586_v37 = vmax.f32 %v968_v34, 0.0 }
 0x121   : > { %v479_v33 = vpop.f32.mrf.mxu0  ;;  %v551_v39 = vpop.f32.mrf.mxu1  ;;  %v897_v5 = vld [vmem:[%s1230_s14 + $0x8] sm:$0xf] (%p1103_p5)  ;;  %708 = vst [vmem:[%s692_s17] sm:$0xff] (%p1103_p5), %v707_v61  ;;  %v901_v7 = vld [vmem:[%s1230_s14 + $0x20] sm:$0xf] (%p1103_p5) }
 0x122   : > { %v922_v35 = vpack.c.bf16 %v573_v30, %v572_v29  ;;  %v575_v40 = vmax.f32 %v479_v33, 0.0  ;;  %676 = vst [vmem:[%s1230_s14 + $0x38] sm:$0xf] %v925_v36  ;;  %v931_v42 = vpack.c.bf16 %v586_v37, %v586_v37  ;;  %v580_v43 = vmax.f32 %v551_v39, 0.0  ;;  %898 = vst [vmem:[%s692_s17 + $0x8] sm:$0xf] (%p1103_p5), %v897_v5 }
 0x123   : > { %v481_v38 = vpop.f32.mrf.mxu0  ;;  %v709_v62 = vld [vmem:[%s1230_s14 + $0xc] sm:$0xff] (%p1103_p5)  ;;  %902 = vst [vmem:[%s692_s17 + $0x38] sm:$0xf] (%p1103_p5), %v901_v7 }
 0x124   : > { %673 = vst [vmem:[%s1230_s14 + $0x24] sm:$0xff] %v922_v35  ;;  %v576_v41 = vmax.f32 %v481_v38, 0.0  ;;  %682 = vst [vmem:[%s1230_s14 + $0x5c] sm:$0xf] %v931_v42  ;;  %v927_v46 = vpack.c.bf16 %v580_v43, %v580_v43  ;;  %v903_v8 = vld [vmem:[%s1230_s14 + $0x2c] sm:$0xf] (%p1103_p5) }
 0x125   : > { %v483_v44 = vpop.f32.mrf.mxu0  ;;  %710 = vst [vmem:[%s692_s17 + $0x18] sm:$0xff] (%p1103_p5), %v709_v62  ;;  %v899_v6 = vld [vmem:[%s1230_s14 + $0x14] sm:$0xf] (%p1103_p5)  ;;  %904 = vst [vmem:[%s692_s17 + $0x50] sm:$0xf] (%p1103_p5), %v903_v8 }
 0x126   : > { %v924_v45 = vpack.c.bf16 %v576_v41, %v575_v40  ;;  %v578_v48 = vmax.f32 %v483_v44, 0.0  ;;  %678 = vst [vmem:[%s1230_s14 + $0x44] sm:$0xf] %v927_v46  ;;  %900 = vst [vmem:[%s692_s17 + $0x20] sm:$0xf] (%p1103_p5), %v899_v6 }
 0x127   : > { %v485_v47 = vpop.f32.mrf.mxu0  ;;  %v711_v63 = vld [vmem:[%s1230_s14 + $0x18] sm:$0xff] (%p1103_p5)  ;;  %v909_v11 = vld [vmem:[%s1230_s14 + $0x50] sm:$0xf] (%p1103_p5) }
 0x128   : > { %675 = vst [vmem:[%s1230_s14 + $0x30] sm:$0xff] %v924_v45  ;;  %v579_v49 = vmax.f32 %v485_v47, 0.0  ;;  %712 = vst [vmem:[%s692_s17 + $0x30] sm:$0xff] (%p1103_p5), %v711_v63 }
 0x129   : > { %v489_v50 = vpop.f32.mrf.mxu0  ;;  %v905_v9 = vld [vmem:[%s1230_s14 + $0x38] sm:$0xf] (%p1103_p5)  ;;  %910 = vst [vmem:[%s692_s17 + $0x98] sm:$0xf] (%p1103_p5), %v909_v11 }
 0x12a   : > { %v926_v51 = vpack.c.bf16 %v579_v49, %v578_v48  ;;  %v581_v53 = vmax.f32 %v489_v50, 0.0  ;;  %906 = vst [vmem:[%s692_s17 + $0x68] sm:$0xf] (%p1103_p5), %v905_v9 }
 0x12b   : > { %v491_v52 = vpop.f32.mrf.mxu0  ;;  %v713_v0 = vld [vmem:[%s1230_s14 + $0x24] sm:$0xff] (%p1103_p5)  ;;  %v911_v12 = vld [vmem:[%s1230_s14 + $0x5c] sm:$0xf] (%p1103_p5) }
 0x12c   : > { %677 = vst [vmem:[%s1230_s14 + $0x3c] sm:$0xff] %v926_v51  ;;  %v582_v54 = vmax.f32 %v491_v52, 0.0  ;;  %714 = vst [vmem:[%s692_s17 + $0x48] sm:$0xff] (%p1103_p5), %v713_v0 }
 0x12d   : > { %v493_v55 = vpop.f32.mrf.mxu0  ;;  %v907_v10 = vld [vmem:[%s1230_s14 + $0x44] sm:$0xf] (%p1103_p5)  ;;  %912 = vst [vmem:[%s692_s17 + $0xb0] sm:$0xf] (%p1103_p5), %v911_v12 }
 0x12e   : > { %v928_v56 = vpack.c.bf16 %v582_v54, %v581_v53  ;;  %v584_v58 = vmax.f32 %v493_v55, 0.0  ;;  %908 = vst [vmem:[%s692_s17 + $0x80] sm:$0xf] (%p1103_p5), %v907_v10 }
 0x12f   : > { %v495_v57 = vpop.f32.mrf.mxu0  ;;  %v715_v1 = vld [vmem:[%s1230_s14 + $0x30] sm:$0xff] (%p1103_p5) }
 0x130   : > { %679 = vst [vmem:[%s1230_s14 + $0x48] sm:$0xff] %v928_v56  ;;  %v585_v59 = vmax.f32 %v495_v57, 0.0  ;;  %689 = sbr.rel (!%p1103_p5) target bundleno = 317 (0x13d), region = 58  ;;  %716 = vst [vmem:[%s692_s17 + $0x60] sm:$0xff] (%p1103_p5), %v715_v1 }
 0x132   : > { %v930_v60 = vpack.c.bf16 %v585_v59, %v584_v58 }
 0x133   : > { %v717_v2 = vld [vmem:[%s1230_s14 + $0x3c] sm:$0xff] (%p1103_p5) }
 0x134   : > { %681 = vst [vmem:[%s1230_s14 + $0x54] sm:$0xff] %v930_v60  ;;  %718 = vst [vmem:[%s692_s17 + $0x78] sm:$0xff] (%p1103_p5), %v717_v2 }
 0x137   : > { %v719_v3 = vld [vmem:[%s1230_s14 + $0x48] sm:$0xff] }
 0x138   : > { %720 = vst [vmem:[%s692_s17 + $0x90] sm:$0xff] %v719_v3 }
 0x13b   : > { %v721_v4 = vld [vmem:[%s1230_s14 + $0x54] sm:$0xff] }
 0x13c   : > { %722 = vst [vmem:[%s692_s17 + $0xa8] sm:$0xff] %v721_v4 }
 0x13d PF: > { %p9_p10 = scmp.ge.s32.totalorder %s1090_s13, 4   ;;  %s1285_s9 = smov %s1051_s10 }
 0x13e   : > { %s1286_s10 = smov %s1101_s16  ;;  %s1287_s11 = smov %s1090_s13 }
 0x13f   :  { %11 = sbr.rel (!%p9_p10) target bundleno = 2 (0x2), region = 127 }

// kernel: _lambda_.10
= control target key start
LH: loop header
LB: loop body
LE: loop exit
PB: predicated region body
PF: predicated region fallthrough
CT: control target
= control target key end

     0   :  { %s1325_s9 = smov 0   ;;  %s1327_s10 = smov 0   ;;  %s1599_s0 = inlined_call_operand.vmem [shape: bf16[32,64], index: 0, kind: input, shape index: {}]   ;;  %s1600_s1 = inlined_call_operand.vmem [shape: bf16[64,2304], index: 1, kind: input, shape index: {}]   ;;  %s1601_s2 = inlined_call_operand.vmem [shape: bf16[32,2304], index: 2, kind: output, shape index: {}]  }
   0x1   :  { %s1329_s11 = smov 0  }
   0x2 LB: > { %s1062_s12 = sadd.s32 4294967295, %s1307_s11   ;;  %s1342_s13 = sadd.s32 1, %s1307_s11   ;;  %s1307_s11 = sphi %s1329_s11, %s1605_s11   ;;  %s1303_s10 = sphi %s1327_s10, %s1604_s10   ;;  %s1299_s9 = sphi %s1325_s9, %s1603_s9  }
   0x3   : > { %s37_s14 = ssub.s32 %s1307_s11, %s1342_s13  ;;  %s40_s15 = sadd.s32 1, %s1303_s10 }
   0x4   : > { %p38_p0 = scmp.eq.s32.totalorder %s37_s14, 0  ;;  %p47_p1 = scmp.ne.s32.totalorder %s1303_s10, %s1299_s9 }
   0x5   : > { %p48_p2 = scmp.eq.s32.totalorder %s1307_s11, 0  ;;  %p77_p3 = scmp.eq.s32.totalorder %s1062_s12, 1 }
   0x6   : > { %s1353_s16 = scalar_select %p38_p0, %s1303_s10, %s40_s15  }
   0x7   : > { %p49_p4 = por %p48_p2, %p47_p1  ;;  %p1355_p5 = por %p77_p3, %p47_p1 }
   0x8   : > { %p1065_p6 = scmp.ge.s32.totalorder %s1307_s11, 2 }
   0xa   : > { %102 = sbr.rel (%p1065_p6) target bundleno = 41 (0x29), region = 20 }
   0xf   : > { %105 = sbr.rel (!%p49_p4) target bundleno = 41 (0x29), region = 24  ;;  %s107_s18 = sand.u32 (%p49_p4), 1, %s1303_s10  }
  0x10   : > { %s1163_s19 = smul.u32 (%p49_p4), 36, %s1307_s11 }
  0x11   : > { %s1203_s20 = smul.u32 (%p49_p4), 288, %s107_s18 }
  0x12   : > { %s1365_s23 = scalar_lea.vmem (%p49_p4), %s1600_s1, %s1163_s19 }
  0x13   : > { %v127_v0 = vld [vmem:[%s1365_s23] sm:$0xff] (%p49_p4)  ;;  %v129_v1 = vld [vmem:[%s1365_s23 + $0x8] sm:$0xff] (%p49_p4)  ;;  %v131_v2 = vld [vmem:[%s1365_s23 + $0x10] sm:$0xff] (%p49_p4)  ;;  %s1370_s24 = scalar_lea.vmem (%p49_p4), [#allocation2], %s1203_s20 }
  0x14   : > { %128 = vst [vmem:[%s1370_s24] sm:$0xff] %v127_v0  ;;  %130 = vst [vmem:[%s1370_s24 + $0x8] sm:$0xff] %v129_v1  ;;  %v133_v3 = vld [vmem:[%s1365_s23 + $0x18] sm:$0xff]  ;;  %v135_v4 = vld [vmem:[%s1365_s23 + $0x48] sm:$0xff] }
  0x15   : > { %132 = vst [vmem:[%s1370_s24 + $0x10] sm:$0xff] %v131_v2  ;;  %v137_v5 = vld [vmem:[%s1365_s23 + $0x50] sm:$0xff]  ;;  %134 = vst [vmem:[%s1370_s24 + $0x18] sm:$0xff] %v133_v3  ;;  %v139_v6 = vld [vmem:[%s1365_s23 + $0x58] sm:$0xff] }
  0x16   : > { %136 = vst [vmem:[%s1370_s24 + $0x24] sm:$0xff] %v135_v4  ;;  %138 = vst [vmem:[%s1370_s24 + $0x2c] sm:$0xff] %v137_v5  ;;  %v141_v7 = vld [vmem:[%s1365_s23 + $0x60] sm:$0xff]  ;;  %v143_v8 = vld [vmem:[%s1365_s23 + $0x90] sm:$0xff] }
  0x17   : > { %140 = vst [vmem:[%s1370_s24 + $0x34] sm:$0xff] %v139_v6  ;;  %142 = vst [vmem:[%s1370_s24 + $0x3c] sm:$0xff] %v141_v7  ;;  %v145_v9 = vld [vmem:[%s1365_s23 + $0x98] sm:$0xff]  ;;  %v147_v10 = vld [vmem:[%s1365_s23 + $0xa0] sm:$0xff] }
  0x18   : > { %144 = vst [vmem:[%s1370_s24 + $0x48] sm:$0xff] %v143_v8  ;;  %v149_v11 = vld [vmem:[%s1365_s23 + $0xa8] sm:$0xff]  ;;  %146 = vst [vmem:[%s1370_s24 + $0x50] sm:$0xff] %v145_v9  ;;  %v151_v12 = vld [vmem:[%s1365_s23 + $0xd8] sm:$0xff] }
  0x19   : > { %148 = vst [vmem:[%s1370_s24 + $0x58] sm:$0xff] %v147_v10  ;;  %150 = vst [vmem:[%s1370_s24 + $0x60] sm:$0xff] %v149_v11  ;;  %v153_v13 = vld [vmem:[%s1365_s23 + $0xe0] sm:$0xff]  ;;  %v155_v14 = vld [vmem:[%s1365_s23 + $0xe8] sm:$0xff] }
  0x1a   : > { %152 = vst [vmem:[%s1370_s24 + $0x6c] sm:$0xff] %v151_v12  ;;  %154 = vst [vmem:[%s1370_s24 + $0x74] sm:$0xff] %v153_v13  ;;  %v157_v15 = vld [vmem:[%s1365_s23 + $0xf0] sm:$0xff]  ;;  %v159_v16 = vld [vmem:[%s1365_s23 + $0x120] sm:$0xff] }
  0x1b   : > { %156 = vst [vmem:[%s1370_s24 + $0x7c] sm:$0xff] %v155_v14  ;;  %v161_v17 = vld [vmem:[%s1365_s23 + $0x128] sm:$0xff]  ;;  %158 = vst [vmem:[%s1370_s24 + $0x84] sm:$0xff] %v157_v15  ;;  %v163_v18 = vld [vmem:[%s1365_s23 + $0x130] sm:$0xff] }
  0x1c   : > { %160 = vst [vmem:[%s1370_s24 + $0x90] sm:$0xff] %v159_v16  ;;  %162 = vst [vmem:[%s1370_s24 + $0x98] sm:$0xff] %v161_v17  ;;  %v165_v19 = vld [vmem:[%s1365_s23 + $0x138] sm:$0xff]  ;;  %v167_v20 = vld [vmem:[%s1365_s23 + $0x168] sm:$0xff] }
  0x1d   : > { %164 = vst [vmem:[%s1370_s24 + $0xa0] sm:$0xff] %v163_v18  ;;  %166 = vst [vmem:[%s1370_s24 + $0xa8] sm:$0xff] %v165_v19  ;;  %v169_v21 = vld [vmem:[%s1365_s23 + $0x170] sm:$0xff]  ;;  %v171_v22 = vld [vmem:[%s1365_s23 + $0x178] sm:$0xff] }
  0x1e   : > { %168 = vst [vmem:[%s1370_s24 + $0xb4] sm:$0xff] %v167_v20  ;;  %v173_v23 = vld [vmem:[%s1365_s23 + $0x180] sm:$0xff]  ;;  %170 = vst [vmem:[%s1370_s24 + $0xbc] sm:$0xff] %v169_v21  ;;  %v175_v24 = vld [vmem:[%s1365_s23 + $0x1b0] sm:$0xff] }
  0x1f   : > { %172 = vst [vmem:[%s1370_s24 + $0xc4] sm:$0xff] %v171_v22  ;;  %174 = vst [vmem:[%s1370_s24 + $0xcc] sm:$0xff] %v173_v23  ;;  %v177_v25 = vld [vmem:[%s1365_s23 + $0x1b8] sm:$0xff]  ;;  %v179_v26 = vld [vmem:[%s1365_s23 + $0x1c0] sm:$0xff] }
  0x20   : > { %176 = vst [vmem:[%s1370_s24 + $0xd8] sm:$0xff] %v175_v24  ;;  %178 = vst [vmem:[%s1370_s24 + $0xe0] sm:$0xff] %v177_v25  ;;  %v181_v27 = vld [vmem:[%s1365_s23 + $0x1c8] sm:$0xff]  ;;  %v183_v28 = vld [vmem:[%s1365_s23 + $0x1f8] sm:$0xff] }
  0x21   : > { %180 = vst [vmem:[%s1370_s24 + $0xe8] sm:$0xff] %v179_v26  ;;  %v185_v29 = vld [vmem:[%s1365_s23 + $0x200] sm:$0xff]  ;;  %182 = vst [vmem:[%s1370_s24 + $0xf0] sm:$0xff] %v181_v27  ;;  %v187_v30 = vld [vmem:[%s1365_s23 + $0x208] sm:$0xff] }
  0x22   : > { %184 = vst [vmem:[%s1370_s24 + $0xfc] sm:$0xff] %v183_v28  ;;  %186 = vst [vmem:[%s1370_s24 + $0x104] sm:$0xff] %v185_v29  ;;  %v189_v31 = vld [vmem:[%s1365_s23 + $0x210] sm:$0xff]  ;;  %v1067_v32 = vld [vmem:[%s1365_s23 + $0x20] sm:$0xf] }
  0x23   : > { %188 = vst [vmem:[%s1370_s24 + $0x10c] sm:$0xff] %v187_v30  ;;  %190 = vst [vmem:[%s1370_s24 + $0x114] sm:$0xff] %v189_v31  ;;  %v1069_v33 = vld [vmem:[%s1365_s23 + $0x68] sm:$0xf]  ;;  %v1071_v34 = vld [vmem:[%s1365_s23 + $0xb0] sm:$0xf] }
  0x24   : > { %1068 = vst [vmem:[%s1370_s24 + $0x20] sm:$0xf] %v1067_v32  ;;  %v1073_v35 = vld [vmem:[%s1365_s23 + $0xf8] sm:$0xf]  ;;  %1070 = vst [vmem:[%s1370_s24 + $0x44] sm:$0xf] %v1069_v33 }
  0x25   : > { %1072 = vst [vmem:[%s1370_s24 + $0x68] sm:$0xf] %v1071_v34  ;;  %1074 = vst [vmem:[%s1370_s24 + $0x8c] sm:$0xf] %v1073_v35  ;;  %v1075_v36 = vld [vmem:[%s1365_s23 + $0x140] sm:$0xf] }
  0x26   : > { %v1077_v37 = vld [vmem:[%s1365_s23 + $0x188] sm:$0xf]  ;;  %v1079_v38 = vld [vmem:[%s1365_s23 + $0x1d0] sm:$0xf]  ;;  %1076 = vst [vmem:[%s1370_s24 + $0xb0] sm:$0xf] %v1075_v36 }
  0x27   : > { %1078 = vst [vmem:[%s1370_s24 + $0xd4] sm:$0xf] %v1077_v37  ;;  %1080 = vst [vmem:[%s1370_s24 + $0xf8] sm:$0xf] %v1079_v38  ;;  %v1081_v39 = vld [vmem:[%s1365_s23 + $0x218] sm:$0xf] }
  0x28   : > { %1082 = vst [vmem:[%s1370_s24 + $0x11c] sm:$0xf] %v1081_v39 }
  0x29 PF: > { %p1083_p7 = scmp.ge.s32.totalorder %s1307_s11, 1  ;;  %p219_p8 = scmp.lt.s32.totalorder %s1307_s11, 3 }
  0x2b   : > { %p220_p9 = pnand %p1083_p7, %p219_p8 }
  0x2c   : > { %s226_s25 = sand.u32 (!%p220_p9), 1, %s1299_s9  }
  0x2d   : > { %223 = sbr.rel (%p220_p9) target bundleno = 312 (0x138), region = 50 }
  0x2e   : > { %s1204_s26 = smul.u32 (!%p220_p9), 288, %s226_s25 }
  0x2f   : > { %s1205_s4 = smul.u32 (!%p220_p9), 144, %s226_s25 }
  0x30   : > { %s1456_s27 = scalar_lea.vmem (!%p220_p9), [#allocation2], %s1204_s26 }
  0x31   : > { %s1518_s5 = scalar_lea.vmem (!%p220_p9), [#allocation3], %s1205_s4 }
  0x32   : > { %v1309_v40 = vmov 0   ;;  %v1231_v41 = vld [vmem:[%s1456_s27 + $0xdc] ss:$36 sps:$4 sm:$0xff]   ;;  %v1234_v43 = vld [vmem:[%s1456_s27 + $0xe4] ss:$36 sps:$4 sm:$0xff]   ;;  %vm487_vm0 = vcmask 523264  }
  0x33   : > { %526 = vmatprep.mubr.bf16.mxu0 %v1309_v40  ;;  %579 = vmatprep.mubr.bf16.mxu1 %v1309_v40  ;;  %v1233_v42 = vld [vmem:[%s1456_s27 + $0xd8] ss:$36 sps:$4 sm:$0xff]   ;;  %v1238_v45 = vld [vmem:[%s1456_s27 + $0xe0] ss:$36 sps:$4 sm:$0xff]   ;;  %v1239_v46 = vld [vmem:[%s1456_s27 + $0x90] ss:$36 sps:$4 sm:$0xff]  }
  0x34   : > { %502 = vmatprep.subr.bf16.mxu0 %v1231_v41  ;;  %v1236_v44 = vld [vmem:[%s1456_s27 + $0x94] ss:$36 sps:$4 sm:$0xff]   ;;  %555 = vmatprep.subr.bf16.mxu1 %v1234_v43  ;;  %v1240_v47 = vld [vmem:[%s1456_s27 + $0x9c] ss:$36 sps:$4 sm:$0xff]   ;;  %v1242_v48 = vld [vmem:[%s1456_s27 + $0x4c] ss:$36 sps:$4 sm:$0xff]  }
  0x35   : > { %503 = vmatpush1.bf16.msra.mxu0 %v1233_v42  ;;  %556 = vmatpush1.bf16.msra.mxu1 %v1238_v45  ;;  %v1244_v49 = vld [vmem:[%s1456_s27 + $0x98] ss:$36 sps:$4 sm:$0xff]   ;;  %v1245_v50 = vld [vmem:[%s1456_s27 + $0x48] ss:$36 sps:$4 sm:$0xff]   ;;  %v1250_v53 = vld [vmem:[%s1456_s27 + $0x50] ss:$36 sps:$4 sm:$0xff]  }
  0x36   : > { %504 = vmatprep.subr.bf16.mxu0 %v1236_v44  ;;  %557 = vmatprep.subr.bf16.mxu1 %v1240_v47  ;;  %v1246_v51 = vld [vmem:[%s1456_s27 + $0x54] ss:$36 sps:$4 sm:$0xff]   ;;  %v1248_v52 = vld [vmem:[%s1456_s27 + $0x4] ss:$36 sps:$4 sm:$0xff]   ;;  %v1252_v54 = vld [vmem:[%s1456_s27 + $0xc] ss:$36 sps:$4 sm:$0xff]  }
  0x37   : > { %v1251_v55 = vld [vmem:[%s1456_s27] ss:$36 sps:$4 sm:$0xff]   ;;  %v1258_v56 = vld [vmem:[%s1456_s27 + $0xec] ss:$36 sps:$4 sm:$0xff]   ;;  %v1261_v59 = vld [vmem:[%s1456_s27 + $0xf4] ss:$36 sps:$4 sm:$0xff]  }
  0x38   : > { %v1255_v57 = vld [vmem:[%s1456_s27 + $0x8] ss:$36 sps:$4 sm:$0xff]   ;;  %v1254_v58 = vld [vmem:[%s1599_s0] sm:$0xff]   ;;  %v1259_v62 = vld [vmem:[%s1456_s27 + $0xf0] ss:$36 sps:$4 sm:$0xff]   ;;  %s1184_s6 = smul.u32 (%p1355_p5), 36, %s1062_s12 }
  0x39   : > { %505 = vmatpush1.bf16.msra.mxu0 %v1239_v46  ;;  %558 = vmatpush1.bf16.msra.mxu1 %v1244_v49  ;;  %v1256_v60 = vld [vmem:[%s1456_s27 + $0xe8] ss:$36 sps:$4 sm:$0xff]   ;;  %v1262_v0 = vld [vmem:[%s1456_s27 + $0xa0] ss:$36 sps:$4 sm:$0xff]   ;;  %v1269_v5 = vld [vmem:[%s1456_s27 + $0x58] ss:$36 sps:$4 sm:$0xff]  }
  0x3a   : > { %506 = vmatprep.subr.bf16.mxu0 %v1242_v48  ;;  %559 = vmatprep.subr.bf16.mxu1 %v1246_v51  ;;  %v1264_v61 = vld [vmem:[%s1456_s27 + $0xa4] ss:$36 sps:$4 sm:$0xff]   ;;  %v1267_v63 = vld [vmem:[%s1456_s27 + $0xac] ss:$36 sps:$4 sm:$0xff]   ;;  %v1271_v2 = vld [vmem:[%s1456_s27 + $0x5c] ss:$36 sps:$4 sm:$0xff]   ;;  %s1553_s9 = scalar_lea.vmem (%p1355_p5), %s1601_s2, %s1184_s6 }
  0x3b   : > { %v1268_v1 = vld [vmem:[%s1599_s0 + $0x8] sm:$0xff]   ;;  %v1277_v6 = vld [vmem:[%s1456_s27 + $0x14] ss:$36 sps:$4 sm:$0xff]   ;;  %v1272_v7 = vld [vmem:[%s1456_s27 + $0x60] ss:$36 sps:$4 sm:$0xff]  }
  0x3c   : > { %v1265_v3 = vld [vmem:[%s1456_s27 + $0xa8] ss:$36 sps:$4 sm:$0xff]   ;;  %v1280_v8 = vld [vmem:[%s1456_s27 + $0x1c] ss:$36 sps:$4 sm:$0xff]   ;;  %v1275_v9 = vld [vmem:[%s1456_s27 + $0x10] ss:$36 sps:$4 sm:$0xff]  }
  0x3d   : > { %507 = vmatpush1.bf16.msra.mxu0 %v1245_v50  ;;  %560 = vmatpush1.bf16.msra.mxu1 %v1250_v53  ;;  %v1274_v4 = vld [vmem:[%s1456_s27 + $0x64] ss:$36 sps:$4 sm:$0xff]   ;;  %v1281_v10 = vld [vmem:[%s1456_s27 + $0xf8] ss:$36 sps:$4 sm:$0xff]   ;;  %v1282_v12 = vld [vmem:[%s1456_s27 + $0xb0] ss:$36 sps:$4 sm:$0xff]  }
  0x3e   : > { %508 = vmatprep.subr.bf16.mxu0 %v1248_v52  ;;  %561 = vmatprep.subr.bf16.mxu1 %v1252_v54  ;;  %v1278_v11 = vld [vmem:[%s1456_s27 + $0x18] ss:$36 sps:$4 sm:$0xff]   ;;  %v1283_v13 = vld [vmem:[%s1456_s27 + $0x68] ss:$36 sps:$4 sm:$0xff]   ;;  %v1284_v14 = vld [vmem:[%s1456_s27 + $0x20] ss:$36 sps:$4 sm:$0xff]  }
  0x41   : > { %509 = vmatpush1.bf16.msra.mxu0 %v1251_v55  ;;  %562 = vmatpush1.bf16.msra.mxu1 %v1255_v57 }
  0x42   : > { %608 = vmatprep.subr.bf16.mxu0 %v1258_v56  ;;  %661 = vmatprep.subr.bf16.mxu1 %v1261_v59 }
  0x44   : > { %1122 = vmatmul.mubr.msk.bf16.vlgmr.msra.gmra.mxu0 %vm487_vm0, %v1254_v58  ;;  %1124 = vmatmul.mubr.msk.bf16.vlgmr.msra.gmra.mxu1 %vm487_vm0, %v1254_v58 }
  0x45   : > { %609 = vmatpush1.bf16.msra.mxu0 %v1256_v60  ;;  %536 = vmatprep.mubr.bf16.mxu0 %v1309_v40 }
  0x46   : > { %610 = vmatprep.subr.bf16.mxu0 %v1264_v61  ;;  %662 = vmatpush1.bf16.msra.mxu1 %v1259_v62 }
  0x47   : > { %589 = vmatprep.mubr.bf16.mxu1 %v1309_v40  ;;  %663 = vmatprep.subr.bf16.mxu1 %v1267_v63 }
  0x49   : > { %611 = vmatpush1.bf16.msra.mxu0 %v1262_v0 }
  0x4a   : > { %612 = vmatprep.subr.bf16.mxu0 %v1271_v2  ;;  %664 = vmatpush1.bf16.msra.mxu1 %v1265_v3 }
  0x4b   : > { %665 = vmatprep.subr.bf16.mxu1 %v1274_v4 }
  0x4c   : > { %1123 = vmatmul.mubr.msk.bf16.gmra.mxu0 %vm487_vm0, %v1268_v1  ;;  %1125 = vmatmul.mubr.msk.bf16.gmra.mxu1 %vm487_vm0, %v1268_v1 }
  0x4d   : > { %613 = vmatpush1.bf16.msra.mxu0 %v1269_v5  ;;  %632 = vmatprep.mubr.bf16.mxu0 %v1309_v40 }
  0x4e   : > { %614 = vmatprep.subr.bf16.mxu0 %v1277_v6  ;;  %666 = vmatpush1.bf16.msra.mxu1 %v1272_v7 }
  0x4f   : > { %685 = vmatprep.mubr.bf16.mxu1 %v1309_v40  ;;  %667 = vmatprep.subr.bf16.mxu1 %v1280_v8 }
  0x51   : > { %615 = vmatpush1.bf16.msra.mxu0 %v1275_v9 }
  0x52   : > { %1191 = vmatprep.subr.bf16.mxu0 %v1281_v10  ;;  %668 = vmatpush1.bf16.msra.mxu1 %v1278_v11 }
  0x54   : > { %1126 = vmatmul.mubr.msk.bf16.vlgmr.msra.gmra.mxu0 %vm487_vm0, %v1254_v58 }
  0x55   : > { %1192 = vmatpush3.bf16.msra.mxu0 %v1281_v10  ;;  %642 = vmatprep.mubr.bf16.mxu0 %v1309_v40 }
  0x56   : > { %1128 = vmatmul.mubr.msk.bf16.vlgmr.msra.gmra.mxu1 %vm487_vm0, %v1254_v58  ;;  %1193 = vmatprep.subr.bf16.mxu0 %v1282_v12 }
  0x57   : > { %695 = vmatprep.mubr.bf16.mxu1 %v1309_v40 }
  0x59   : > { %1194 = vmatpush3.bf16.msra.mxu0 %v1282_v12 }
  0x5a   : > { %1195 = vmatprep.subr.bf16.mxu0 %v1283_v13 }
  0x5c   : > { %1127 = vmatmul.mubr.msk.bf16.gmra.mxu0 %vm487_vm0, %v1268_v1 }
  0x5d   : > { %1196 = vmatpush3.bf16.msra.mxu0 %v1283_v13  ;;  %1199 = vmatprep.mubr.msk.bf16.mxu0 %vm487_vm0, %v1254_v58 }
  0x5e   : > { %1129 = vmatmul.mubr.msk.bf16.gmra.mxu1 %vm487_vm0, %v1268_v1  ;;  %1197 = vmatprep.subr.bf16.mxu0 %v1284_v14 }
  0x61   : > { %1198 = vmatpush3.bf16.msra.mxu0 %v1284_v14 }
  0x64   : > { %1200 = vmatmul.mubr.msk.bf16.vlgmr.msra.gmra.mxu0 %vm487_vm0, %v1268_v1 }
 0x104   : > { %v528_v15 = vpop.f32.mrf.mxu0  ;;  %v581_v17 = vpop.f32.mrf.mxu1 }
 0x105   : > { %v755_v18 = vmax.f32 %v528_v15, 0.0  ;;  %v757_v20 = vmax.f32 %v581_v17, 0.0 }
 0x106   : > { %v530_v16 = vpop.f32.mrf.mxu0  ;;  %v583_v22 = vpop.f32.mrf.mxu1 }
 0x107   : > { %v756_v19 = vmax.f32 %v530_v16, 0.0  ;;  %v758_v24 = vmax.f32 %v583_v22, 0.0 }
 0x108   : > { %v532_v21 = vpop.f32.mrf.mxu0  ;;  %v585_v26 = vpop.f32.mrf.mxu1 }
 0x109   : > { %v1164_v23 = vpack.c.bf16 %v756_v19, %v755_v18  ;;  %v764_v27 = vmax.f32 %v532_v21, 0.0  ;;  %v1165_v28 = vpack.c.bf16 %v758_v24, %v757_v20  ;;  %v766_v30 = vmax.f32 %v585_v26, 0.0 }
 0x10a   : > { %v534_v25 = vpop.f32.mrf.mxu0  ;;  %v587_v32 = vpop.f32.mrf.mxu1 }
 0x10b   : > { %903 = vst [vmem:[%s1518_s5] sm:$0xff] %v1164_v23  ;;  %v765_v29 = vmax.f32 %v534_v25, 0.0  ;;  %904 = vst [vmem:[%s1518_s5 + $0x8] sm:$0xff] %v1165_v28  ;;  %v767_v34 = vmax.f32 %v587_v32, 0.0 }
 0x10c   : > { %v538_v31 = vpop.f32.mrf.mxu0  ;;  %v591_v36 = vpop.f32.mrf.mxu1 }
 0x10d   : > { %v1169_v33 = vpack.c.bf16 %v765_v29, %v764_v27  ;;  %v773_v37 = vmax.f32 %v538_v31, 0.0  ;;  %v1170_v38 = vpack.c.bf16 %v767_v34, %v766_v30  ;;  %v775_v40 = vmax.f32 %v591_v36, 0.0 }
 0x10e   : > { %v540_v35 = vpop.f32.mrf.mxu0  ;;  %v593_v42 = vpop.f32.mrf.mxu1 }
 0x10f   : > { %908 = vst [vmem:[%s1518_s5 + $0x24] sm:$0xff] %v1169_v33  ;;  %v774_v39 = vmax.f32 %v540_v35, 0.0  ;;  %909 = vst [vmem:[%s1518_s5 + $0x2c] sm:$0xff] %v1170_v38  ;;  %v776_v44 = vmax.f32 %v593_v42, 0.0 }
 0x110   : > { %v542_v41 = vpop.f32.mrf.mxu0  ;;  %v595_v46 = vpop.f32.mrf.mxu1 }
 0x111   : > { %v1174_v43 = vpack.c.bf16 %v774_v39, %v773_v37  ;;  %v782_v47 = vmax.f32 %v542_v41, 0.0  ;;  %v1175_v48 = vpack.c.bf16 %v776_v44, %v775_v40  ;;  %v784_v50 = vmax.f32 %v595_v46, 0.0 }
 0x112   : > { %v544_v45 = vpop.f32.mrf.mxu0  ;;  %v597_v52 = vpop.f32.mrf.mxu1  ;;  %v949_v44 = vld [vmem:[%s1518_s5 + $0x8] sm:$0xff] (%p1355_p5) }
 0x113   : > { %913 = vst [vmem:[%s1518_s5 + $0x48] sm:$0xff] %v1174_v43  ;;  %v783_v49 = vmax.f32 %v544_v45, 0.0  ;;  %914 = vst [vmem:[%s1518_s5 + $0x50] sm:$0xff] %v1175_v48  ;;  %v785_v54 = vmax.f32 %v597_v52, 0.0  ;;  %v947_v43 = vld [vmem:[%s1518_s5] sm:$0xff] (%p1355_p5) }
 0x114   : > { %v634_v51 = vpop.f32.mrf.mxu0  ;;  %948 = vst [vmem:[%s1553_s9] sm:$0xff] (%p1355_p5), %v947_v43  ;;  %950 = vst [vmem:[%s1553_s9 + $0x8] sm:$0xff] (%p1355_p5), %v949_v44 }
 0x115   : > { %v1179_v53 = vpack.c.bf16 %v783_v49, %v782_v47  ;;  %v759_v57 = vmax.f32 %v634_v51, 0.0  ;;  %v1180_v58 = vpack.c.bf16 %v785_v54, %v784_v50 }
 0x116   : > { %v636_v55 = vpop.f32.mrf.mxu0  ;;  %v687_v56 = vpop.f32.mrf.mxu1  ;;  %v955_v47 = vld [vmem:[%s1518_s5 + $0x24] sm:$0xff] (%p1355_p5)  ;;  %v957_v48 = vld [vmem:[%s1518_s5 + $0x2c] sm:$0xff] (%p1355_p5) }
 0x117   : > { %918 = vst [vmem:[%s1518_s5 + $0x6c] sm:$0xff] %v1179_v53  ;;  %v760_v59 = vmax.f32 %v636_v55, 0.0  ;;  %v761_v60 = vmax.f32 %v687_v56, 0.0  ;;  %919 = vst [vmem:[%s1518_s5 + $0x74] sm:$0xff] %v1180_v58 }
 0x118   : > { %v638_v61 = vpop.f32.mrf.mxu0  ;;  %v689_v62 = vpop.f32.mrf.mxu1  ;;  %956 = vst [vmem:[%s1553_s9 + $0x48] sm:$0xff] (%p1355_p5), %v955_v47  ;;  %958 = vst [vmem:[%s1553_s9 + $0x50] sm:$0xff] (%p1355_p5), %v957_v48 }
 0x119   : > { %v1166_v63 = vpack.c.bf16 %v760_v59, %v759_v57  ;;  %v762_v0 = vmax.f32 %v689_v62, 0.0  ;;  %v768_v3 = vmax.f32 %v638_v61, 0.0 }
 0x11a   : > { %v640_v1 = vpop.f32.mrf.mxu0  ;;  %v691_v2 = vpop.f32.mrf.mxu1  ;;  %v963_v51 = vld [vmem:[%s1518_s5 + $0x48] sm:$0xff] (%p1355_p5)  ;;  %v965_v52 = vld [vmem:[%s1518_s5 + $0x50] sm:$0xff] (%p1355_p5) }
 0x11b   : > { %905 = vst [vmem:[%s1518_s5 + $0x10] sm:$0xff] %v1166_v63  ;;  %v1167_v4 = vpack.c.bf16 %v762_v0, %v761_v60  ;;  %v769_v5 = vmax.f32 %v640_v1, 0.0  ;;  %v770_v6 = vmax.f32 %v691_v2, 0.0  ;;  %964 = vst [vmem:[%s1553_s9 + $0x90] sm:$0xff] (%p1355_p5), %v963_v51 }
 0x11c   : > { %v644_v7 = vpop.f32.mrf.mxu0  ;;  %v693_v8 = vpop.f32.mrf.mxu1  ;;  %966 = vst [vmem:[%s1553_s9 + $0x98] sm:$0xff] (%p1355_p5), %v965_v52 }
 0x11d   : > { %906 = vst [vmem:[%s1518_s5 + $0x18] sm:$0xff] %v1167_v4  ;;  %v1171_v9 = vpack.c.bf16 %v769_v5, %v768_v3  ;;  %v771_v10 = vmax.f32 %v693_v8, 0.0  ;;  %v777_v13 = vmax.f32 %v644_v7, 0.0 }
 0x11e   : > { %v646_v11 = vpop.f32.mrf.mxu0  ;;  %v697_v12 = vpop.f32.mrf.mxu1  ;;  %v971_v55 = vld [vmem:[%s1518_s5 + $0x6c] sm:$0xff] (%p1355_p5)  ;;  %v973_v56 = vld [vmem:[%s1518_s5 + $0x74] sm:$0xff] (%p1355_p5) }
 0x11f   : > { %910 = vst [vmem:[%s1518_s5 + $0x34] sm:$0xff] %v1171_v9  ;;  %v1172_v14 = vpack.c.bf16 %v771_v10, %v770_v6  ;;  %v778_v15 = vmax.f32 %v646_v11, 0.0  ;;  %v779_v16 = vmax.f32 %v697_v12, 0.0  ;;  %972 = vst [vmem:[%s1553_s9 + $0xd8] sm:$0xff] (%p1355_p5), %v971_v55 }
 0x120   : > { %v648_v17 = vpop.f32.mrf.mxu0  ;;  %v699_v18 = vpop.f32.mrf.mxu1  ;;  %974 = vst [vmem:[%s1553_s9 + $0xe0] sm:$0xff] (%p1355_p5), %v973_v56 }
 0x121   : > { %911 = vst [vmem:[%s1518_s5 + $0x3c] sm:$0xff] %v1172_v14  ;;  %v1176_v19 = vpack.c.bf16 %v778_v15, %v777_v13  ;;  %v780_v20 = vmax.f32 %v699_v18, 0.0  ;;  %v786_v23 = vmax.f32 %v648_v17, 0.0 }
 0x122   : > { %v650_v21 = vpop.f32.mrf.mxu0  ;;  %v701_v22 = vpop.f32.mrf.mxu1  ;;  %v951_v45 = vld [vmem:[%s1518_s5 + $0x10] sm:$0xff] (%p1355_p5) }
 0x123   : > { %915 = vst [vmem:[%s1518_s5 + $0x58] sm:$0xff] %v1176_v19  ;;  %v1177_v24 = vpack.c.bf16 %v780_v20, %v779_v16  ;;  %v787_v25 = vmax.f32 %v650_v21, 0.0  ;;  %v788_v26 = vmax.f32 %v701_v22, 0.0  ;;  %952 = vst [vmem:[%s1553_s9 + $0x10] sm:$0xff] (%p1355_p5), %v951_v45 }
 0x124   : > { %v1201_v27 = vpop.f32.mrf.mxu0  ;;  %v703_v28 = vpop.f32.mrf.mxu1  ;;  %v953_v46 = vld [vmem:[%s1518_s5 + $0x18] sm:$0xff] (%p1355_p5) }
 0x125   : > { %916 = vst [vmem:[%s1518_s5 + $0x60] sm:$0xff] %v1177_v24  ;;  %v1181_v29 = vpack.c.bf16 %v787_v25, %v786_v23  ;;  %v781_v30 = vmax.f32 %v1201_v27, 0.0  ;;  %v789_v31 = vmax.f32 %v703_v28, 0.0  ;;  %954 = vst [vmem:[%s1553_s9 + $0x18] sm:$0xff] (%p1355_p5), %v953_v46 }
 0x126   : > { %v740_v32 = vpop.f32.mrf.mxu0  ;;  %v959_v49 = vld [vmem:[%s1518_s5 + $0x34] sm:$0xff] (%p1355_p5) }
 0x127   : > { %920 = vst [vmem:[%s1518_s5 + $0x7c] sm:$0xff] %v1181_v29  ;;  %v1178_v33 = vpack.c.bf16 %v781_v30, %v781_v30  ;;  %v1182_v34 = vpack.c.bf16 %v789_v31, %v788_v26  ;;  %v763_v35 = vmax.f32 %v740_v32, 0.0  ;;  %960 = vst [vmem:[%s1553_s9 + $0x58] sm:$0xff] (%p1355_p5), %v959_v49 }
 0x128   : > { %v1202_v36 = vpop.f32.mrf.mxu0  ;;  %v961_v50 = vld [vmem:[%s1518_s5 + $0x3c] sm:$0xff] (%p1355_p5) }
 0x129   : > { %917 = vst [vmem:[%s1518_s5 + $0x68] sm:$0xf] %v1178_v33  ;;  %921 = vst [vmem:[%s1518_s5 + $0x84] sm:$0xff] %v1182_v34  ;;  %v1168_v37 = vpack.c.bf16 %v763_v35, %v763_v35  ;;  %v790_v38 = vmax.f32 %v1202_v36, 0.0 }
 0x12a   : > { %v743_v39 = vpop.f32.mrf.mxu0  ;;  %962 = vst [vmem:[%s1553_s9 + $0x60] sm:$0xff] (%p1355_p5), %v961_v50  ;;  %v967_v53 = vld [vmem:[%s1518_s5 + $0x58] sm:$0xff] (%p1355_p5) }
 0x12b   : > { %907 = vst [vmem:[%s1518_s5 + $0x20] sm:$0xf] %v1168_v37  ;;  %v1183_v40 = vpack.c.bf16 %v790_v38, %v790_v38  ;;  %v772_v41 = vmax.f32 %v743_v39, 0.0  ;;  %929 = sbr.rel (!%p1355_p5) target bundleno = 312 (0x138), region = 58  ;;  %968 = vst [vmem:[%s1553_s9 + $0xa0] sm:$0xff] (%p1355_p5), %v967_v53 }
 0x12c   : > { %v969_v54 = vld [vmem:[%s1518_s5 + $0x60] sm:$0xff] (%p1355_p5) }
 0x12d   : > { %922 = vst [vmem:[%s1518_s5 + $0x8c] sm:$0xf] %v1183_v40  ;;  %v1173_v42 = vpack.c.bf16 %v772_v41, %v772_v41  ;;  %970 = vst [vmem:[%s1553_s9 + $0xa8] sm:$0xff] (%p1355_p5), %v969_v54 }
 0x12e   : > { %v975_v57 = vld [vmem:[%s1518_s5 + $0x7c] sm:$0xff] (%p1355_p5) }
 0x12f   : > { %912 = vst [vmem:[%s1518_s5 + $0x44] sm:$0xf] %v1173_v42  ;;  %976 = vst [vmem:[%s1553_s9 + $0xe8] sm:$0xff] (%p1355_p5), %v975_v57 }
 0x130   : > { %v977_v58 = vld [vmem:[%s1518_s5 + $0x84] sm:$0xff] }
 0x131   : > { %978 = vst [vmem:[%s1553_s9 + $0xf0] sm:$0xff] %v977_v58  ;;  %v1157_v61 = vld [vmem:[%s1518_s5 + $0x68] sm:$0xf] }
 0x132   : > { %v1153_v59 = vld [vmem:[%s1518_s5 + $0x20] sm:$0xf]  ;;  %1158 = vst [vmem:[%s1553_s9 + $0xb0] sm:$0xf] %v1157_v61 }
 0x133   : > { %1154 = vst [vmem:[%s1553_s9 + $0x20] sm:$0xf] %v1153_v59 }
 0x134   : > { %v1159_v62 = vld [vmem:[%s1518_s5 + $0x8c] sm:$0xf] }
 0x135   : > { %1160 = vst [vmem:[%s1553_s9 + $0xf8] sm:$0xf] %v1159_v62 }
 0x136   : > { %v1155_v60 = vld [vmem:[%s1518_s5 + $0x44] sm:$0xf] }
 0x137   : > { %1156 = vst [vmem:[%s1553_s9 + $0x68] sm:$0xf] %v1155_v60 }
 0x138 PF: > { %p9_p10 = scmp.ge.s32.totalorder %s1342_s13, 4   ;;  %s1603_s9 = smov %s1303_s10 }
 0x139   : > { %s1604_s10 = smov %s1353_s16  ;;  %s1605_s11 = smov %s1342_s13 }
 0x13a   :  { %11 = sbr.rel (!%p9_p10) target bundleno = 2 (0x2), region = 127 }

// kernel: _lambda_.11
= control target key start
LH: loop header
LB: loop body
LE: loop exit
PB: predicated region body
PF: predicated region fallthrough
CT: control target
= control target key end

     0   :  { %s1315_s9 = smov 0   ;;  %s1317_s10 = smov 0   ;;  %s1522_s0 = inlined_call_operand.vmem [shape: bf16[4,32], index: 0, kind: input, shape index: {}]   ;;  %s1523_s1 = inlined_call_operand.vmem [shape: bf16[32,8704], index: 1, kind: input, shape index: {}]   ;;  %s1524_s2 = inlined_call_operand.vmem [shape: f32[4,8704], index: 2, kind: output, shape index: {}]  }
   0x1   :  { %s1319_s11 = smov 0  }
   0x2 LB: > { %s1037_s12 = sadd.s32 4294967295, %s1295_s11   ;;  %s1332_s13 = sadd.s32 1, %s1295_s11   ;;  %s1295_s11 = sphi %s1319_s11, %s1527_s11   ;;  %s1291_s10 = sphi %s1317_s10, %s1526_s10   ;;  %s1287_s9 = sphi %s1315_s9, %s1525_s9  }
   0x3   : > { %s37_s14 = ssub.s32 %s1295_s11, %s1332_s13  ;;  %s40_s15 = sadd.s32 1, %s1291_s10 }
   0x4   : > { %p38_p0 = scmp.eq.s32.totalorder %s37_s14, 0  ;;  %p47_p1 = scmp.ne.s32.totalorder %s1291_s10, %s1287_s9 }
   0x5   : > { %p48_p2 = scmp.eq.s32.totalorder %s1295_s11, 0  ;;  %p1040_p4 = scmp.ge.s32.totalorder %s1295_s11, 4 }
   0x6   : > { %s1341_s16 = scalar_select %p38_p0, %s1291_s10, %s40_s15  }
   0x7   : > { %p49_p3 = por %p48_p2, %p47_p1  ;;  %102 = sbr.rel (%p1040_p4) target bundleno = 35 (0x23), region = 20 }
   0xc   : > { %105 = sbr.rel (!%p49_p3) target bundleno = 35 (0x23), region = 24  ;;  %s107_s17 = sand.u32 (%p49_p3), 1, %s1291_s10  }
   0xd   : > { %s1114_s18 = smul.u32 (%p49_p3), 68, %s1295_s11 }
   0xe   : > { %s1126_s19 = smul.u32 (%p49_p3), 272, %s107_s17 }
   0xf   : > { %s1349_s22 = scalar_lea.vmem (%p49_p3), %s1523_s1, %s1114_s18 }
  0x10   : > { %v127_v0 = vld [vmem:[%s1349_s22] sm:$0xff] (%p49_p3)  ;;  %v129_v1 = vld [vmem:[%s1349_s22 + $0x8] sm:$0xff] (%p49_p3)  ;;  %v131_v2 = vld [vmem:[%s1349_s22 + $0x10] sm:$0xff] (%p49_p3)  ;;  %s1354_s23 = scalar_lea.vmem (%p49_p3), [#allocation2], %s1126_s19 }
  0x11   : > { %128 = vst [vmem:[%s1354_s23] sm:$0xff] %v127_v0  ;;  %130 = vst [vmem:[%s1354_s23 + $0x8] sm:$0xff] %v129_v1  ;;  %v133_v3 = vld [vmem:[%s1349_s22 + $0x18] sm:$0xff]  ;;  %v135_v4 = vld [vmem:[%s1349_s22 + $0x20] sm:$0xff] }
  0x12   : > { %132 = vst [vmem:[%s1354_s23 + $0x10] sm:$0xff] %v131_v2  ;;  %v137_v5 = vld [vmem:[%s1349_s22 + $0x28] sm:$0xff]  ;;  %134 = vst [vmem:[%s1354_s23 + $0x18] sm:$0xff] %v133_v3  ;;  %v139_v6 = vld [vmem:[%s1349_s22 + $0x30] sm:$0xff] }
  0x13   : > { %136 = vst [vmem:[%s1354_s23 + $0x20] sm:$0xff] %v135_v4  ;;  %138 = vst [vmem:[%s1354_s23 + $0x28] sm:$0xff] %v137_v5  ;;  %v141_v7 = vld [vmem:[%s1349_s22 + $0x38] sm:$0xff]  ;;  %v143_v8 = vld [vmem:[%s1349_s22 + $0x110] sm:$0xff] }
  0x14   : > { %140 = vst [vmem:[%s1354_s23 + $0x30] sm:$0xff] %v139_v6  ;;  %142 = vst [vmem:[%s1354_s23 + $0x38] sm:$0xff] %v141_v7  ;;  %v145_v9 = vld [vmem:[%s1349_s22 + $0x118] sm:$0xff]  ;;  %v147_v10 = vld [vmem:[%s1349_s22 + $0x120] sm:$0xff] }
  0x15   : > { %144 = vst [vmem:[%s1354_s23 + $0x44] sm:$0xff] %v143_v8  ;;  %v149_v11 = vld [vmem:[%s1349_s22 + $0x128] sm:$0xff]  ;;  %146 = vst [vmem:[%s1354_s23 + $0x4c] sm:$0xff] %v145_v9  ;;  %v151_v12 = vld [vmem:[%s1349_s22 + $0x130] sm:$0xff] }
  0x16   : > { %148 = vst [vmem:[%s1354_s23 + $0x54] sm:$0xff] %v147_v10  ;;  %150 = vst [vmem:[%s1354_s23 + $0x5c] sm:$0xff] %v149_v11  ;;  %v153_v13 = vld [vmem:[%s1349_s22 + $0x138] sm:$0xff]  ;;  %v155_v14 = vld [vmem:[%s1349_s22 + $0x140] sm:$0xff] }
  0x17   : > { %152 = vst [vmem:[%s1354_s23 + $0x64] sm:$0xff] %v151_v12  ;;  %154 = vst [vmem:[%s1354_s23 + $0x6c] sm:$0xff] %v153_v13  ;;  %v157_v15 = vld [vmem:[%s1349_s22 + $0x148] sm:$0xff]  ;;  %v159_v16 = vld [vmem:[%s1349_s22 + $0x220] sm:$0xff] }
  0x18   : > { %156 = vst [vmem:[%s1354_s23 + $0x74] sm:$0xff] %v155_v14  ;;  %v161_v17 = vld [vmem:[%s1349_s22 + $0x228] sm:$0xff]  ;;  %158 = vst [vmem:[%s1354_s23 + $0x7c] sm:$0xff] %v157_v15  ;;  %v163_v18 = vld [vmem:[%s1349_s22 + $0x230] sm:$0xff] }
  0x19   : > { %160 = vst [vmem:[%s1354_s23 + $0x88] sm:$0xff] %v159_v16  ;;  %162 = vst [vmem:[%s1354_s23 + $0x90] sm:$0xff] %v161_v17  ;;  %v165_v19 = vld [vmem:[%s1349_s22 + $0x238] sm:$0xff]  ;;  %v167_v20 = vld [vmem:[%s1349_s22 + $0x240] sm:$0xff] }
  0x1a   : > { %164 = vst [vmem:[%s1354_s23 + $0x98] sm:$0xff] %v163_v18  ;;  %166 = vst [vmem:[%s1354_s23 + $0xa0] sm:$0xff] %v165_v19  ;;  %v169_v21 = vld [vmem:[%s1349_s22 + $0x248] sm:$0xff]  ;;  %v171_v22 = vld [vmem:[%s1349_s22 + $0x250] sm:$0xff] }
  0x1b   : > { %168 = vst [vmem:[%s1354_s23 + $0xa8] sm:$0xff] %v167_v20  ;;  %v173_v23 = vld [vmem:[%s1349_s22 + $0x258] sm:$0xff]  ;;  %170 = vst [vmem:[%s1354_s23 + $0xb0] sm:$0xff] %v169_v21  ;;  %v175_v24 = vld [vmem:[%s1349_s22 + $0x330] sm:$0xff] }
  0x1c   : > { %172 = vst [vmem:[%s1354_s23 + $0xb8] sm:$0xff] %v171_v22  ;;  %174 = vst [vmem:[%s1354_s23 + $0xc0] sm:$0xff] %v173_v23  ;;  %v177_v25 = vld [vmem:[%s1349_s22 + $0x338] sm:$0xff]  ;;  %v179_v26 = vld [vmem:[%s1349_s22 + $0x340] sm:$0xff] }
  0x1d   : > { %176 = vst [vmem:[%s1354_s23 + $0xcc] sm:$0xff] %v175_v24  ;;  %178 = vst [vmem:[%s1354_s23 + $0xd4] sm:$0xff] %v177_v25  ;;  %v181_v27 = vld [vmem:[%s1349_s22 + $0x348] sm:$0xff]  ;;  %v183_v28 = vld [vmem:[%s1349_s22 + $0x350] sm:$0xff] }
  0x1e   : > { %180 = vst [vmem:[%s1354_s23 + $0xdc] sm:$0xff] %v179_v26  ;;  %v185_v29 = vld [vmem:[%s1349_s22 + $0x358] sm:$0xff]  ;;  %182 = vst [vmem:[%s1354_s23 + $0xe4] sm:$0xff] %v181_v27  ;;  %v187_v30 = vld [vmem:[%s1349_s22 + $0x360] sm:$0xff] }
  0x1f   : > { %184 = vst [vmem:[%s1354_s23 + $0xec] sm:$0xff] %v183_v28  ;;  %186 = vst [vmem:[%s1354_s23 + $0xf4] sm:$0xff] %v185_v29  ;;  %v189_v31 = vld [vmem:[%s1349_s22 + $0x368] sm:$0xff]  ;;  %v1042_v32 = vld [vmem:[%s1349_s22 + $0x40] sm:$0xf] }
  0x20   : > { %188 = vst [vmem:[%s1354_s23 + $0xfc] sm:$0xff] %v187_v30  ;;  %190 = vst [vmem:[%s1354_s23 + $0x104] sm:$0xff] %v189_v31  ;;  %v1044_v33 = vld [vmem:[%s1349_s22 + $0x150] sm:$0xf]  ;;  %v1046_v34 = vld [vmem:[%s1349_s22 + $0x260] sm:$0xf] }
  0x21   : > { %1043 = vst [vmem:[%s1354_s23 + $0x40] sm:$0xf] %v1042_v32  ;;  %v1048_v35 = vld [vmem:[%s1349_s22 + $0x370] sm:$0xf]  ;;  %1045 = vst [vmem:[%s1354_s23 + $0x84] sm:$0xf] %v1044_v33 }
  0x22   : > { %1047 = vst [vmem:[%s1354_s23 + $0xc8] sm:$0xf] %v1046_v34  ;;  %1049 = vst [vmem:[%s1354_s23 + $0x10c] sm:$0xf] %v1048_v35 }
  0x23 PF: > { %p1050_p5 = scmp.ge.s32.totalorder %s1295_s11, 1  ;;  %p211_p6 = scmp.lt.s32.totalorder %s1295_s11, 5 }
  0x25   : > { %p212_p7 = pnand %p1050_p5, %p211_p6 }
  0x26   : > { %s218_s24 = sand.u32 (!%p212_p7), 1, %s1287_s9   ;;  %s240_s29 = smul.u32 (!%p212_p7), 17, %s1037_s12 }
  0x27   : > { %215 = sbr.rel (%p212_p7) target bundleno = 313 (0x139), region = 50 }
  0x28   : > { %s1127_s25 = smul.u32 (!%p212_p7), 272, %s218_s24  ;;  %p241_p8 = scmp.lt.s32.totalorder (!%p212_p7), %s240_s29, 67 }
  0x2a   : > { %s1430_s26 = scalar_lea.vmem (!%p212_p7), [#allocation2], %s1127_s25 }
  0x2c   : > { %v1297_v36 = vmov 0   ;;  %v1155_v37 = vld [vmem:[%s1430_s26 + $0x8c] ss:$68 sps:$4 sm:$0xff]   ;;  %v1157_v38 = vld [vmem:[%s1430_s26 + $0x94] ss:$68 sps:$4 sm:$0xff]   ;;  %vm456_vm0 = vcmask 261120  }
  0x2d   : > { %492 = vmatprep.mubr.bf16.mxu0 %v1297_v36  ;;  %533 = vmatprep.mubr.bf16.mxu1 %v1297_v36  ;;  %v1159_v39 = vld [vmem:[%s1430_s26 + $0x88] ss:$68 sps:$4 sm:$0xff]   ;;  %v1160_v40 = vld [vmem:[%s1430_s26 + $0x90] ss:$68 sps:$4 sm:$0xff]   ;;  %v1165_v43 = vld [vmem:[%s1430_s26] ss:$68 sps:$4 sm:$0xff]  }
  0x2e   : > { %472 = vmatprep.subr.bf16.mxu0 %v1155_v37  ;;  %513 = vmatprep.subr.bf16.mxu1 %v1157_v38  ;;  %v1161_v41 = vld [vmem:[%s1430_s26 + $0x4] ss:$68 sps:$4 sm:$0xff]   ;;  %v1163_v42 = vld [vmem:[%s1430_s26 + $0xc] ss:$68 sps:$4 sm:$0xff]   ;;  %v1169_v46 = vld [vmem:[%s1430_s26 + $0x9c] ss:$68 sps:$4 sm:$0xff]  }
  0x2f   : > { %473 = vmatpush1.bf16.msra.mxu0 %v1159_v39  ;;  %514 = vmatpush1.bf16.msra.mxu1 %v1160_v40  ;;  %v1166_v44 = vld [vmem:[%s1430_s26 + $0x8] ss:$68 sps:$4 sm:$0xff]   ;;  %v1443_v45 = vld [vmem:[%s1522_s0] sm:$0x3]  ;;  %v1167_v47 = vld [vmem:[%s1430_s26 + $0x98] ss:$68 sps:$4 sm:$0xff]  }
  0x30   : > { %474 = vmatprep.subr.bf16.mxu0 %v1161_v41  ;;  %515 = vmatprep.subr.bf16.mxu1 %v1163_v42  ;;  %v1172_v48 = vld [vmem:[%s1430_s26 + $0xa4] ss:$68 sps:$4 sm:$0xff]   ;;  %v1175_v50 = vld [vmem:[%s1430_s26 + $0x14] ss:$68 sps:$4 sm:$0xff]   ;;  %v1178_v51 = vld [vmem:[%s1430_s26 + $0x1c] ss:$68 sps:$4 sm:$0xff]  }
  0x31   : > { %v1170_v49 = vld [vmem:[%s1430_s26 + $0xa0] ss:$68 sps:$4 sm:$0xff]   ;;  %v1173_v52 = vld [vmem:[%s1430_s26 + $0x10] ss:$68 sps:$4 sm:$0xff]   ;;  %v1176_v53 = vld [vmem:[%s1430_s26 + $0x18] ss:$68 sps:$4 sm:$0xff]  }
  0x32   : > { %v1181_v54 = vld [vmem:[%s1430_s26 + $0xac] ss:$68 sps:$4 sm:$0xff]   ;;  %v1184_v55 = vld [vmem:[%s1430_s26 + $0xb4] ss:$68 sps:$4 sm:$0xff]   ;;  %v1187_v58 = vld [vmem:[%s1430_s26 + $0x24] ss:$68 sps:$4 sm:$0xff]  }
  0x33   : > { %475 = vmatpush1.bf16.msra.mxu0 %v1165_v43  ;;  %516 = vmatpush1.bf16.msra.mxu1 %v1166_v44  ;;  %v1179_v56 = vld [vmem:[%s1430_s26 + $0xa8] ss:$68 sps:$4 sm:$0xff]   ;;  %v1182_v57 = vld [vmem:[%s1430_s26 + $0xb0] ss:$68 sps:$4 sm:$0xff]   ;;  %v1185_v60 = vld [vmem:[%s1430_s26 + $0x20] ss:$68 sps:$4 sm:$0xff]  }
  0x34   : > { %554 = vmatprep.subr.bf16.mxu0 %v1169_v46  ;;  %595 = vmatprep.subr.bf16.mxu1 %v1172_v48  ;;  %v1190_v59 = vld [vmem:[%s1430_s26 + $0x2c] ss:$68 sps:$4 sm:$0xff]   ;;  %v1193_v62 = vld [vmem:[%s1430_s26 + $0xbc] ss:$68 sps:$4 sm:$0xff]   ;;  %v1196_v63 = vld [vmem:[%s1430_s26 + $0xc4] ss:$68 sps:$4 sm:$0xff]  }
  0x35   : > { %v1188_v61 = vld [vmem:[%s1430_s26 + $0x28] ss:$68 sps:$4 sm:$0xff]   ;;  %v1191_v0 = vld [vmem:[%s1430_s26 + $0xb8] ss:$68 sps:$4 sm:$0xff]   ;;  %v1194_v1 = vld [vmem:[%s1430_s26 + $0xc0] ss:$68 sps:$4 sm:$0xff]  }
  0x36   : > { %1086 = vmatmul.mubr.msk.bf16.vlgmr.msra.gmra.mxu0 %vm456_vm0, %v1443_v45  ;;  %1087 = vmatmul.mubr.msk.bf16.vlgmr.msra.gmra.mxu1 %vm456_vm0, %v1443_v45  ;;  %v1199_v2 = vld [vmem:[%s1430_s26 + $0x34] ss:$68 sps:$4 sm:$0xff]   ;;  %v1202_v3 = vld [vmem:[%s1430_s26 + $0x3c] ss:$68 sps:$4 sm:$0xff]   ;;  %v1203_v6 = vld [vmem:[%s1430_s26 + $0xc8] ss:$68 sps:$4 sm:$0xff]  }
  0x37   : > { %555 = vmatpush1.bf16.msra.mxu0 %v1167_v47  ;;  %596 = vmatpush1.bf16.msra.mxu1 %v1170_v49  ;;  %v1197_v4 = vld [vmem:[%s1430_s26 + $0x30] ss:$68 sps:$4 sm:$0xff]   ;;  %v1200_v5 = vld [vmem:[%s1430_s26 + $0x38] ss:$68 sps:$4 sm:$0xff]   ;;  %v1298_v7 = vmov 0.0   ;;  %vm1299_vm1 = vmmov 0  }
  0x38   : > { %556 = vmatprep.subr.bf16.mxu0 %v1175_v50  ;;  %597 = vmatprep.subr.bf16.mxu1 %v1178_v51  ;;  %v1204_v8 = vld [vmem:[%s1430_s26 + $0x40] ss:$68 sps:$4 sm:$0xff]   ;;  %s1529_s29 = smov (!%p241_p8, %s240_s29), 67 }
  0x39   : > { %574 = vmatprep.mubr.bf16.mxu0 %v1297_v36  ;;  %615 = vmatprep.mubr.bf16.mxu1 %v1297_v36  ;;  %s1051_s30 = sshll.u32 %s1529_s29, 2 }
  0x3a   : > { %s1501_s5 = scalar_lea.vmem %s1524_s2, %s1051_s30 }
  0x3b   : > { %557 = vmatpush1.bf16.msra.mxu0 %v1173_v52  ;;  %598 = vmatpush1.bf16.msra.mxu1 %v1176_v53 }
  0x3c   : > { %636 = vmatprep.subr.bf16.mxu0 %v1181_v54  ;;  %677 = vmatprep.subr.bf16.mxu1 %v1184_v55 }
  0x3e   : > { %1088 = vmatmul.mubr.msk.bf16.vlgmr.msra.gmra.mxu0 %vm456_vm0, %v1443_v45  ;;  %1089 = vmatmul.mubr.msk.bf16.vlgmr.msra.gmra.mxu1 %vm456_vm0, %v1443_v45 }
  0x3f   : > { %637 = vmatpush1.bf16.msra.mxu0 %v1179_v56  ;;  %678 = vmatpush1.bf16.msra.mxu1 %v1182_v57 }
  0x40   : > { %638 = vmatprep.subr.bf16.mxu0 %v1187_v58  ;;  %679 = vmatprep.subr.bf16.mxu1 %v1190_v59 }
  0x41   : > { %656 = vmatprep.mubr.bf16.mxu0 %v1297_v36  ;;  %697 = vmatprep.mubr.bf16.mxu1 %v1297_v36 }
  0x43   : > { %639 = vmatpush1.bf16.msra.mxu0 %v1185_v60  ;;  %680 = vmatpush1.bf16.msra.mxu1 %v1188_v61 }
  0x44   : > { %718 = vmatprep.subr.bf16.mxu0 %v1193_v62  ;;  %759 = vmatprep.subr.bf16.mxu1 %v1196_v63 }
  0x46   : > { %1090 = vmatmul.mubr.msk.bf16.vlgmr.msra.gmra.mxu0 %vm456_vm0, %v1443_v45  ;;  %1091 = vmatmul.mubr.msk.bf16.vlgmr.msra.gmra.mxu1 %vm456_vm0, %v1443_v45 }
  0x47   : > { %719 = vmatpush1.bf16.msra.mxu0 %v1191_v0  ;;  %760 = vmatpush1.bf16.msra.mxu1 %v1194_v1 }
  0x48   : > { %720 = vmatprep.subr.bf16.mxu0 %v1199_v2  ;;  %761 = vmatprep.subr.bf16.mxu1 %v1202_v3 }
  0x49   : > { %738 = vmatprep.mubr.bf16.mxu0 %v1297_v36  ;;  %779 = vmatprep.mubr.bf16.mxu1 %v1297_v36 }
  0x4b   : > { %721 = vmatpush1.bf16.msra.mxu0 %v1197_v4  ;;  %762 = vmatpush1.bf16.msra.mxu1 %v1200_v5 }
  0x4c   : > { %1118 = vmatprep.subr.bf16.mxu0 %v1298_v7 }
  0x4e   : > { %1092 = vmatmul.mubr.msk.bf16.vlgmr.msra.gmra.mxu0 %vm456_vm0, %v1443_v45  ;;  %1093 = vmatmul.mubr.msk.bf16.vlgmr.msra.gmra.mxu1 %vm456_vm0, %v1443_v45 }
  0x4f   : > { %1119 = vmatpush3.bf16.msra.mxu0 %v1203_v6  ;;  %1122 = vmatprep.mubr.msk.bf16.mxu0 %vm1299_vm1, %v1298_v7 }
  0x50   : > { %1120 = vmatprep.subr.bf16.mxu0 %v1298_v7 }
  0x53   : > { %1121 = vmatpush3.bf16.msra.mxu0 %v1204_v8 }
  0x56   : > { %1123 = vmatmul.mubr.msk.bf16.vlgmr.msra.gmra.mxu0 %vm456_vm0, %v1443_v45 }
  0xf6   : > { %v494_v9 = vpop.f32.mrf.mxu0  ;;  %v535_v10 = vpop.f32.mrf.mxu1 }
  0xf7   : > { %v1095_v11 = vmul.f32 -1.442695, %v494_v9  ;;  %v1097_v12 = vmul.f32 -1.442695, %v535_v10 }
  0xf8   : > { %v496_v13 = vpop.f32.mrf.mxu0  ;;  %v537_v14 = vpop.f32.mrf.mxu1 }
  0xf9   : > { %1205 = vpow2.f32 %v1095_v11  ;;  %v1096_v15 = vmul.f32 -1.442695, %v496_v13  ;;  %v1098_v16 = vmul.f32 -1.442695, %v537_v14 }
  0xfa   : > { %1207 = vpow2.f32 %v1097_v12  ;;  %v498_v17 = vpop.f32.mrf.mxu0  ;;  %v539_v18 = vpop.f32.mrf.mxu1 }
  0xfb   : > { %1209 = vpow2.f32 %v1096_v15 }
  0xfc   : > { %1211 = vpow2.f32 %v1098_v16  ;;  %v499_v19 = vpop.f32.mrf.mxu0  ;;  %v540_v20 = vpop.f32.mrf.mxu1 }
  0xfe   : > { %v576_v21 = vpop.f32.mrf.mxu0  ;;  %v617_v22 = vpop.f32.mrf.mxu1 }
  0xff   : > { %v1099_v23 = vmul.f32 -1.442695, %v576_v21  ;;  %v1101_v24 = vmul.f32 -1.442695, %v617_v22 }
 0x100   : > { %v578_v25 = vpop.f32.mrf.mxu0  ;;  %v619_v26 = vpop.f32.mrf.mxu1 }
 0x101   : > { %1213 = vpow2.f32 %v1099_v23  ;;  %v1100_v27 = vmul.f32 -1.442695, %v578_v25  ;;  %v1102_v28 = vmul.f32 -1.442695, %v619_v26 }
 0x102   : > { %1215 = vpow2.f32 %v1101_v24  ;;  %v580_v29 = vpop.f32.mrf.mxu0  ;;  %v621_v30 = vpop.f32.mrf.mxu1 }
 0x103   : > { %1217 = vpow2.f32 %v1100_v27 }
 0x104   : > { %1219 = vpow2.f32 %v1102_v28  ;;  %v581_v31 = vpop.f32.mrf.mxu0  ;;  %v622_v32 = vpop.f32.mrf.mxu1 }
 0x106   : > { %v1206_v33 = vpop.eup %1205  ;;  %v658_v34 = vpop.f32.mrf.mxu0 }
 0x107   : > { %v699_v35 = vpop.f32.mrf.mxu1  ;;  %v1208_v36 = vpop.eup %1207  ;;  %v879_v37 = vadd.f32 1.0, %v1206_v33  ;;  %v1103_v44 = vmul.f32 -1.442695, %v658_v34 }
 0x108   : > { %v1210_v38 = vpop.eup %1209  ;;  %v881_v39 = vadd.f32 1.0, %v1208_v36  ;;  %v660_v40 = vpop.f32.mrf.mxu0  ;;  %v1105_v46 = vmul.f32 -1.442695, %v699_v35 }
 0x109   : > { %v701_v41 = vpop.f32.mrf.mxu1  ;;  %v1212_v42 = vpop.eup %1211  ;;  %1221 = vrcp.f32 %v879_v37  ;;  %v880_v43 = vadd.f32 1.0, %v1210_v38  ;;  %v1104_v49 = vmul.f32 -1.442695, %v660_v40 }
 0x10a   : > { %1223 = vrcp.f32 %v881_v39  ;;  %v882_v45 = vadd.f32 1.0, %v1212_v42  ;;  %v662_v47 = vpop.f32.mrf.mxu0  ;;  %v1106_v50 = vmul.f32 -1.442695, %v701_v41 }
 0x10b   : > { %v703_v48 = vpop.f32.mrf.mxu1  ;;  %1225 = vrcp.f32 %v880_v43 }
 0x10c   : > { %1227 = vrcp.f32 %v882_v45  ;;  %v663_v51 = vpop.f32.mrf.mxu0 }
 0x10d   : > { %v704_v52 = vpop.f32.mrf.mxu1  ;;  %1229 = vpow2.f32 %v1103_v44 }
 0x10e   : > { %v1214_v53 = vpop.eup %1213  ;;  %1231 = vpow2.f32 %v1105_v46  ;;  %v740_v54 = vpop.f32.mrf.mxu0 }
 0x10f   : > { %v781_v55 = vpop.f32.mrf.mxu1  ;;  %v1216_v56 = vpop.eup %1215  ;;  %v883_v57 = vadd.f32 1.0, %v1214_v53  ;;  %1233 = vpow2.f32 %v1104_v49  ;;  %v1107_v0 = vmul.f32 -1.442695, %v740_v54 }
 0x110   : > { %v1218_v58 = vpop.eup %1217  ;;  %v885_v59 = vadd.f32 1.0, %v1216_v56  ;;  %1235 = vpow2.f32 %v1106_v50  ;;  %v742_v60 = vpop.f32.mrf.mxu0  ;;  %v1109_v2 = vmul.f32 -1.442695, %v781_v55 }
 0x111   : > { %v783_v61 = vpop.f32.mrf.mxu1  ;;  %v1220_v62 = vpop.eup %1219  ;;  %1237 = vrcp.f32 %v883_v57  ;;  %v884_v63 = vadd.f32 1.0, %v1218_v58  ;;  %v1108_v5 = vmul.f32 -1.442695, %v742_v60 }
 0x112   : > { %1239 = vrcp.f32 %v885_v59  ;;  %v886_v1 = vadd.f32 1.0, %v1220_v62  ;;  %v744_v3 = vpop.f32.mrf.mxu0  ;;  %v1110_v6 = vmul.f32 -1.442695, %v783_v61 }
 0x113   : > { %v785_v4 = vpop.f32.mrf.mxu1  ;;  %1241 = vrcp.f32 %v884_v63 }
 0x114   : > { %1243 = vrcp.f32 %v886_v1  ;;  %v745_v7 = vpop.f32.mrf.mxu0 }
 0x115   : > { %v786_v8 = vpop.f32.mrf.mxu1  ;;  %1245 = vpow2.f32 %v1107_v0 }
 0x116   : > { %v1222_v9 = vpop.eup %1221  ;;  %1247 = vpow2.f32 %v1109_v2  ;;  %v822_v10 = vpop.f32.mrf.mxu0 }
 0x117   : > { %v1224_v11 = vpop.eup %1223  ;;  %1249 = vpow2.f32 %v1108_v5  ;;  %v1111_v12 = vmul.f32 -1.442695, %v822_v10 }
 0x118   : > { %v1226_v13 = vpop.eup %1225  ;;  %1251 = vpow2.f32 %v1110_v6  ;;  %v1124_v14 = vpop.f32.mrf.mxu0 }
 0x119   : > { %v1228_v15 = vpop.eup %1227  ;;  %v946_v16 = vcombine.low %v1222_v9, %v1226_v13  ;;  %1253 = vpow2.f32 %v1111_v12 }
 0x11a   : > { %v1230_v17 = vpop.eup %1229  ;;  %v947_v18 = vcombine.low %v1224_v11, %v1228_v15  ;;  %v825_v19 = vpop.f32.mrf.mxu0 }
 0x11b   : > { %v1232_v20 = vpop.eup %1231  ;;  %962 = vst [vmem:[%s1501_s5] sm:$0xff] %v946_v16  ;;  %v887_v21 = vadd.f32 1.0, %v1230_v17 }
 0x11c   : > { %v1234_v22 = vpop.eup %1233  ;;  %963 = vst [vmem:[%s1501_s5 + $0x8] sm:$0xff] %v947_v18  ;;  %v889_v23 = vadd.f32 1.0, %v1232_v20  ;;  %v1125_v24 = vpop.f32.mrf.mxu0 }
 0x11d   : > { %v1236_v25 = vpop.eup %1235  ;;  %1255 = vrcp.f32 %v887_v21  ;;  %v888_v26 = vadd.f32 1.0, %v1234_v22 }
 0x11e   : > { %v1238_v27 = vpop.eup %1237  ;;  %1257 = vrcp.f32 %v889_v23  ;;  %v890_v28 = vadd.f32 1.0, %v1236_v25 }
 0x11f   : > { %v1240_v29 = vpop.eup %1239  ;;  %1259 = vrcp.f32 %v888_v26 }
 0x120   : > { %v1242_v30 = vpop.eup %1241  ;;  %1261 = vrcp.f32 %v890_v28 }
 0x121   : > { %v1244_v31 = vpop.eup %1243  ;;  %v948_v32 = vcombine.low %v1238_v27, %v1242_v30 }
 0x122   : > { %v1246_v33 = vpop.eup %1245  ;;  %v949_v34 = vcombine.low %v1240_v29, %v1244_v31 }
 0x123   : > { %v1248_v35 = vpop.eup %1247  ;;  %964 = vst [vmem:[%s1501_s5 + $0x10] sm:$0xff] %v948_v32  ;;  %v891_v36 = vadd.f32 1.0, %v1246_v33 }
 0x124   : > { %v1250_v37 = vpop.eup %1249  ;;  %965 = vst [vmem:[%s1501_s5 + $0x18] sm:$0xff] %v949_v34  ;;  %v893_v38 = vadd.f32 1.0, %v1248_v35 }
 0x125   : > { %v1252_v39 = vpop.eup %1251  ;;  %1263 = vrcp.f32 %v891_v36  ;;  %v892_v40 = vadd.f32 1.0, %v1250_v37 }
 0x126   : > { %v1254_v41 = vpop.eup %1253  ;;  %1265 = vrcp.f32 %v893_v38  ;;  %v894_v42 = vadd.f32 1.0, %v1252_v39 }
 0x127   : > { %1267 = vrcp.f32 %v892_v40  ;;  %v895_v43 = vadd.f32 1.0, %v1254_v41 }
 0x128   : > { %1269 = vrcp.f32 %v894_v42 }
 0x129   : > { %1271 = vrcp.f32 %v895_v43 }
 0x12a   : > { %v1256_v44 = vpop.eup %1255 }
 0x12b   : > { %v1258_v45 = vpop.eup %1257 }
 0x12c   : > { %v1260_v46 = vpop.eup %1259 }
 0x12d   : > { %v1262_v47 = vpop.eup %1261  ;;  %v950_v48 = vcombine.low %v1256_v44, %v1260_v46 }
 0x12e   : > { %v951_v49 = vcombine.low %v1258_v45, %v1262_v47 }
 0x12f   : > { %966 = vst [vmem:[%s1501_s5 + $0x20] sm:$0xff] %v950_v48 }
 0x130   : > { %967 = vst [vmem:[%s1501_s5 + $0x28] sm:$0xff] %v951_v49 }
 0x132   : > { %v1264_v50 = vpop.eup %1263 }
 0x133   : > { %v1266_v51 = vpop.eup %1265 }
 0x134   : > { %v1268_v52 = vpop.eup %1267 }
 0x135   : > { %v1270_v53 = vpop.eup %1269  ;;  %v952_v54 = vcombine.low %v1264_v50, %v1268_v52 }
 0x136   : > { %v1272_v55 = vpop.eup %1271  ;;  %v953_v56 = vcombine.low %v1266_v51, %v1270_v53 }
 0x137   : > { %968 = vst [vmem:[%s1501_s5 + $0x30] sm:$0xff] %v952_v54  ;;  %970 = vst [vmem:[%s1501_s5 + $0x40] sm:$0xf] %v1272_v55 }
 0x138   : > { %969 = vst [vmem:[%s1501_s5 + $0x38] sm:$0xff] %v953_v56 }
 0x139 PF: > { %p9_p9 = scmp.ge.s32.totalorder %s1332_s13, 6   ;;  %s1525_s9 = smov %s1291_s10 }
 0x13a   : > { %s1526_s10 = smov %s1341_s16  ;;  %s1527_s11 = smov %s1332_s13 }
 0x13b   :  { %11 = sbr.rel (!%p9_p9) target bundleno = 2 (0x2), region = 95 }

</bundles_post_ra>
